<compile_context>
chip_gen: v6e
topology: v6e:2x2x1
jax: 0.10.0
libtpu: 0.0.40
codegen_flags: <defaults>
</compile_context>

<pallas_src>
import functools

import jax
import jax.numpy as jnp
from jax.experimental import pallas as pl
from jax.experimental.pallas import tpu as pltpu

HIDDEN_DIM = 32          # self_embed_dim / hidden_dim_fx / hidden_dim_fy
NEIGHBOR_EMBED = 128
FEATURE_DIM = 256
OB_RADIUS = 2.0
HORIZON = 12             # stored by the module, unused in forward

_VMEM_LIMIT = 32 * 1024 * 1024   # safe scoped-VMEM budget on v5e/v6e/v7x
_ENC_TN = 64                     # max batch rows per encoder grid block


def _relu6(x):
    return jnp.clip(x, 0.0, 6.0)


# ---------------------------------------------------------------------------
# Fused multi-layer MLP: one pallas_call, row-tiled, all layers chained in VMEM
# ---------------------------------------------------------------------------
def _fused_mlp_kernel(*refs, nlayers, acts):
    x_ref = refs[0]
    out_ref = refs[-1]
    h = x_ref[...].astype(jnp.float32)
    for li in range(nlayers):
        w = refs[1 + 2 * li][...]
        b = refs[2 + 2 * li][...]
        h = jnp.dot(h, w, preferred_element_type=jnp.float32) + b
        if acts[li] == "relu6":
            h = _relu6(h)
    out_ref[...] = h.astype(out_ref.dtype)


def fused_mlp(x, layers, acts, tm=1024):
    """y = act_n(...act_0(x @ W0 + b0)...) computed in a single Pallas kernel.

    layers: sequence of (W, b); W is (din, dout), b is (dout,) or None.
    Rows are tiled with TM rows; the grid axis is "parallel" (pipelined,
    shards across TensorCores on v7x).  Rows are independent, so boundary
    padding is harmless (no cross-row reductions inside the kernel).
    """
    *lead, din = x.shape
    x2 = x.reshape(-1, din)
    m = x2.shape[0]
    dout = layers[-1][0].shape[1]

    tm_eff = m if m <= tm else tm
    grid = (pl.cdiv(m, tm_eff),)

    flat_args = [x2]
    in_specs = [pl.BlockSpec((tm_eff, din), lambda i: (i, 0))]
    for (w, b) in layers:
        d_o = w.shape[1]
        if b is None:
            b = jnp.zeros((d_o,), x.dtype)
        flat_args.append(w)
        flat_args.append(b.reshape(1, d_o))
        in_specs.append(pl.BlockSpec(w.shape, lambda i: (0, 0)))
        in_specs.append(pl.BlockSpec((1, d_o), lambda i: (0, 0)))

    out = pl.pallas_call(
        functools.partial(_fused_mlp_kernel, nlayers=len(layers), acts=tuple(acts)),
        grid=grid,
        in_specs=in_specs,
        out_specs=pl.BlockSpec((tm_eff, dout), lambda i: (i, 0)),
        out_shape=jax.ShapeDtypeStruct((m, dout), x.dtype),
        compiler_params=pltpu.CompilerParams(
            dimension_semantics=("parallel",),
            vmem_limit_bytes=_VMEM_LIMIT),
    )(*flat_args)
    return out.reshape(*lead, dout)


# ---------------------------------------------------------------------------
# Fused recurrent encoder:
#   embed_k + embed_n + embed_q MLPs + neighbor attention + GRU per timestep,
#   one pallas_call over grid=(N/TN, L1); h lives in a VMEM scratch.
# ---------------------------------------------------------------------------
def _encoder_kernel(h0_ref, feat_ref, dpdv_ref, mask_ref, smeta_ref,
                    wk0, bk0, wk1, bk1, wk2, bk2,
                    wn0, bn0, wn1, bn1, wn2, bn2,
                    wq0, bq0, wq1, bq1, wq2, bq2,
                    wih_a, wih_s, whh, bih, bhh,
                    h_out_ref, h_scr):
    t = pl.program_id(1)

    @pl.when(t == 0)
    def _():
        h_scr[...] = h0_ref[...].astype(jnp.float32)

    h = h_scr[...]                                          # (TN, H) f32
    TN, H = h.shape
    Nn = mask_ref.shape[-1]

    # --- embed_q: 3-layer MLP on the current hidden state ---
    q = _relu6(jnp.dot(h, wq0[...], preferred_element_type=jnp.float32) + bq0[...])
    q = _relu6(jnp.dot(q, wq1[...], preferred_element_type=jnp.float32) + bq1[...])
    q = jnp.dot(q, wq2[...], preferred_element_type=jnp.float32) + bq2[...]   # (TN, F)

    # --- embed_k on the streamed raw features (flattened neighbors) ---
    kf = feat_ref[0].astype(jnp.float32)                    # (TN*Nn, 3)
    k = _relu6(jnp.dot(kf, wk0[...], preferred_element_type=jnp.float32) + bk0[...])
    k = _relu6(jnp.dot(k, wk1[...], preferred_element_type=jnp.float32) + bk1[...])
    k = jnp.dot(k, wk2[...], preferred_element_type=jnp.float32) + bk2[...]   # (TN*Nn, F)

    # --- embed_n on the streamed (dp, dv) ---
    nf = dpdv_ref[0].astype(jnp.float32)                    # (TN*Nn, 4)
    nb = _relu6(jnp.dot(nf, wn0[...], preferred_element_type=jnp.float32) + bn0[...])
    nb = _relu6(jnp.dot(nb, wn1[...], preferred_element_type=jnp.float32) + bn1[...])
    nb = jnp.dot(nb, wn2[...], preferred_element_type=jnp.float32) + bn2[...]  # (TN*Nn, E)

    F = k.shape[-1]
    E = nb.shape[-1]
    k3 = k.reshape(TN, Nn, F)                               # Nn is a multiple of 8 -> layout-preserving
    nb3 = nb.reshape(TN, Nn, E)
    mask = mask_ref[0]                                      # (TN, Nn) float {0,1}

    # --- neighbor attention for this timestep ---
    e = jnp.sum(k3 * q[:, None, :], axis=-1)                # (TN, Nn)  == k @ q
    e = jnp.where(e >= 0.0, e, 0.2 * e)                     # LeakyReLU(0.2)
    valid = mask > 0.0
    e = jnp.where(valid, e, jnp.float32(-1e30))             # finite sentinel (no NaN traps)
    mmax = jnp.max(e, axis=-1, keepdims=True)
    pexp = jnp.where(valid, jnp.exp(e - mmax), 0.0)
    denom = jnp.sum(pexp, axis=-1, keepdims=True)
    att = jnp.where(denom > 0.0, pexp / jnp.maximum(denom, 1e-30), 0.0)
    # weighted sum on the MXU: (TN batched) (1, Nn) @ (Nn, E)
    x_att = jnp.einsum("nqk,nkd->nqd", att[:, None, :], nb3,
                       preferred_element_type=jnp.float32)[:, 0, :]           # (TN, E)

    smeta = smeta_ref[0].astype(jnp.float32)                # (TN, H) == -s[t]*meta_weight[t]

    # --- GRU cell with packed gates [r|z|n] along a 3H output ---
    gi = (jnp.dot(x_att, wih_a[...], preferred_element_type=jnp.float32)
          + jnp.dot(smeta, wih_s[...], preferred_element_type=jnp.float32)
          + bih[...])                                       # (TN, 3H)
    gh = jnp.dot(h, whh[...], preferred_element_type=jnp.float32) + bhh[...]
    r = jax.nn.sigmoid(gi[:, :H] + gh[:, :H])
    z = jax.nn.sigmoid(gi[:, H:2 * H] + gh[:, H:2 * H])
    ng = jnp.tanh(gi[:, 2 * H:] + r * gh[:, 2 * H:])
    h_new = (1.0 - z) * ng + z * h

    h_scr[...] = h_new
    h_out_ref[...] = h_new.astype(h_out_ref.dtype)


def recurrent_encoder(p, h_init, feat_flat, dpdv_flat, mask_f, smeta):
    L1, N, Nn = mask_f.shape
    H = h_init.shape[-1]
    E = p["embed_n"][-1][0].shape[1]
    fdim = feat_flat.shape[-1]
    ddim = dpdv_flat.shape[-1]

    TN = N if N <= _ENC_TN else _ENC_TN
    n_blocks = pl.cdiv(N, TN)

    def b2(b):
        return b.reshape(1, -1)

    (wk0, bk0), (wk1, bk1), (wk2, bk2) = p["embed_k"]
    (wn0, bn0), (wn1, bn1), (wn2, bn2) = p["embed_n"]
    (wq0, bq0), (wq1, bq1), (wq2, bq2) = p["embed_q"]
    wih = p["gru_wih"]                                      # (E + H, 3H), rows = [x_att | smeta]
    wih_a, wih_s = wih[:E], wih[E:]
    whh, bih, bhh = p["gru_whh"], p["gru_bih"], p["gru_bhh"]

    weights = [wk0, b2(bk0), wk1, b2(bk1), wk2, b2(bk2),
               wn0, b2(bn0), wn1, b2(bn1), wn2, b2(bn2),
               wq0, b2(bq0), wq1, b2(bq1), wq2, b2(bq2),
               wih_a, wih_s, whh, bih, bhh]

    def const_spec(shape):
        return pl.BlockSpec(shape, lambda n, t: (0, 0))

    in_specs = [
        pl.BlockSpec((TN, H), lambda n, t: (n, 0)),                 # h_init (per N block)
        pl.BlockSpec((1, TN * Nn, fdim), lambda n, t: (t, n, 0)),   # raw features, streamed per t
        pl.BlockSpec((1, TN * Nn, ddim), lambda n, t: (t, n, 0)),   # (dp, dv), streamed per t
        pl.BlockSpec((1, TN, Nn), lambda n, t: (t, n, 0)),          # mask
        pl.BlockSpec((1, TN, H), lambda n, t: (t, n, 0)),           # smeta
    ] + [const_spec(w.shape) for w in weights]                      # resident weights

    return pl.pallas_call(
        _encoder_kernel,
        grid=(n_blocks, L1),
        in_specs=in_specs,
        out_specs=pl.BlockSpec((TN, H), lambda n, t: (n, 0)),
        out_shape=jax.ShapeDtypeStruct((N, H), h_init.dtype),
        scratch_shapes=[pltpu.VMEM((TN, H), jnp.float32)],
        compiler_params=pltpu.CompilerParams(
            dimension_semantics=("parallel", "arbitrary"),
            vmem_limit_bytes=_VMEM_LIMIT),
    )(h_init, feat_flat, dpdv_flat, mask_f, smeta, *weights)


# ---------------------------------------------------------------------------
# Parameters (deterministic synthetic init, torch-like uniform(-1/sqrt(fanin)))
# ---------------------------------------------------------------------------
def _init_linear(key, din, dout, bias=True):
    k1, k2 = jax.random.split(key)
    bound = 1.0 / (din ** 0.5)
    w = jax.random.uniform(k1, (din, dout), jnp.float32, -bound, bound)
    b = jax.random.uniform(k2, (dout,), jnp.float32, -bound, bound) if bias else None
    return w, b


def init_params(key, hidden_dim=HIDDEN_DIM):
    H = hidden_dim
    keys = jax.random.split(key, 32)
    it = iter(keys)

    def lin(din, dout, bias=True):
        return _init_linear(next(it), din, dout, bias)

    params = {
        "embed_s": [lin(4, 64), lin(64, H)],
        "embed_n": [lin(4, 64), lin(64, NEIGHBOR_EMBED), lin(NEIGHBOR_EMBED, NEIGHBOR_EMBED)],
        "embed_k": [lin(3, FEATURE_DIM), lin(FEATURE_DIM, FEATURE_DIM), lin(FEATURE_DIM, FEATURE_DIM)],
        "embed_q": [lin(H, FEATURE_DIM), lin(FEATURE_DIM, FEATURE_DIM), lin(FEATURE_DIM, FEATURE_DIM)],
        "rnn_fx_init": [lin(2, H), lin(H, H), lin(H, H)],
        "rnn_fy_init": [lin(H, H), lin(H, H)],
        "reg_head": [lin(H, 2 * H), lin(2 * H, 12 * 20 * 2)],
        "values": lin(H, H, bias=False),   # kept for parity; unused in forward (matches torch)
        "keys": lin(H, H, bias=False),
        "queries": lin(H, H, bias=False),
    }
    # GRU rnn_fx: input = neighbor_embed + self_embed, hidden = H.
    # Gates are packed along the output dim: [r | z | n] -> 3H lanes.
    din = NEIGHBOR_EMBED + H
    bound = 1.0 / (H ** 0.5)
    kg = jax.random.split(next(it), 4)
    params["gru_wih"] = jax.random.uniform(kg[0], (din, 3 * H), jnp.float32, -bound, bound)
    params["gru_whh"] = jax.random.uniform(kg[1], (H, 3 * H), jnp.float32, -bound, bound)
    params["gru_bih"] = jax.random.uniform(kg[2], (1, 3 * H), jnp.float32, -bound, bound)
    params["gru_bhh"] = jax.random.uniform(kg[3], (1, 3 * H), jnp.float32, -bound, bound)
    return params


# ---------------------------------------------------------------------------
# Forward pass (mirrors MetaPTP.forward with y=None)
# ---------------------------------------------------------------------------
def meta_ptp_forward(p, x, neighbor, ob_radius=OB_RADIUS):
    L, N, _ = x.shape
    neighbor = neighbor[:L]
    Nn = neighbor.shape[2]
    state = x
    pos = state[..., :2]                                    # (L, N, 2)
    L1 = L - 1

    # ---- no_grad geometric feature block (plain JAX glue) ----
    v = pos[1:] - pos[:-1]                                  # (L1, N, 2)
    a = v[1:] - v[:-1]                                      # (L1-1, N, 2)
    a = jnp.concatenate([state[1:2, :, 4:6], a], axis=0)    # (L1, N, 2)
    neighbor_x = neighbor[..., :2]                          # (L, N, Nn, 2)
    neighbor_v = neighbor[1:, ..., 2:4]                     # (L1, N, Nn, 2)
    dp = neighbor_x - pos[:, :, None, :]                    # (L, N, Nn, 2)
    dv = neighbor_v - v[:, :, None, :]                      # (L1, N, Nn, 2)
    dist = jnp.linalg.norm(dp, axis=-1)                     # (L, N, Nn)
    mask = dist <= ob_radius
    dp0, mask0 = dp[0], mask[0]
    dp, mask = dp[1:], mask[1:]
    dist = dist[1:]
    dot_dp_v = jnp.sum(dp * v[:, :, None, :], axis=-1)      # (L1, N, Nn)
    v_norm = jnp.linalg.norm(v, axis=-1)                    # (L1, N)
    bearing = dot_dp_v / (dist * v_norm[:, :, None])
    bearing = jnp.nan_to_num(bearing, nan=0.0, posinf=0.0, neginf=0.0)
    dot_dp_dv = jnp.sum(dp * dv, axis=-1)
    dv_norm = jnp.linalg.norm(dv, axis=-1)
    tau = -dot_dp_dv / dv_norm                              # matches torch: -dot/|dv|
    tau = jnp.clip(jnp.nan_to_num(tau, nan=0.0, posinf=0.0, neginf=0.0), 0.0, 7.0)
    mpd = jnp.linalg.norm(dp + tau[..., None] * dv, axis=-1)
    features = jnp.stack([dist, bearing, mpd], axis=-1)     # (L1, N, Nn, 3)
    dpdv = jnp.concatenate([dp, dv], axis=-1)               # (L1, N, Nn, 4)
    mask_f = mask.astype(x.dtype)                           # (L1, N, Nn)

    # Pad Nn to a sublane multiple (>= 8) so every streamed encoder tile is
    # dense, then flatten neighbors so (N*Nn) sits in the sublane axis.
    Nn_pad = max(8, -(-Nn // 8) * 8)
    if Nn_pad != Nn:
        padw = [(0, 0), (0, 0), (0, Nn_pad - Nn), (0, 0)]
        features = jnp.pad(features, padw)
        dpdv = jnp.pad(dpdv, padw)
        mask_f = jnp.pad(mask_f, [(0, 0), (0, 0), (0, Nn_pad - Nn)])
    feat_flat = features.reshape(L1, N * Nn_pad, 3)
    dpdv_flat = dpdv.reshape(L1, N * Nn_pad, 4)

    # ---- embed_s fused with keys/queries projections (single pallas_call) ----
    # keys(s) = relu6(x@W0+b0) @ (W1@Wk) + b1@Wk  (no nonlinearity after embed_s)
    H = p["embed_s"][1][0].shape[1]
    (ws0, bs0), (ws1, bs1) = p["embed_s"]
    wk_meta = p["keys"][0]
    wq_meta = p["queries"][0]
    w1_big = jnp.concatenate([ws1, ws1 @ wk_meta, ws1 @ wq_meta], axis=1)   # (64, 3H)
    b1_big = jnp.concatenate([bs1, bs1 @ wk_meta, bs1 @ wq_meta], axis=0)   # (3H,)
    skq = fused_mlp(jnp.concatenate([v, a], -1),
                    [(ws0, bs0), (w1_big, b1_big)], acts=("relu6", None))   # (L1, N, 3H)
    s_feat = skq[..., :H]
    keys = skq[..., H:2 * H]
    qrys = skq[..., 2 * H:]

    # ---- meta attention weight (heads = 1); dead `values` projection dropped ----
    # energy.sum(-1) == q . (sum over key-times of k); computed in (L1, N, H)
    # layout so no transposes are needed.
    keys_sum = jnp.sum(keys, axis=0)                        # (N, H)
    score = jnp.sum(qrys * keys_sum[None, :, :], axis=-1) / jnp.sqrt(jnp.float32(H))
    smeta = s_feat * score[..., None]                       # == -s[t] * meta_weight[t]

    # ---- initial hidden state ----
    h0_all = fused_mlp(dp0, p["rnn_fx_init"], acts=("relu6", "relu6", None))   # (N, Nn, H)
    h_init = jnp.sum(mask0[..., None].astype(x.dtype) * h0_all, axis=-2)       # (N, H)

    # ---- fused recurrent encoder (embed_k/embed_n/embed_q + attn + GRU) ----
    h_enc = recurrent_encoder(p, h_init, feat_flat, dpdv_flat, mask_f, smeta)  # (N, H)

    # ---- decoder head: rnn_fy_init + reg_head fused into one kernel ----
    head_layers = list(p["rnn_fy_init"]) + list(p["reg_head"])
    pred = fused_mlp(h_enc, head_layers, acts=("relu6", None, "relu6", None))  # (N, 480)
    pred = pred.reshape(N, 20, 12, 2)
    pred = jnp.cumsum(pred, axis=2)
    endpoint = state[-1, :, :2]                             # (N, 2)
    pred = pred + endpoint[:, None, None, :]
    return pred
    # TODO(synk): rnn_fy, rnn_by, wo_meta and the loss helpers are dead code in
    # the reference forward (y=None) and are intentionally not ported.


if __name__ == "__main__":
    key = jax.random.PRNGKey(0)
    kp, kx, kn = jax.random.split(key, 3)
    L, N, Nn = 8, 2, 4
    params = init_params(kp, hidden_dim=HIDDEN_DIM)
    x = jax.random.normal(kx, (L, N, 6), jnp.float32)
    neighbor = jax.random.normal(kn, (L, N, Nn, 6), jnp.float32)

    fwd = jax.jit(meta_ptp_forward)
    out = jax.block_until_ready(fwd(params, x, neighbor))
    assert out.shape == (N, 20, 12, 2), out.shape
    assert bool(jnp.all(jnp.isfinite(out)))
    print("KERNEL_OK")
</pallas_src>

<mosaic_0001>
module attributes {stable_mosaic.version = 11 : i64} {
  func.func @_fused_mlp_kernel(%arg0: i32, %arg1: memref<8x2xf32, #tpu.memory_space<vmem>>, %arg2: memref<2x32xf32, #tpu.memory_space<vmem>>, %arg3: memref<1x32xf32, #tpu.memory_space<vmem>>, %arg4: memref<32x32xf32, #tpu.memory_space<vmem>>, %arg5: memref<1x32xf32, #tpu.memory_space<vmem>>, %arg6: memref<32x32xf32, #tpu.memory_space<vmem>>, %arg7: memref<1x32xf32, #tpu.memory_space<vmem>>, %arg8: memref<8x32xf32, #tpu.memory_space<vmem>>) attributes {dimension_semantics = [#tpu.dimension_semantics<parallel>], iteration_bounds = array<i64: 1>, scalar_prefetch = 0 : i64, scratch_operands = 0 : i64, tpu.core_type = #tpu.core_type<tc>, window_params = [{transform_indices = @transform_0, window_bounds = array<i64: 8, 2>}, {pipeline_mode = #tpu.pipeline_mode<synchronous>, transform_indices = @transform_1, window_bounds = array<i64: 2, 32>}, {pipeline_mode = #tpu.pipeline_mode<synchronous>, transform_indices = @transform_2, window_bounds = array<i64: 1, 32>}, {pipeline_mode = #tpu.pipeline_mode<synchronous>, transform_indices = @transform_3, window_bounds = array<i64: 32, 32>}, {pipeline_mode = #tpu.pipeline_mode<synchronous>, transform_indices = @transform_4, window_bounds = array<i64: 1, 32>}, {pipeline_mode = #tpu.pipeline_mode<synchronous>, transform_indices = @transform_5, window_bounds = array<i64: 32, 32>}, {pipeline_mode = #tpu.pipeline_mode<synchronous>, transform_indices = @transform_6, window_bounds = array<i64: 1, 32>}, {transform_indices = @transform_7, window_bounds = array<i64: 8, 32>}]} {
    %c0 = arith.constant 0 : index
    %c0_0 = arith.constant 0 : index
    %0 = vector.load %arg1[%c0, %c0_0] : memref<8x2xf32, #tpu.memory_space<vmem>>, vector<8x2xf32>
    %c0_1 = arith.constant 0 : index
    %c0_2 = arith.constant 0 : index
    %1 = vector.load %arg2[%c0_1, %c0_2] : memref<2x32xf32, #tpu.memory_space<vmem>>, vector<2x32xf32>
    %c0_3 = arith.constant 0 : index
    %c0_4 = arith.constant 0 : index
    %2 = vector.load %arg3[%c0_3, %c0_4] : memref<1x32xf32, #tpu.memory_space<vmem>>, vector<1x32xf32>
    %cst = arith.constant dense<0.000000e+00> : vector<8x32xf32>
    %3 = tpu.matmul %0, %1, %cst {dimension_numbers = #tpu.dot_dimension_numbers<[1], [0], [0], [1], [0, 0, 1, 1], [], []>} : vector<8x2xf32>, vector<2x32xf32>, vector<8x32xf32> -> vector<8x32xf32>
    %4 = vector.broadcast %2 : vector<1x32xf32> to vector<8x32xf32>
    %5 = arith.addf %3, %4 : vector<8x32xf32>
    %cst_5 = arith.constant 0.000000e+00 : f32
    %cst_6 = arith.constant 6.000000e+00 : f32
    %6 = vector.broadcast %cst_5 : f32 to vector<8x32xf32>
    %7 = arith.maximumf %6, %5 : vector<8x32xf32>
    %8 = vector.broadcast %cst_6 : f32 to vector<8x32xf32>
    %9 = arith.minimumf %8, %7 : vector<8x32xf32>
    %c0_7 = arith.constant 0 : index
    %c0_8 = arith.constant 0 : index
    %10 = vector.load %arg4[%c0_7, %c0_8] : memref<32x32xf32, #tpu.memory_space<vmem>>, vector<32x32xf32>
    %c0_9 = arith.constant 0 : index
    %c0_10 = arith.constant 0 : index
    %11 = vector.load %arg5[%c0_9, %c0_10] : memref<1x32xf32, #tpu.memory_space<vmem>>, vector<1x32xf32>
    %cst_11 = arith.constant dense<0.000000e+00> : vector<8x32xf32>
    %12 = tpu.matmul %9, %10, %cst_11 {dimension_numbers = #tpu.dot_dimension_numbers<[1], [0], [0], [1], [0, 0, 1, 1], [], []>} : vector<8x32xf32>, vector<32x32xf32>, vector<8x32xf32> -> vector<8x32xf32>
    %13 = vector.broadcast %11 : vector<1x32xf32> to vector<8x32xf32>
    %14 = arith.addf %12, %13 : vector<8x32xf32>
    %cst_12 = arith.constant 0.000000e+00 : f32
    %cst_13 = arith.constant 6.000000e+00 : f32
    %15 = vector.broadcast %cst_12 : f32 to vector<8x32xf32>
    %16 = arith.maximumf %15, %14 : vector<8x32xf32>
    %17 = vector.broadcast %cst_13 : f32 to vector<8x32xf32>
    %18 = arith.minimumf %17, %16 : vector<8x32xf32>
    %c0_14 = arith.constant 0 : index
    %c0_15 = arith.constant 0 : index
    %19 = vector.load %arg6[%c0_14, %c0_15] : memref<32x32xf32, #tpu.memory_space<vmem>>, vector<32x32xf32>
    %c0_16 = arith.constant 0 : index
    %c0_17 = arith.constant 0 : index
    %20 = vector.load %arg7[%c0_16, %c0_17] : memref<1x32xf32, #tpu.memory_space<vmem>>, vector<1x32xf32>
    %cst_18 = arith.constant dense<0.000000e+00> : vector<8x32xf32>
    %21 = tpu.matmul %18, %19, %cst_18 {dimension_numbers = #tpu.dot_dimension_numbers<[1], [0], [0], [1], [0, 0, 1, 1], [], []>} : vector<8x32xf32>, vector<32x32xf32>, vector<8x32xf32> -> vector<8x32xf32>
    %22 = vector.broadcast %20 : vector<1x32xf32> to vector<8x32xf32>
    %23 = arith.addf %21, %22 : vector<8x32xf32>
    %c0_19 = arith.constant 0 : index
    %c0_20 = arith.constant 0 : index
    %24 = vector.load %arg8[%c0_19, %c0_20] : memref<8x32xf32, #tpu.memory_space<vmem>>, vector<8x32xf32>
    tpu.vector_store %arg8[%c0_19, %c0_20], %23 {strides = array<i32>} : memref<8x32xf32, #tpu.memory_space<vmem>>, vector<8x32xf32>,
    return
  }
  func.func @transform_0(%arg0: i32) -> (i32, i32) {
    %c0_i32 = arith.constant 0 : i32
    %c0_i32_0 = arith.constant 0 : i32
    return %arg0, %c0_i32 : i32, i32
  }
  func.func @transform_1(%arg0: i32) -> (i32, i32) {
    %c0_i32 = arith.constant 0 : i32
    %c0_i32_0 = arith.constant 0 : i32
    %c0_i32_1 = arith.constant 0 : i32
    return %c0_i32, %c0_i32_0 : i32, i32
  }
  func.func @transform_2(%arg0: i32) -> (i32, i32) {
    %c0_i32 = arith.constant 0 : i32
    %c0_i32_0 = arith.constant 0 : i32
    %c0_i32_1 = arith.constant 0 : i32
    return %c0_i32, %c0_i32_0 : i32, i32
  }
  func.func @transform_3(%arg0: i32) -> (i32, i32) {
    %c0_i32 = arith.constant 0 : i32
    %c0_i32_0 = arith.constant 0 : i32
    %c0_i32_1 = arith.constant 0 : i32
    return %c0_i32, %c0_i32_0 : i32, i32
  }
  func.func @transform_4(%arg0: i32) -> (i32, i32) {
    %c0_i32 = arith.constant 0 : i32
    %c0_i32_0 = arith.constant 0 : i32
    %c0_i32_1 = arith.constant 0 : i32
    return %c0_i32, %c0_i32_0 : i32, i32
  }
  func.func @transform_5(%arg0: i32) -> (i32, i32) {
    %c0_i32 = arith.constant 0 : i32
    %c0_i32_0 = arith.constant 0 : i32
    %c0_i32_1 = arith.constant 0 : i32
    return %c0_i32, %c0_i32_0 : i32, i32
  }
  func.func @transform_6(%arg0: i32) -> (i32, i32) {
    %c0_i32 = arith.constant 0 : i32
    %c0_i32_0 = arith.constant 0 : i32
    %c0_i32_1 = arith.constant 0 : i32
    return %c0_i32, %c0_i32_0 : i32, i32
  }
  func.func @transform_7(%arg0: i32) -> (i32, i32) {
    %c0_i32 = arith.constant 0 : i32
    %c0_i32_0 = arith.constant 0 : i32
    return %arg0, %c0_i32 : i32, i32
  }
}

module attributes {stable_mosaic.version = 11 : i64} {
  func.func @_fused_mlp_kernel(%arg0: i32, %arg1: memref<14x4xf32, #tpu.memory_space<vmem>>, %arg2: memref<4x64xf32, #tpu.memory_space<vmem>>, %arg3: memref<1x64xf32, #tpu.memory_space<vmem>>, %arg4: memref<64x96xf32, #tpu.memory_space<vmem>>, %arg5: memref<1x96xf32, #tpu.memory_space<vmem>>, %arg6: memref<14x96xf32, #tpu.memory_space<vmem>>) attributes {dimension_semantics = [#tpu.dimension_semantics<parallel>], iteration_bounds = array<i64: 1>, scalar_prefetch = 0 : i64, scratch_operands = 0 : i64, tpu.core_type = #tpu.core_type<tc>, window_params = [{transform_indices = @transform_0, window_bounds = array<i64: 14, 4>}, {pipeline_mode = #tpu.pipeline_mode<synchronous>, transform_indices = @transform_1, window_bounds = array<i64: 4, 64>}, {pipeline_mode = #tpu.pipeline_mode<synchronous>, transform_indices = @transform_2, window_bounds = array<i64: 1, 64>}, {pipeline_mode = #tpu.pipeline_mode<synchronous>, transform_indices = @transform_3, window_bounds = array<i64: 64, 96>}, {pipeline_mode = #tpu.pipeline_mode<synchronous>, transform_indices = @transform_4, window_bounds = array<i64: 1, 96>}, {transform_indices = @transform_5, window_bounds = array<i64: 14, 96>}]} {
    %c0 = arith.constant 0 : index
    %c0_0 = arith.constant 0 : index
    %0 = vector.load %arg1[%c0, %c0_0] : memref<14x4xf32, #tpu.memory_space<vmem>>, vector<14x4xf32>
    %c0_1 = arith.constant 0 : index
    %c0_2 = arith.constant 0 : index
    %1 = vector.load %arg2[%c0_1, %c0_2] : memref<4x64xf32, #tpu.memory_space<vmem>>, vector<4x64xf32>
    %c0_3 = arith.constant 0 : index
    %c0_4 = arith.constant 0 : index
    %2 = vector.load %arg3[%c0_3, %c0_4] : memref<1x64xf32, #tpu.memory_space<vmem>>, vector<1x64xf32>
    %cst = arith.constant dense<0.000000e+00> : vector<14x64xf32>
    %3 = tpu.matmul %0, %1, %cst {dimension_numbers = #tpu.dot_dimension_numbers<[1], [0], [0], [1], [0, 0, 1, 1], [], []>} : vector<14x4xf32>, vector<4x64xf32>, vector<14x64xf32> -> vector<14x64xf32>
    %4 = vector.broadcast %2 : vector<1x64xf32> to vector<14x64xf32>
    %5 = arith.addf %3, %4 : vector<14x64xf32>
    %cst_5 = arith.constant 0.000000e+00 : f32
    %cst_6 = arith.constant 6.000000e+00 : f32
    %6 = vector.broadcast %cst_5 : f32 to vector<14x64xf32>
    %7 = arith.maximumf %6, %5 : vector<14x64xf32>
    %8 = vector.broadcast %cst_6 : f32 to vector<14x64xf32>
    %9 = arith.minimumf %8, %7 : vector<14x64xf32>
    %c0_7 = arith.constant 0 : index
    %c0_8 = arith.constant 0 : index
    %10 = vector.load %arg4[%c0_7, %c0_8] : memref<64x96xf32, #tpu.memory_space<vmem>>, vector<64x96xf32>
    %c0_9 = arith.constant 0 : index
    %c0_10 = arith.constant 0 : index
    %11 = vector.load %arg5[%c0_9, %c0_10] : memref<1x96xf32, #tpu.memory_space<vmem>>, vector<1x96xf32>
    %cst_11 = arith.constant dense<0.000000e+00> : vector<14x96xf32>
    %12 = tpu.matmul %9, %10, %cst_11 {dimension_numbers = #tpu.dot_dimension_numbers<[1], [0], [0], [1], [0, 0, 1, 1], [], []>} : vector<14x64xf32>, vector<64x96xf32>, vector<14x96xf32> -> vector<14x96xf32>
    %13 = vector.broadcast %11 : vector<1x96xf32> to vector<14x96xf32>
    %14 = arith.addf %12, %13 : vector<14x96xf32>
    %c0_12 = arith.constant 0 : index
    %c0_13 = arith.constant 0 : index
    %15 = vector.load %arg6[%c0_12, %c0_13] : memref<14x96xf32, #tpu.memory_space<vmem>>, vector<14x96xf32>
    tpu.vector_store %arg6[%c0_12, %c0_13], %14 {strides = array<i32>} : memref<14x96xf32, #tpu.memory_space<vmem>>, vector<14x96xf32>,
    return
  }
  func.func @transform_0(%arg0: i32) -> (i32, i32) {
    %c0_i32 = arith.constant 0 : i32
    %c0_i32_0 = arith.constant 0 : i32
    return %arg0, %c0_i32 : i32, i32
  }
  func.func @transform_1(%arg0: i32) -> (i32, i32) {
    %c0_i32 = arith.constant 0 : i32
    %c0_i32_0 = arith.constant 0 : i32
    %c0_i32_1 = arith.constant 0 : i32
    return %c0_i32, %c0_i32_0 : i32, i32
  }
  func.func @transform_2(%arg0: i32) -> (i32, i32) {
    %c0_i32 = arith.constant 0 : i32
    %c0_i32_0 = arith.constant 0 : i32
    %c0_i32_1 = arith.constant 0 : i32
    return %c0_i32, %c0_i32_0 : i32, i32
  }
  func.func @transform_3(%arg0: i32) -> (i32, i32) {
    %c0_i32 = arith.constant 0 : i32
    %c0_i32_0 = arith.constant 0 : i32
    %c0_i32_1 = arith.constant 0 : i32
    return %c0_i32, %c0_i32_0 : i32, i32
  }
  func.func @transform_4(%arg0: i32) -> (i32, i32) {
    %c0_i32 = arith.constant 0 : i32
    %c0_i32_0 = arith.constant 0 : i32
    %c0_i32_1 = arith.constant 0 : i32
    return %c0_i32, %c0_i32_0 : i32, i32
  }
  func.func @transform_5(%arg0: i32) -> (i32, i32) {
    %c0_i32 = arith.constant 0 : i32
    %c0_i32_0 = arith.constant 0 : i32
    return %arg0, %c0_i32 : i32, i32
  }
}

module attributes {stable_mosaic.version = 11 : i64} {
  func.func @_encoder_kernel(%arg0: i32, %arg1: i32, %arg2: memref<2x32xf32, #tpu.memory_space<vmem>>, %arg3: memref<1x16x3xf32, #tpu.memory_space<vmem>>, %arg4: memref<1x16x4xf32, #tpu.memory_space<vmem>>, %arg5: memref<1x2x8xf32, #tpu.memory_space<vmem>>, %arg6: memref<1x2x32xf32, #tpu.memory_space<vmem>>, %arg7: memref<3x256xf32, #tpu.memory_space<vmem>>, %arg8: memref<1x256xf32, #tpu.memory_space<vmem>>, %arg9: memref<256x256xf32, #tpu.memory_space<vmem>>, %arg10: memref<1x256xf32, #tpu.memory_space<vmem>>, %arg11: memref<256x256xf32, #tpu.memory_space<vmem>>, %arg12: memref<1x256xf32, #tpu.memory_space<vmem>>, %arg13: memref<4x64xf32, #tpu.memory_space<vmem>>, %arg14: memref<1x64xf32, #tpu.memory_space<vmem>>, %arg15: memref<64x128xf32, #tpu.memory_space<vmem>>, %arg16: memref<1x128xf32, #tpu.memory_space<vmem>>, %arg17: memref<128x128xf32, #tpu.memory_space<vmem>>, %arg18: memref<1x128xf32, #tpu.memory_space<vmem>>, %arg19: memref<32x256xf32, #tpu.memory_space<vmem>>, %arg20: memref<1x256xf32, #tpu.memory_space<vmem>>, %arg21: memref<256x256xf32, #tpu.memory_space<vmem>>, %arg22: memref<1x256xf32, #tpu.memory_space<vmem>>, %arg23: memref<256x256xf32, #tpu.memory_space<vmem>>, %arg24: memref<1x256xf32, #tpu.memory_space<vmem>>, %arg25: memref<128x96xf32, #tpu.memory_space<vmem>>, %arg26: memref<32x96xf32, #tpu.memory_space<vmem>>, %arg27: memref<32x96xf32, #tpu.memory_space<vmem>>, %arg28: memref<1x96xf32, #tpu.memory_space<vmem>>, %arg29: memref<1x96xf32, #tpu.memory_space<vmem>>, %arg30: memref<2x32xf32, #tpu.memory_space<vmem>>, %arg31: memref<2x32xf32, #tpu.memory_space<vmem>>) attributes {dimension_semantics = [#tpu.dimension_semantics<parallel>, #tpu.dimension_semantics<arbitrary>], iteration_bounds = array<i64: 1, 7>, scalar_prefetch = 0 : i64, scratch_operands = 1 : i64, tpu.core_type = #tpu.core_type<tc>, window_params = [{transform_indices = @transform_0, window_bounds = array<i64: 2, 32>}, {transform_indices = @transform_1, window_bounds = array<i64: 1, 16, 3>}, {transform_indices = @transform_2, window_bounds = array<i64: 1, 16, 4>}, {transform_indices = @transform_3, window_bounds = array<i64: 1, 2, 8>}, {transform_indices = @transform_4, window_bounds = array<i64: 1, 2, 32>}, {pipeline_mode = #tpu.pipeline_mode<synchronous>, transform_indices = @transform_5, window_bounds = array<i64: 3, 256>}, {pipeline_mode = #tpu.pipeline_mode<synchronous>, transform_indices = @transform_6, window_bounds = array<i64: 1, 256>}, {pipeline_mode = #tpu.pipeline_mode<synchronous>, transform_indices = @transform_7, window_bounds = array<i64: 256, 256>}, {pipeline_mode = #tpu.pipeline_mode<synchronous>, transform_indices = @transform_8, window_bounds = array<i64: 1, 256>}, {pipeline_mode = #tpu.pipeline_mode<synchronous>, transform_indices = @transform_9, window_bounds = array<i64: 256, 256>}, {pipeline_mode = #tpu.pipeline_mode<synchronous>, transform_indices = @transform_10, window_bounds = array<i64: 1, 256>}, {pipeline_mode = #tpu.pipeline_mode<synchronous>, transform_indices = @transform_11, window_bounds = array<i64: 4, 64>}, {pipeline_mode = #tpu.pipeline_mode<synchronous>, transform_indices = @transform_12, window_bounds = array<i64: 1, 64>}, {pipeline_mode = #tpu.pipeline_mode<synchronous>, transform_indices = @transform_13, window_bounds = array<i64: 64, 128>}, {pipeline_mode = #tpu.pipeline_mode<synchronous>, transform_indices = @transform_14, window_bounds = array<i64: 1, 128>}, {pipeline_mode = #tpu.pipeline_mode<synchronous>, transform_indices = @transform_15, window_bounds = array<i64: 128, 128>}, {pipeline_mode = #tpu.pipeline_mode<synchronous>, transform_indices = @transform_16, window_bounds = array<i64: 1, 128>}, {pipeline_mode = #tpu.pipeline_mode<synchronous>, transform_indices = @transform_17, window_bounds = array<i64: 32, 256>}, {pipeline_mode = #tpu.pipeline_mode<synchronous>, transform_indices = @transform_18, window_bounds = array<i64: 1, 256>}, {pipeline_mode = #tpu.pipeline_mode<synchronous>, transform_indices = @transform_19, window_bounds = array<i64: 256, 256>}, {pipeline_mode = #tpu.pipeline_mode<synchronous>, transform_indices = @transform_20, window_bounds = array<i64: 1, 256>}, {pipeline_mode = #tpu.pipeline_mode<synchronous>, transform_indices = @transform_21, window_bounds = array<i64: 256, 256>}, {pipeline_mode = #tpu.pipeline_mode<synchronous>, transform_indices = @transform_22, window_bounds = array<i64: 1, 256>}, {pipeline_mode = #tpu.pipeline_mode<synchronous>, transform_indices = @transform_23, window_bounds = array<i64: 128, 96>}, {pipeline_mode = #tpu.pipeline_mode<synchronous>, transform_indices = @transform_24, window_bounds = array<i64: 32, 96>}, {pipeline_mode = #tpu.pipeline_mode<synchronous>, transform_indices = @transform_25, window_bounds = array<i64: 32, 96>}, {pipeline_mode = #tpu.pipeline_mode<synchronous>, transform_indices = @transform_26, window_bounds = array<i64: 1, 96>}, {pipeline_mode = #tpu.pipeline_mode<synchronous>, transform_indices = @transform_27, window_bounds = array<i64: 1, 96>}, {transform_indices = @transform_28, window_bounds = array<i64: 2, 32>}]} {
    %c0_i32 = arith.constant 0 : i32
    %0 = arith.cmpi eq, %arg1, %c0_i32 : i32
    %1 = arith.extui %0 : i1 to i32
    %c0_i32_0 = arith.constant 0 : i32
    %2 = arith.cmpi ne, %1, %c0_i32_0 : i32
    scf.if %2 {
      %c0_102 = arith.constant 0 : index
      %c0_103 = arith.constant 0 : index
      %159 = vector.load %arg2[%c0_102, %c0_103] : memref<2x32xf32, #tpu.memory_space<vmem>>, vector<2x32xf32>
      %c0_104 = arith.constant 0 : index
      %c0_105 = arith.constant 0 : index
      %160 = vector.load %arg31[%c0_104, %c0_105] : memref<2x32xf32, #tpu.memory_space<vmem>>, vector<2x32xf32>
      tpu.vector_store %arg31[%c0_104, %c0_105], %159 {strides = array<i32>} : memref<2x32xf32, #tpu.memory_space<vmem>>, vector<2x32xf32>,
    } else {
    }
    %c0 = arith.constant 0 : index
    %c0_1 = arith.constant 0 : index
    %3 = vector.load %arg31[%c0, %c0_1] : memref<2x32xf32, #tpu.memory_space<vmem>>, vector<2x32xf32>
    %c0_2 = arith.constant 0 : index
    %c0_3 = arith.constant 0 : index
    %4 = vector.load %arg19[%c0_2, %c0_3] : memref<32x256xf32, #tpu.memory_space<vmem>>, vector<32x256xf32>
    %cst = arith.constant dense<0.000000e+00> : vector<2x256xf32>
    %5 = tpu.matmul %3, %4, %cst {dimension_numbers = #tpu.dot_dimension_numbers<[1], [0], [0], [1], [0, 0, 1, 1], [], []>} : vector<2x32xf32>, vector<32x256xf32>, vector<2x256xf32> -> vector<2x256xf32>
    %c0_4 = arith.constant 0 : index
    %c0_5 = arith.constant 0 : index
    %6 = vector.load %arg20[%c0_4, %c0_5] : memref<1x256xf32, #tpu.memory_space<vmem>>, vector<1x256xf32>
    %7 = vector.broadcast %6 : vector<1x256xf32> to vector<2x256xf32>
    %8 = arith.addf %5, %7 : vector<2x256xf32>
    %cst_6 = arith.constant 0.000000e+00 : f32
    %cst_7 = arith.constant 6.000000e+00 : f32
    %9 = vector.broadcast %cst_6 : f32 to vector<2x256xf32>
    %10 = arith.maximumf %9, %8 : vector<2x256xf32>
    %11 = vector.broadcast %cst_7 : f32 to vector<2x256xf32>
    %12 = arith.minimumf %11, %10 : vector<2x256xf32>
    %c0_8 = arith.constant 0 : index
    %c0_9 = arith.constant 0 : index
    %13 = vector.load %arg21[%c0_8, %c0_9] : memref<256x256xf32, #tpu.memory_space<vmem>>, vector<256x256xf32>
    %cst_10 = arith.constant dense<0.000000e+00> : vector<2x256xf32>
    %14 = tpu.matmul %12, %13, %cst_10 {dimension_numbers = #tpu.dot_dimension_numbers<[1], [0], [0], [1], [0, 0, 1, 1], [], []>} : vector<2x256xf32>, vector<256x256xf32>, vector<2x256xf32> -> vector<2x256xf32>
    %c0_11 = arith.constant 0 : index
    %c0_12 = arith.constant 0 : index
    %15 = vector.load %arg22[%c0_11, %c0_12] : memref<1x256xf32, #tpu.memory_space<vmem>>, vector<1x256xf32>
    %16 = vector.broadcast %15 : vector<1x256xf32> to vector<2x256xf32>
    %17 = arith.addf %14, %16 : vector<2x256xf32>
    %cst_13 = arith.constant 0.000000e+00 : f32
    %cst_14 = arith.constant 6.000000e+00 : f32
    %18 = vector.broadcast %cst_13 : f32 to vector<2x256xf32>
    %19 = arith.maximumf %18, %17 : vector<2x256xf32>
    %20 = vector.broadcast %cst_14 : f32 to vector<2x256xf32>
    %21 = arith.minimumf %20, %19 : vector<2x256xf32>
    %c0_15 = arith.constant 0 : index
    %c0_16 = arith.constant 0 : index
    %22 = vector.load %arg23[%c0_15, %c0_16] : memref<256x256xf32, #tpu.memory_space<vmem>>, vector<256x256xf32>
    %cst_17 = arith.constant dense<0.000000e+00> : vector<2x256xf32>
    %23 = tpu.matmul %21, %22, %cst_17 {dimension_numbers = #tpu.dot_dimension_numbers<[1], [0], [0], [1], [0, 0, 1, 1], [], []>} : vector<2x256xf32>, vector<256x256xf32>, vector<2x256xf32> -> vector<2x256xf32>
    %c0_18 = arith.constant 0 : index
    %c0_19 = arith.constant 0 : index
    %24 = vector.load %arg24[%c0_18, %c0_19] : memref<1x256xf32, #tpu.memory_space<vmem>>, vector<1x256xf32>
    %25 = vector.broadcast %24 : vector<1x256xf32> to vector<2x256xf32>
    %26 = arith.addf %23, %25 : vector<2x256xf32>
    %c0_20 = arith.constant 0 : index
    %c0_21 = arith.constant 0 : index
    %c0_22 = arith.constant 0 : index
    %27 = vector.load %arg3[%c0_20, %c0_21, %c0_22] : memref<1x16x3xf32, #tpu.memory_space<vmem>>, vector<1x16x3xf32>
    %28 = vector.shape_cast %27 : vector<1x16x3xf32> to vector<16x3xf32>
    %c0_23 = arith.constant 0 : index
    %c0_24 = arith.constant 0 : index
    %29 = vector.load %arg7[%c0_23, %c0_24] : memref<3x256xf32, #tpu.memory_space<vmem>>, vector<3x256xf32>
    %cst_25 = arith.constant dense<0.000000e+00> : vector<16x256xf32>
    %30 = tpu.matmul %28, %29, %cst_25 {dimension_numbers = #tpu.dot_dimension_numbers<[1], [0], [0], [1], [0, 0, 1, 1], [], []>} : vector<16x3xf32>, vector<3x256xf32>, vector<16x256xf32> -> vector<16x256xf32>
    %c0_26 = arith.constant 0 : index
    %c0_27 = arith.constant 0 : index
    %31 = vector.load %arg8[%c0_26, %c0_27] : memref<1x256xf32, #tpu.memory_space<vmem>>, vector<1x256xf32>
    %32 = vector.broadcast %31 : vector<1x256xf32> to vector<16x256xf32>
    %33 = arith.addf %30, %32 : vector<16x256xf32>
    %cst_28 = arith.constant 0.000000e+00 : f32
    %cst_29 = arith.constant 6.000000e+00 : f32
    %34 = vector.broadcast %cst_28 : f32 to vector<16x256xf32>
    %35 = arith.maximumf %34, %33 : vector<16x256xf32>
    %36 = vector.broadcast %cst_29 : f32 to vector<16x256xf32>
    %37 = arith.minimumf %36, %35 : vector<16x256xf32>
    %c0_30 = arith.constant 0 : index
    %c0_31 = arith.constant 0 : index
    %38 = vector.load %arg9[%c0_30, %c0_31] : memref<256x256xf32, #tpu.memory_space<vmem>>, vector<256x256xf32>
    %cst_32 = arith.constant dense<0.000000e+00> : vector<16x256xf32>
    %39 = tpu.matmul %37, %38, %cst_32 {dimension_numbers = #tpu.dot_dimension_numbers<[1], [0], [0], [1], [0, 0, 1, 1], [], []>} : vector<16x256xf32>, vector<256x256xf32>, vector<16x256xf32> -> vector<16x256xf32>
    %c0_33 = arith.constant 0 : index
    %c0_34 = arith.constant 0 : index
    %40 = vector.load %arg10[%c0_33, %c0_34] : memref<1x256xf32, #tpu.memory_space<vmem>>, vector<1x256xf32>
    %41 = vector.broadcast %40 : vector<1x256xf32> to vector<16x256xf32>
    %42 = arith.addf %39, %41 : vector<16x256xf32>
    %cst_35 = arith.constant 0.000000e+00 : f32
    %cst_36 = arith.constant 6.000000e+00 : f32
    %43 = vector.broadcast %cst_35 : f32 to vector<16x256xf32>
    %44 = arith.maximumf %43, %42 : vector<16x256xf32>
    %45 = vector.broadcast %cst_36 : f32 to vector<16x256xf32>
    %46 = arith.minimumf %45, %44 : vector<16x256xf32>
    %c0_37 = arith.constant 0 : index
    %c0_38 = arith.constant 0 : index
    %47 = vector.load %arg11[%c0_37, %c0_38] : memref<256x256xf32, #tpu.memory_space<vmem>>, vector<256x256xf32>
    %cst_39 = arith.constant dense<0.000000e+00> : vector<16x256xf32>
    %48 = tpu.matmul %46, %47, %cst_39 {dimension_numbers = #tpu.dot_dimension_numbers<[1], [0], [0], [1], [0, 0, 1, 1], [], []>} : vector<16x256xf32>, vector<256x256xf32>, vector<16x256xf32> -> vector<16x256xf32>
    %c0_40 = arith.constant 0 : index
    %c0_41 = arith.constant 0 : index
    %49 = vector.load %arg12[%c0_40, %c0_41] : memref<1x256xf32, #tpu.memory_space<vmem>>, vector<1x256xf32>
    %50 = vector.broadcast %49 : vector<1x256xf32> to vector<16x256xf32>
    %51 = arith.addf %48, %50 : vector<16x256xf32>
    %c0_42 = arith.constant 0 : index
    %c0_43 = arith.constant 0 : index
    %c0_44 = arith.constant 0 : index
    %52 = vector.load %arg4[%c0_42, %c0_43, %c0_44] : memref<1x16x4xf32, #tpu.memory_space<vmem>>, vector<1x16x4xf32>
    %53 = vector.shape_cast %52 : vector<1x16x4xf32> to vector<16x4xf32>
    %c0_45 = arith.constant 0 : index
    %c0_46 = arith.constant 0 : index
    %54 = vector.load %arg13[%c0_45, %c0_46] : memref<4x64xf32, #tpu.memory_space<vmem>>, vector<4x64xf32>
    %cst_47 = arith.constant dense<0.000000e+00> : vector<16x64xf32>
    %55 = tpu.matmul %53, %54, %cst_47 {dimension_numbers = #tpu.dot_dimension_numbers<[1], [0], [0], [1], [0, 0, 1, 1], [], []>} : vector<16x4xf32>, vector<4x64xf32>, vector<16x64xf32> -> vector<16x64xf32>
    %c0_48 = arith.constant 0 : index
    %c0_49 = arith.constant 0 : index
    %56 = vector.load %arg14[%c0_48, %c0_49] : memref<1x64xf32, #tpu.memory_space<vmem>>, vector<1x64xf32>
    %57 = vector.broadcast %56 : vector<1x64xf32> to vector<16x64xf32>
    %58 = arith.addf %55, %57 : vector<16x64xf32>
    %cst_50 = arith.constant 0.000000e+00 : f32
    %cst_51 = arith.constant 6.000000e+00 : f32
    %59 = vector.broadcast %cst_50 : f32 to vector<16x64xf32>
    %60 = arith.maximumf %59, %58 : vector<16x64xf32>
    %61 = vector.broadcast %cst_51 : f32 to vector<16x64xf32>
    %62 = arith.minimumf %61, %60 : vector<16x64xf32>
    %c0_52 = arith.constant 0 : index
    %c0_53 = arith.constant 0 : index
    %63 = vector.load %arg15[%c0_52, %c0_53] : memref<64x128xf32, #tpu.memory_space<vmem>>, vector<64x128xf32>
    %cst_54 = arith.constant dense<0.000000e+00> : vector<16x128xf32>
    %64 = tpu.matmul %62, %63, %cst_54 {dimension_numbers = #tpu.dot_dimension_numbers<[1], [0], [0], [1], [0, 0, 1, 1], [], []>} : vector<16x64xf32>, vector<64x128xf32>, vector<16x128xf32> -> vector<16x128xf32>
    %c0_55 = arith.constant 0 : index
    %c0_56 = arith.constant 0 : index
    %65 = vector.load %arg16[%c0_55, %c0_56] : memref<1x128xf32, #tpu.memory_space<vmem>>, vector<1x128xf32>
    %66 = vector.broadcast %65 : vector<1x128xf32> to vector<16x128xf32>
    %67 = arith.addf %64, %66 : vector<16x128xf32>
    %cst_57 = arith.constant 0.000000e+00 : f32
    %cst_58 = arith.constant 6.000000e+00 : f32
    %68 = vector.broadcast %cst_57 : f32 to vector<16x128xf32>
    %69 = arith.maximumf %68, %67 : vector<16x128xf32>
    %70 = vector.broadcast %cst_58 : f32 to vector<16x128xf32>
    %71 = arith.minimumf %70, %69 : vector<16x128xf32>
    %c0_59 = arith.constant 0 : index
    %c0_60 = arith.constant 0 : index
    %72 = vector.load %arg17[%c0_59, %c0_60] : memref<128x128xf32, #tpu.memory_space<vmem>>, vector<128x128xf32>
    %cst_61 = arith.constant dense<0.000000e+00> : vector<16x128xf32>
    %73 = tpu.matmul %71, %72, %cst_61 {dimension_numbers = #tpu.dot_dimension_numbers<[1], [0], [0], [1], [0, 0, 1, 1], [], []>} : vector<16x128xf32>, vector<128x128xf32>, vector<16x128xf32> -> vector<16x128xf32>
    %c0_62 = arith.constant 0 : index
    %c0_63 = arith.constant 0 : index
    %74 = vector.load %arg18[%c0_62, %c0_63] : memref<1x128xf32, #tpu.memory_space<vmem>>, vector<1x128xf32>
    %75 = vector.broadcast %74 : vector<1x128xf32> to vector<16x128xf32>
    %76 = arith.addf %73, %75 : vector<16x128xf32>
    %77 = vector.shape_cast %51 : vector<16x256xf32> to vector<2x8x256xf32>
    %78 = vector.shape_cast %76 : vector<16x128xf32> to vector<2x8x128xf32>
    %c0_64 = arith.constant 0 : index
    %c0_65 = arith.constant 0 : index
    %c0_66 = arith.constant 0 : index
    %79 = vector.load %arg5[%c0_64, %c0_65, %c0_66] : memref<1x2x8xf32, #tpu.memory_space<vmem>>, vector<1x2x8xf32>
    %80 = vector.shape_cast %79 : vector<1x2x8xf32> to vector<2x8xf32>
    %81 = vector.shape_cast %26 : vector<2x256xf32> to vector<2x1x256xf32>
    %82 = vector.broadcast %81 : vector<2x1x256xf32> to vector<2x8x256xf32>
    %83 = arith.mulf %77, %82 : vector<2x8x256xf32>
    %cst_67 = arith.constant dense<0.000000e+00> : vector<2x8xf32>
    %84 = vector.multi_reduction <add>, %83, %cst_67 [2] : vector<2x8x256xf32> to vector<2x8xf32>
    %cst_68 = arith.constant 0.000000e+00 : f32
    %85 = vector.broadcast %cst_68 : f32 to vector<2x8xf32>
    %86 = arith.cmpf oge, %84, %85 : vector<2x8xf32>
    %cst_69 = arith.constant 2.000000e-01 : f32
    %87 = vector.broadcast %cst_69 : f32 to vector<2x8xf32>
    %88 = arith.mulf %87, %84 : vector<2x8xf32>
    %89 = arith.select %86, %84, %88 : vector<2x8xi1>, vector<2x8xf32>
    %cst_70 = arith.constant 0.000000e+00 : f32
    %90 = vector.broadcast %cst_70 : f32 to vector<2x8xf32>
    %91 = arith.cmpf ogt, %80, %90 : vector<2x8xf32>
    %cst_71 = arith.constant -1.000000e+30 : f32
    %92 = vector.broadcast %cst_71 : f32 to vector<2x8xf32>
    %93 = arith.select %91, %89, %92 : vector<2x8xi1>, vector<2x8xf32>
    %cst_72 = arith.constant dense<0xFF800000> : vector<2xf32>
    %94 = vector.multi_reduction <maximumf>, %93, %cst_72 [1] : vector<2x8xf32> to vector<2xf32>
    %95 = vector.shape_cast %94 : vector<2xf32> to vector<2x1xf32>
    %96 = vector.broadcast %95 : vector<2x1xf32> to vector<2x8xf32>
    %97 = arith.subf %93, %96 : vector<2x8xf32>
    %98 = math.exp %97 : vector<2x8xf32>
    %cst_73 = arith.constant 0.000000e+00 : f32
    %99 = vector.broadcast %cst_73 : f32 to vector<2x8xf32>
    %100 = arith.select %91, %98, %99 : vector<2x8xi1>, vector<2x8xf32>
    %cst_74 = arith.constant dense<0.000000e+00> : vector<2xf32>
    %101 = vector.multi_reduction <add>, %100, %cst_74 [1] : vector<2x8xf32> to vector<2xf32>
    %102 = vector.shape_cast %101 : vector<2xf32> to vector<2x1xf32>
    %cst_75 = arith.constant 0.000000e+00 : f32
    %103 = vector.broadcast %cst_75 : f32 to vector<2x1xf32>
    %104 = arith.cmpf ogt, %102, %103 : vector<2x1xf32>
    %cst_76 = arith.constant 1.000000e-30 : f32
    %105 = vector.broadcast %cst_76 : f32 to vector<2x1xf32>
    %106 = arith.maximumf %102, %105 : vector<2x1xf32>
    %107 = vector.broadcast %106 : vector<2x1xf32> to vector<2x8xf32>
    %108 = arith.divf %100, %107 : vector<2x8xf32>
    %cst_77 = arith.constant 0.000000e+00 : f32
    %109 = vector.shape_cast %104 : vector<2x1xi1> to vector<2x1xi1>
    %110 = vector.broadcast %109 : vector<2x1xi1> to vector<2x8xi1>
    %111 = vector.broadcast %cst_77 : f32 to vector<2x8xf32>
    %112 = arith.select %110, %108, %111 : vector<2x8xi1>, vector<2x8xf32>
    %113 = vector.shape_cast %112 : vector<2x8xf32> to vector<2x1x8xf32>
    "tpu.trace_start"() <{level = 10 : i32, message = "nqk,nkd->nqd"}> : () -> ()
    %cst_78 = arith.constant dense<0.000000e+00> : vector<2x1x128xf32>
    %114 = tpu.matmul %113, %78, %cst_78 {dimension_numbers = #tpu.dot_dimension_numbers<[2], [1], [1], [2], [0, 0, 0, 1, 1, 2], [0], [0]>} : vector<2x1x8xf32>, vector<2x8x128xf32>, vector<2x1x128xf32> -> vector<2x1x128xf32>
    "tpu.trace_stop"() : () -> ()
    %115 = vector.shape_cast %114 : vector<2x1x128xf32> to vector<2x128xf32>
    %c0_79 = arith.constant 0 : index
    %c0_80 = arith.constant 0 : index
    %c0_81 = arith.constant 0 : index
    %116 = vector.load %arg6[%c0_79, %c0_80, %c0_81] : memref<1x2x32xf32, #tpu.memory_space<vmem>>, vector<1x2x32xf32>
    %117 = vector.shape_cast %116 : vector<1x2x32xf32> to vector<2x32xf32>
    %c0_82 = arith.constant 0 : index
    %c0_83 = arith.constant 0 : index
    %118 = vector.load %arg25[%c0_82, %c0_83] : memref<128x96xf32, #tpu.memory_space<vmem>>, vector<128x96xf32>
    %cst_84 = arith.constant dense<0.000000e+00> : vector<2x96xf32>
    %119 = tpu.matmul %115, %118, %cst_84 {dimension_numbers = #tpu.dot_dimension_numbers<[1], [0], [0], [1], [0, 0, 1, 1], [], []>} : vector<2x128xf32>, vector<128x96xf32>, vector<2x96xf32> -> vector<2x96xf32>
    %c0_85 = arith.constant 0 : index
    %c0_86 = arith.constant 0 : index
    %120 = vector.load %arg26[%c0_85, %c0_86] : memref<32x96xf32, #tpu.memory_space<vmem>>, vector<32x96xf32>
    %cst_87 = arith.constant dense<0.000000e+00> : vector<2x96xf32>
    %121 = tpu.matmul %117, %120, %cst_87 {dimension_numbers = #tpu.dot_dimension_numbers<[1], [0], [0], [1], [0, 0, 1, 1], [], []>} : vector<2x32xf32>, vector<32x96xf32>, vector<2x96xf32> -> vector<2x96xf32>
    %122 = arith.addf %119, %121 : vector<2x96xf32>
    %c0_88 = arith.constant 0 : index
    %c0_89 = arith.constant 0 : index
    %123 = vector.load %arg28[%c0_88, %c0_89] : memref<1x96xf32, #tpu.memory_space<vmem>>, vector<1x96xf32>
    %124 = vector.broadcast %123 : vector<1x96xf32> to vector<2x96xf32>
    %125 = arith.addf %122, %124 : vector<2x96xf32>
    %c0_90 = arith.constant 0 : index
    %c0_91 = arith.constant 0 : index
    %126 = vector.load %arg27[%c0_90, %c0_91] : memref<32x96xf32, #tpu.memory_space<vmem>>, vector<32x96xf32>
    %cst_92 = arith.constant dense<0.000000e+00> : vector<2x96xf32>
    %127 = tpu.matmul %3, %126, %cst_92 {dimension_numbers = #tpu.dot_dimension_numbers<[1], [0], [0], [1], [0, 0, 1, 1], [], []>} : vector<2x32xf32>, vector<32x96xf32>, vector<2x96xf32> -> vector<2x96xf32>
    %c0_93 = arith.constant 0 : index
    %c0_94 = arith.constant 0 : index
    %128 = vector.load %arg29[%c0_93, %c0_94] : memref<1x96xf32, #tpu.memory_space<vmem>>, vector<1x96xf32>
    %129 = vector.broadcast %128 : vector<1x96xf32> to vector<2x96xf32>
    %130 = arith.addf %127, %129 : vector<2x96xf32>
    %131 = vector.extract_strided_slice %125 {offsets = [0, 0], sizes = [2, 32], strides = [1, 1]} : vector<2x96xf32> to vector<2x32xf32>
    %132 = vector.extract_strided_slice %130 {offsets = [0, 0], sizes = [2, 32], strides = [1, 1]} : vector<2x96xf32> to vector<2x32xf32>
    %133 = arith.addf %131, %132 : vector<2x32xf32>
    %134 = arith.negf %133 : vector<2x32xf32>
    %135 = math.exp %134 : vector<2x32xf32>
    %cst_95 = arith.constant 1.000000e+00 : f32
    %136 = vector.broadcast %cst_95 : f32 to vector<2x32xf32>
    %137 = arith.addf %136, %135 : vector<2x32xf32>
    %138 = arith.divf %136, %137 : vector<2x32xf32>
    %139 = vector.extract_strided_slice %125 {offsets = [0, 32], sizes = [2, 32], strides = [1, 1]} : vector<2x96xf32> to vector<2x32xf32>
    %140 = vector.extract_strided_slice %130 {offsets = [0, 32], sizes = [2, 32], strides = [1, 1]} : vector<2x96xf32> to vector<2x32xf32>
    %141 = arith.addf %139, %140 : vector<2x32xf32>
    %142 = arith.negf %141 : vector<2x32xf32>
    %143 = math.exp %142 : vector<2x32xf32>
    %cst_96 = arith.constant 1.000000e+00 : f32
    %144 = vector.broadcast %cst_96 : f32 to vector<2x32xf32>
    %145 = arith.addf %144, %143 : vector<2x32xf32>
    %146 = arith.divf %144, %145 : vector<2x32xf32>
    %147 = vector.extract_strided_slice %125 {offsets = [0, 64], sizes = [2, 32], strides = [1, 1]} : vector<2x96xf32> to vector<2x32xf32>
    %148 = vector.extract_strided_slice %130 {offsets = [0, 64], sizes = [2, 32], strides = [1, 1]} : vector<2x96xf32> to vector<2x32xf32>
    %149 = arith.mulf %138, %148 : vector<2x32xf32>
    %150 = arith.addf %147, %149 : vector<2x32xf32>
    %151 = math.tanh %150 : vector<2x32xf32>
    %cst_97 = arith.constant 1.000000e+00 : f32
    %152 = vector.broadcast %cst_97 : f32 to vector<2x32xf32>
    %153 = arith.subf %152, %146 : vector<2x32xf32>
    %154 = arith.mulf %153, %151 : vector<2x32xf32>
    %155 = arith.mulf %146, %3 : vector<2x32xf32>
    %156 = arith.addf %154, %155 : vector<2x32xf32>
    %c0_98 = arith.constant 0 : index
    %c0_99 = arith.constant 0 : index
    %157 = vector.load %arg31[%c0_98, %c0_99] : memref<2x32xf32, #tpu.memory_space<vmem>>, vector<2x32xf32>
    tpu.vector_store %arg31[%c0_98, %c0_99], %156 {strides = array<i32>} : memref<2x32xf32, #tpu.memory_space<vmem>>, vector<2x32xf32>,
    %c0_100 = arith.constant 0 : index
    %c0_101 = arith.constant 0 : index
    %158 = vector.load %arg30[%c0_100, %c0_101] : memref<2x32xf32, #tpu.memory_space<vmem>>, vector<2x32xf32>
    tpu.vector_store %arg30[%c0_100, %c0_101], %156 {strides = array<i32>} : memref<2x32xf32, #tpu.memory_space<vmem>>, vector<2x32xf32>,
    return
  }
  func.func @transform_0(%arg0: i32, %arg1: i32) -> (i32, i32) {
    %c0_i32 = arith.constant 0 : i32
    %c0_i32_0 = arith.constant 0 : i32
    return %arg0, %c0_i32 : i32, i32
  }
  func.func @transform_1(%arg0: i32, %arg1: i32) -> (i32, i32, i32) {
    %c0_i32 = arith.constant 0 : i32
    %c0_i32_0 = arith.constant 0 : i32
    return %arg1, %arg0, %c0_i32 : i32, i32, i32
  }
  func.func @transform_2(%arg0: i32, %arg1: i32) -> (i32, i32, i32) {
    %c0_i32 = arith.constant 0 : i32
    %c0_i32_0 = arith.constant 0 : i32
    return %arg1, %arg0, %c0_i32 : i32, i32, i32
  }
  func.func @transform_3(%arg0: i32, %arg1: i32) -> (i32, i32, i32) {
    %c0_i32 = arith.constant 0 : i32
    %c0_i32_0 = arith.constant 0 : i32
    return %arg1, %arg0, %c0_i32 : i32, i32, i32
  }
  func.func @transform_4(%arg0: i32, %arg1: i32) -> (i32, i32, i32) {
    %c0_i32 = arith.constant 0 : i32
    %c0_i32_0 = arith.constant 0 : i32
    return %arg1, %arg0, %c0_i32 : i32, i32, i32
  }
  func.func @transform_5(%arg0: i32, %arg1: i32) -> (i32, i32) {
    %c0_i32 = arith.constant 0 : i32
    %c0_i32_0 = arith.constant 0 : i32
    %c0_i32_1 = arith.constant 0 : i32
    return %c0_i32, %c0_i32_0 : i32, i32
  }
  func.func @transform_6(%arg0: i32, %arg1: i32) -> (i32, i32) {
    %c0_i32 = arith.constant 0 : i32
    %c0_i32_0 = arith.constant 0 : i32
    %c0_i32_1 = arith.constant 0 : i32
    return %c0_i32, %c0_i32_0 : i32, i32
  }
  func.func @transform_7(%arg0: i32, %arg1: i32) -> (i32, i32) {
    %c0_i32 = arith.constant 0 : i32
    %c0_i32_0 = arith.constant 0 : i32
    %c0_i32_1 = arith.constant 0 : i32
    return %c0_i32, %c0_i32_0 : i32, i32
  }
  func.func @transform_8(%arg0: i32, %arg1: i32) -> (i32, i32) {
    %c0_i32 = arith.constant 0 : i32
    %c0_i32_0 = arith.constant 0 : i32
    %c0_i32_1 = arith.constant 0 : i32
    return %c0_i32, %c0_i32_0 : i32, i32
  }
  func.func @transform_9(%arg0: i32, %arg1: i32) -> (i32, i32) {
    %c0_i32 = arith.constant 0 : i32
    %c0_i32_0 = arith.constant 0 : i32
    %c0_i32_1 = arith.constant 0 : i32
    return %c0_i32, %c0_i32_0 : i32, i32
  }
  func.func @transform_10(%arg0: i32, %arg1: i32) -> (i32, i32) {
    %c0_i32 = arith.constant 0 : i32
    %c0_i32_0 = arith.constant 0 : i32
    %c0_i32_1 = arith.constant 0 : i32
    return %c0_i32, %c0_i32_0 : i32, i32
  }
  func.func @transform_11(%arg0: i32, %arg1: i32) -> (i32, i32) {
    %c0_i32 = arith.constant 0 : i32
    %c0_i32_0 = arith.constant 0 : i32
    %c0_i32_1 = arith.constant 0 : i32
    return %c0_i32, %c0_i32_0 : i32, i32
  }
  func.func @transform_12(%arg0: i32, %arg1: i32) -> (i32, i32) {
    %c0_i32 = arith.constant 0 : i32
    %c0_i32_0 = arith.constant 0 : i32
    %c0_i32_1 = arith.constant 0 : i32
    return %c0_i32, %c0_i32_0 : i32, i32
  }
  func.func @transform_13(%arg0: i32, %arg1: i32) -> (i32, i32) {
    %c0_i32 = arith.constant 0 : i32
    %c0_i32_0 = arith.constant 0 : i32
    %c0_i32_1 = arith.constant 0 : i32
    return %c0_i32, %c0_i32_0 : i32, i32
  }
  func.func @transform_14(%arg0: i32, %arg1: i32) -> (i32, i32) {
    %c0_i32 = arith.constant 0 : i32
    %c0_i32_0 = arith.constant 0 : i32
    %c0_i32_1 = arith.constant 0 : i32
    return %c0_i32, %c0_i32_0 : i32, i32
  }
  func.func @transform_15(%arg0: i32, %arg1: i32) -> (i32, i32) {
    %c0_i32 = arith.constant 0 : i32
    %c0_i32_0 = arith.constant 0 : i32
    %c0_i32_1 = arith.constant 0 : i32
    return %c0_i32, %c0_i32_0 : i32, i32
  }
  func.func @transform_16(%arg0: i32, %arg1: i32) -> (i32, i32) {
    %c0_i32 = arith.constant 0 : i32
    %c0_i32_0 = arith.constant 0 : i32
    %c0_i32_1 = arith.constant 0 : i32
    return %c0_i32, %c0_i32_0 : i32, i32
  }
  func.func @transform_17(%arg0: i32, %arg1: i32) -> (i32, i32) {
    %c0_i32 = arith.constant 0 : i32
    %c0_i32_0 = arith.constant 0 : i32
    %c0_i32_1 = arith.constant 0 : i32
    return %c0_i32, %c0_i32_0 : i32, i32
  }
  func.func @transform_18(%arg0: i32, %arg1: i32) -> (i32, i32) {
    %c0_i32 = arith.constant 0 : i32
    %c0_i32_0 = arith.constant 0 : i32
    %c0_i32_1 = arith.constant 0 : i32
    return %c0_i32, %c0_i32_0 : i32, i32
  }
  func.func @transform_19(%arg0: i32, %arg1: i32) -> (i32, i32) {
    %c0_i32 = arith.constant 0 : i32
    %c0_i32_0 = arith.constant 0 : i32
    %c0_i32_1 = arith.constant 0 : i32
    return %c0_i32, %c0_i32_0 : i32, i32
  }
  func.func @transform_20(%arg0: i32, %arg1: i32) -> (i32, i32) {
    %c0_i32 = arith.constant 0 : i32
    %c0_i32_0 = arith.constant 0 : i32
    %c0_i32_1 = arith.constant 0 : i32
    return %c0_i32, %c0_i32_0 : i32, i32
  }
  func.func @transform_21(%arg0: i32, %arg1: i32) -> (i32, i32) {
    %c0_i32 = arith.constant 0 : i32
    %c0_i32_0 = arith.constant 0 : i32
    %c0_i32_1 = arith.constant 0 : i32
    return %c0_i32, %c0_i32_0 : i32, i32
  }
  func.func @transform_22(%arg0: i32, %arg1: i32) -> (i32, i32) {
    %c0_i32 = arith.constant 0 : i32
    %c0_i32_0 = arith.constant 0 : i32
    %c0_i32_1 = arith.constant 0 : i32
    return %c0_i32, %c0_i32_0 : i32, i32
  }
  func.func @transform_23(%arg0: i32, %arg1: i32) -> (i32, i32) {
    %c0_i32 = arith.constant 0 : i32
    %c0_i32_0 = arith.constant 0 : i32
    %c0_i32_1 = arith.constant 0 : i32
    return %c0_i32, %c0_i32_0 : i32, i32
  }
  func.func @transform_24(%arg0: i32, %arg1: i32) -> (i32, i32) {
    %c0_i32 = arith.constant 0 : i32
    %c0_i32_0 = arith.constant 0 : i32
    %c0_i32_1 = arith.constant 0 : i32
    return %c0_i32, %c0_i32_0 : i32, i32
  }
  func.func @transform_25(%arg0: i32, %arg1: i32) -> (i32, i32) {
    %c0_i32 = arith.constant 0 : i32
    %c0_i32_0 = arith.constant 0 : i32
    %c0_i32_1 = arith.constant 0 : i32
    return %c0_i32, %c0_i32_0 : i32, i32
  }
  func.func @transform_26(%arg0: i32, %arg1: i32) -> (i32, i32) {
    %c0_i32 = arith.constant 0 : i32
    %c0_i32_0 = arith.constant 0 : i32
    %c0_i32_1 = arith.constant 0 : i32
    return %c0_i32, %c0_i32_0 : i32, i32
  }
  func.func @transform_27(%arg0: i32, %arg1: i32) -> (i32, i32) {
    %c0_i32 = arith.constant 0 : i32
    %c0_i32_0 = arith.constant 0 : i32
    %c0_i32_1 = arith.constant 0 : i32
    return %c0_i32, %c0_i32_0 : i32, i32
  }
  func.func @transform_28(%arg0: i32, %arg1: i32) -> (i32, i32) {
    %c0_i32 = arith.constant 0 : i32
    %c0_i32_0 = arith.constant 0 : i32
    return %arg0, %c0_i32 : i32, i32
  }
}

module attributes {stable_mosaic.version = 11 : i64} {
  func.func @_fused_mlp_kernel(%arg0: i32, %arg1: memref<2x32xf32, #tpu.memory_space<vmem>>, %arg2: memref<32x32xf32, #tpu.memory_space<vmem>>, %arg3: memref<1x32xf32, #tpu.memory_space<vmem>>, %arg4: memref<32x32xf32, #tpu.memory_space<vmem>>, %arg5: memref<1x32xf32, #tpu.memory_space<vmem>>, %arg6: memref<32x64xf32, #tpu.memory_space<vmem>>, %arg7: memref<1x64xf32, #tpu.memory_space<vmem>>, %arg8: memref<64x480xf32, #tpu.memory_space<vmem>>, %arg9: memref<1x480xf32, #tpu.memory_space<vmem>>, %arg10: memref<2x480xf32, #tpu.memory_space<vmem>>) attributes {dimension_semantics = [#tpu.dimension_semantics<parallel>], iteration_bounds = array<i64: 1>, scalar_prefetch = 0 : i64, scratch_operands = 0 : i64, tpu.core_type = #tpu.core_type<tc>, window_params = [{transform_indices = @transform_0, window_bounds = array<i64: 2, 32>}, {pipeline_mode = #tpu.pipeline_mode<synchronous>, transform_indices = @transform_1, window_bounds = array<i64: 32, 32>}, {pipeline_mode = #tpu.pipeline_mode<synchronous>, transform_indices = @transform_2, window_bounds = array<i64: 1, 32>}, {pipeline_mode = #tpu.pipeline_mode<synchronous>, transform_indices = @transform_3, window_bounds = array<i64: 32, 32>}, {pipeline_mode = #tpu.pipeline_mode<synchronous>, transform_indices = @transform_4, window_bounds = array<i64: 1, 32>}, {pipeline_mode = #tpu.pipeline_mode<synchronous>, transform_indices = @transform_5, window_bounds = array<i64: 32, 64>}, {pipeline_mode = #tpu.pipeline_mode<synchronous>, transform_indices = @transform_6, window_bounds = array<i64: 1, 64>}, {pipeline_mode = #tpu.pipeline_mode<synchronous>, transform_indices = @transform_7, window_bounds = array<i64: 64, 480>}, {pipeline_mode = #tpu.pipeline_mode<synchronous>, transform_indices = @transform_8, window_bounds = array<i64: 1, 480>}, {transform_indices = @transform_9, window_bounds = array<i64: 2, 480>}]} {
    %c0 = arith.constant 0 : index
    %c0_0 = arith.constant 0 : index
    %0 = vector.load %arg1[%c0, %c0_0] : memref<2x32xf32, #tpu.memory_space<vmem>>, vector<2x32xf32>
    %c0_1 = arith.constant 0 : index
    %c0_2 = arith.constant 0 : index
    %1 = vector.load %arg2[%c0_1, %c0_2] : memref<32x32xf32, #tpu.memory_space<vmem>>, vector<32x32xf32>
    %c0_3 = arith.constant 0 : index
    %c0_4 = arith.constant 0 : index
    %2 = vector.load %arg3[%c0_3, %c0_4] : memref<1x32xf32, #tpu.memory_space<vmem>>, vector<1x32xf32>
    %cst = arith.constant dense<0.000000e+00> : vector<2x32xf32>
    %3 = tpu.matmul %0, %1, %cst {dimension_numbers = #tpu.dot_dimension_numbers<[1], [0], [0], [1], [0, 0, 1, 1], [], []>} : vector<2x32xf32>, vector<32x32xf32>, vector<2x32xf32> -> vector<2x32xf32>
    %4 = vector.broadcast %2 : vector<1x32xf32> to vector<2x32xf32>
    %5 = arith.addf %3, %4 : vector<2x32xf32>
    %cst_5 = arith.constant 0.000000e+00 : f32
    %cst_6 = arith.constant 6.000000e+00 : f32
    %6 = vector.broadcast %cst_5 : f32 to vector<2x32xf32>
    %7 = arith.maximumf %6, %5 : vector<2x32xf32>
    %8 = vector.broadcast %cst_6 : f32 to vector<2x32xf32>
    %9 = arith.minimumf %8, %7 : vector<2x32xf32>
    %c0_7 = arith.constant 0 : index
    %c0_8 = arith.constant 0 : index
    %10 = vector.load %arg4[%c0_7, %c0_8] : memref<32x32xf32, #tpu.memory_space<vmem>>, vector<32x32xf32>
    %c0_9 = arith.constant 0 : index
    %c0_10 = arith.constant 0 : index
    %11 = vector.load %arg5[%c0_9, %c0_10] : memref<1x32xf32, #tpu.memory_space<vmem>>, vector<1x32xf32>
    %cst_11 = arith.constant dense<0.000000e+00> : vector<2x32xf32>
    %12 = tpu.matmul %9, %10, %cst_11 {dimension_numbers = #tpu.dot_dimension_numbers<[1], [0], [0], [1], [0, 0, 1, 1], [], []>} : vector<2x32xf32>, vector<32x32xf32>, vector<2x32xf32> -> vector<2x32xf32>
    %13 = vector.broadcast %11 : vector<1x32xf32> to vector<2x32xf32>
    %14 = arith.addf %12, %13 : vector<2x32xf32>
    %c0_12 = arith.constant 0 : index
    %c0_13 = arith.constant 0 : index
    %15 = vector.load %arg6[%c0_12, %c0_13] : memref<32x64xf32, #tpu.memory_space<vmem>>, vector<32x64xf32>
    %c0_14 = arith.constant 0 : index
    %c0_15 = arith.constant 0 : index
    %16 = vector.load %arg7[%c0_14, %c0_15] : memref<1x64xf32, #tpu.memory_space<vmem>>, vector<1x64xf32>
    %cst_16 = arith.constant dense<0.000000e+00> : vector<2x64xf32>
    %17 = tpu.matmul %14, %15, %cst_16 {dimension_numbers = #tpu.dot_dimension_numbers<[1], [0], [0], [1], [0, 0, 1, 1], [], []>} : vector<2x32xf32>, vector<32x64xf32>, vector<2x64xf32> -> vector<2x64xf32>
    %18 = vector.broadcast %16 : vector<1x64xf32> to vector<2x64xf32>
    %19 = arith.addf %17, %18 : vector<2x64xf32>
    %cst_17 = arith.constant 0.000000e+00 : f32
    %cst_18 = arith.constant 6.000000e+00 : f32
    %20 = vector.broadcast %cst_17 : f32 to vector<2x64xf32>
    %21 = arith.maximumf %20, %19 : vector<2x64xf32>
    %22 = vector.broadcast %cst_18 : f32 to vector<2x64xf32>
    %23 = arith.minimumf %22, %21 : vector<2x64xf32>
    %c0_19 = arith.constant 0 : index
    %c0_20 = arith.constant 0 : index
    %24 = vector.load %arg8[%c0_19, %c0_20] : memref<64x480xf32, #tpu.memory_space<vmem>>, vector<64x480xf32>
    %c0_21 = arith.constant 0 : index
    %c0_22 = arith.constant 0 : index
    %25 = vector.load %arg9[%c0_21, %c0_22] : memref<1x480xf32, #tpu.memory_space<vmem>>, vector<1x480xf32>
    %cst_23 = arith.constant dense<0.000000e+00> : vector<2x480xf32>
    %26 = tpu.matmul %23, %24, %cst_23 {dimension_numbers = #tpu.dot_dimension_numbers<[1], [0], [0], [1], [0, 0, 1, 1], [], []>} : vector<2x64xf32>, vector<64x480xf32>, vector<2x480xf32> -> vector<2x480xf32>
    %27 = vector.broadcast %25 : vector<1x480xf32> to vector<2x480xf32>
    %28 = arith.addf %26, %27 : vector<2x480xf32>
    %c0_24 = arith.constant 0 : index
    %c0_25 = arith.constant 0 : index
    %29 = vector.load %arg10[%c0_24, %c0_25] : memref<2x480xf32, #tpu.memory_space<vmem>>, vector<2x480xf32>
    tpu.vector_store %arg10[%c0_24, %c0_25], %28 {strides = array<i32>} : memref<2x480xf32, #tpu.memory_space<vmem>>, vector<2x480xf32>,
    return
  }
  func.func @transform_0(%arg0: i32) -> (i32, i32) {
    %c0_i32 = arith.constant 0 : i32
    %c0_i32_0 = arith.constant 0 : i32
    return %arg0, %c0_i32 : i32, i32
  }
  func.func @transform_1(%arg0: i32) -> (i32, i32) {
    %c0_i32 = arith.constant 0 : i32
    %c0_i32_0 = arith.constant 0 : i32
    %c0_i32_1 = arith.constant 0 : i32
    return %c0_i32, %c0_i32_0 : i32, i32
  }
  func.func @transform_2(%arg0: i32) -> (i32, i32) {
    %c0_i32 = arith.constant 0 : i32
    %c0_i32_0 = arith.constant 0 : i32
    %c0_i32_1 = arith.constant 0 : i32
    return %c0_i32, %c0_i32_0 : i32, i32
  }
  func.func @transform_3(%arg0: i32) -> (i32, i32) {
    %c0_i32 = arith.constant 0 : i32
    %c0_i32_0 = arith.constant 0 : i32
    %c0_i32_1 = arith.constant 0 : i32
    return %c0_i32, %c0_i32_0 : i32, i32
  }
  func.func @transform_4(%arg0: i32) -> (i32, i32) {
    %c0_i32 = arith.constant 0 : i32
    %c0_i32_0 = arith.constant 0 : i32
    %c0_i32_1 = arith.constant 0 : i32
    return %c0_i32, %c0_i32_0 : i32, i32
  }
  func.func @transform_5(%arg0: i32) -> (i32, i32) {
    %c0_i32 = arith.constant 0 : i32
    %c0_i32_0 = arith.constant 0 : i32
    %c0_i32_1 = arith.constant 0 : i32
    return %c0_i32, %c0_i32_0 : i32, i32
  }
  func.func @transform_6(%arg0: i32) -> (i32, i32) {
    %c0_i32 = arith.constant 0 : i32
    %c0_i32_0 = arith.constant 0 : i32
    %c0_i32_1 = arith.constant 0 : i32
    return %c0_i32, %c0_i32_0 : i32, i32
  }
  func.func @transform_7(%arg0: i32) -> (i32, i32) {
    %c0_i32 = arith.constant 0 : i32
    %c0_i32_0 = arith.constant 0 : i32
    %c0_i32_1 = arith.constant 0 : i32
    return %c0_i32, %c0_i32_0 : i32, i32
  }
  func.func @transform_8(%arg0: i32) -> (i32, i32) {
    %c0_i32 = arith.constant 0 : i32
    %c0_i32_0 = arith.constant 0 : i32
    %c0_i32_1 = arith.constant 0 : i32
    return %c0_i32, %c0_i32_0 : i32, i32
  }
  func.func @transform_9(%arg0: i32) -> (i32, i32) {
    %c0_i32 = arith.constant 0 : i32
    %c0_i32_0 = arith.constant 0 : i32
    return %arg0, %c0_i32 : i32, i32
  }
}

</mosaic_0001>

<bundles_post_ra>
// kernel: meta_ptp_forward.5
= control target key start
LH: loop header
LB: loop body
LE: loop exit
PB: predicated region body
PF: predicated region fallthrough
CT: control target
= control target key end

     0   :  { %vm39_vm0 = vcmask 1041408   ;;  %vm35_vm1 = vcmask 15360   ;;  %v339_v0 = vmov 0.0   ;;  %vm340_vm2 = vmmov 0   ;;  %s426_s1 = inlined_call_operand.vmem [shape: f32[2,32], index: 1, kind: input, shape index: {}]   ;;  %s427_s0 = inlined_call_operand.vmem [shape: f32[8,2], index: 0, kind: input, shape index: {}]   ;;  %s428_s3 = inlined_call_operand.vmem [shape: f32[32,32], index: 3, kind: input, shape index: {}]   ;;  %s429_s2 = inlined_call_operand.vmem [shape: f32[1,32], index: 2, kind: input, shape index: {}]   ;;  %s430_s5 = inlined_call_operand.vmem [shape: f32[32,32], index: 5, kind: input, shape index: {}]   ;;  %s431_s4 = inlined_call_operand.vmem [shape: f32[1,32], index: 4, kind: input, shape index: {}]   ;;  %s432_s6 = inlined_call_operand.vmem [shape: f32[1,32], index: 6, kind: input, shape index: {}]   ;;  %s433_s7 = inlined_call_operand.vmem [shape: f32[8,32], index: 7, kind: output, shape index: {}]  }
   0x1   :  { %310 = vmatprep.subr.mxu0 %v339_v0  ;;  %v27_v1 = vld [vmem:[%s426_s1] sm:$0x3]  ;;  %312 = vmatprep.mubr.msk.f32.mxu0 %vm340_vm2, %v339_v0  ;;  %v118_v3 = vld [vmem:[%s428_s3 + $0x18] sm:$0xff]  ;;  %v117_v4 = vld [vmem:[%s428_s3 + $0x10] sm:$0xff]  ;;  %vm126_vm3 = vcmask 261120  }
   0x2   :  { %v26_v2 = vld [vmem:[%s427_s0] sm:$0xff]  ;;  %311 = vmatpush3.msk.msra.mxu0 %vm39_vm0, %v27_v1  ;;  %315 = vmatprep.subr.mxu1 %v339_v0  ;;  %v116_v5 = vld [vmem:[%s428_s3 + $0x8] sm:$0xff]  ;;  %v205_v13 = vld [vmem:[%s430_s5 + $0x18] sm:$0xff] }
   0x3   :  { %313 = vmatmul.mubr.msk.f32.vlgmr.msra.gmra.mxu0 %vm35_vm1, %v26_v2  ;;  %323 = vmatprep.mubr.msk.f32.mxu1 %vm340_vm2, %v339_v0  ;;  %v115_v6 = vld [vmem:[%s428_s3] sm:$0xff]  ;;  %v204_v14 = vld [vmem:[%s430_s5 + $0x10] sm:$0xff]  ;;  %v203_v15 = vld [vmem:[%s430_s5 + $0x8] sm:$0xff] }
   0x4   :  { %326 = vmatprep.subr.mxu0 %v339_v0  ;;  %334 = vmatprep.mubr.msk.f32.mxu0 %vm340_vm2, %v339_v0  ;;  %v291_v7 = vld [vmem:[%s429_s2] ss:$0 sm:$0xff] }
   0x5   :  { %316 = vmatpush3.msra.mxu1 %v118_v3  ;;  %327 = vmatpush3.msra.mxu0 %v205_v13  ;;  %v202_v16 = vld [vmem:[%s430_s5] sm:$0xff] }
   0x6   :  { %317 = vmatprep.subr.mxu1 %v339_v0  ;;  %328 = vmatprep.subr.mxu0 %v339_v0  ;;  %v294_v17 = vld [vmem:[%s431_s4] ss:$0 sm:$0xff] }
   0x7   :  { %318 = vmatpush3.msra.mxu1 %v117_v4  ;;  %329 = vmatpush3.msra.mxu0 %v204_v14  ;;  %v296_v23 = vld [vmem:[%s432_s6] ss:$0 sm:$0xff] }
   0x8   :  { %319 = vmatprep.subr.mxu1 %v339_v0  ;;  %330 = vmatprep.subr.mxu0 %v339_v0 }
   0x9   :  { %320 = vmatpush3.msra.mxu1 %v116_v5  ;;  %331 = vmatpush3.msra.mxu0 %v203_v15 }
   0xa   :  { %321 = vmatprep.subr.mxu1 %v339_v0  ;;  %332 = vmatprep.subr.mxu0 %v339_v0 }
   0xb   :  { %322 = vmatpush3.msra.mxu1 %v115_v6  ;;  %333 = vmatpush3.msra.mxu0 %v202_v16 }
  0xc3   :  { %v109_v8 = vpop.f32.mrf.mxu0 }
  0xc4   :  { %v110_v9 = vadd.f32 %v291_v7, %v109_v8 }
  0xc5   :  { %v314_v10 = vpop.f32.mrf.mxu0 }
  0xc6   :  { %v113_v11 = vmax.f32 %v110_v9, 0.0 }
  0xc8   :  { %v114_v12 = vmin.f32 %v113_v11, 6.0 }
  0xca   :  { %324 = vmatmul.mubr.msk.f32.vlgmr.msra.gmra.mxu1 %vm126_vm3, %v114_v12 }
 0x18a   :  { %v196_v18 = vpop.f32.mrf.mxu1 }
 0x18b   :  { %v197_v19 = vadd.f32 %v294_v17, %v196_v18 }
 0x18c   :  { %v325_v20 = vpop.f32.mrf.mxu1 }
 0x18d   :  { %v200_v21 = vmax.f32 %v197_v19, 0.0 }
 0x18f   :  { %v201_v22 = vmin.f32 %v200_v21, 6.0 }
 0x191   :  { %335 = vmatmul.mubr.msk.f32.vlgmr.msra.gmra.mxu0 %vm126_vm3, %v201_v22 }
 0x251   :  { %v282_v24 = vpop.f32.mrf.mxu0 }
 0x252   :  { %v283_v25 = vadd.f32 %v296_v23, %v282_v24 }
 0x253   :  { %v336_v26 = vpop.f32.mrf.mxu0 }
 0x254   :  { %286 = vst.msk [vmem:[%s433_s7] sm:$0xff] %vm126_vm3, %v283_v25 }

// kernel: meta_ptp_forward.4
= control target key start
LH: loop header
LB: loop body
LE: loop exit
PB: predicated region body
PF: predicated region fallthrough
CT: control target
= control target key end

     0   :  { %vm37_vm0 = vcmask 1043456   ;;  %vm30_vm1 = vcmask 31744   ;;  %vm135_vm2 = vcmask 523264   ;;  %vm219_vm3 = vcmask 783360   ;;  %s344_s1 = inlined_call_operand.vmem [shape: f32[4,64], index: 1, kind: input, shape index: {}]   ;;  %s345_s0 = inlined_call_operand.vmem [shape: f32[14,4], index: 0, kind: input, shape index: {}]   ;;  %s346_s3 = inlined_call_operand.vmem [shape: f32[64,96], index: 3, kind: input, shape index: {}]   ;;  %s347_s2 = inlined_call_operand.vmem [shape: f32[1,64], index: 2, kind: input, shape index: {}]   ;;  %s348_s4 = inlined_call_operand.vmem [shape: f32[1,96], index: 4, kind: input, shape index: {}]   ;;  %s349_s5 = inlined_call_operand.vmem [shape: f32[14,96], index: 5, kind: output, shape index: {}]  }
   0x1   :  { %v22_v0 = vld [vmem:[%s344_s1] sm:$0xf]  ;;  %v21_v2 = vld [vmem:[%s345_s0 + $0x8] sm:$0x3f]  ;;  %v127_v3 = vld [vmem:[%s346_s3 + $0x38] sm:$0xff]  ;;  %vm217_vm4 = vcmask 785408  }
   0x2   :  { %v20_v1 = vld [vmem:[%s345_s0] sm:$0xff]  ;;  %245 = vmatprep.subr.msk.mxu0 %vm37_vm0, %v22_v0  ;;  %v126_v4 = vld [vmem:[%s346_s3 + $0x30] sm:$0xff]  ;;  %250 = vmatprep.subr.mxu1 %v127_v3  ;;  %v125_v5 = vld [vmem:[%s346_s3 + $0x28] sm:$0xff] }
   0x3   :  { %247 = vmatprep.mubr.msk.f32.mxu0 %vm30_vm1, %v20_v1  ;;  %246 = vmatpush3.msk.msra.mxu0 %vm37_vm0, %v22_v0  ;;  %v124_v6 = vld [vmem:[%s346_s3 + $0x20] sm:$0xff]  ;;  %v123_v7 = vld [vmem:[%s346_s3 + $0x18] sm:$0xff]  ;;  %v122_v8 = vld [vmem:[%s346_s3 + $0x10] sm:$0xff] }
   0x4   :  { %248 = vmatmul.mubr.msk.f32.vlgmr.msra.gmra.mxu0 %vm30_vm1, %v21_v2  ;;  %251 = vmatpush3.msra.mxu1 %v127_v3  ;;  %v121_v9 = vld [vmem:[%s346_s3 + $0x8] sm:$0xff]  ;;  %v120_v10 = vld [vmem:[%s346_s3] sm:$0xff] }
   0x5   :  { %252 = vmatprep.subr.mxu1 %v126_v4  ;;  %v225_v11 = vld [vmem:[%s347_s2] ss:$0 sm:$0xff] }
   0x6   :  { %253 = vmatpush3.msra.mxu1 %v126_v4  ;;  %v229_v20 = vld [vmem:[%s348_s4] ss:$0 sm:$0xff] }
   0x7   :  { %254 = vmatprep.subr.mxu1 %v125_v5 }
   0x8   :  { %255 = vmatpush3.msra.mxu1 %v125_v5 }
   0x9   :  { %256 = vmatprep.subr.mxu1 %v124_v6 }
   0xa   :  { %257 = vmatpush3.msra.mxu1 %v124_v6 }
   0xb   :  { %258 = vmatprep.subr.mxu1 %v123_v7 }
   0xc   :  { %259 = vmatpush3.msra.mxu1 %v123_v7 }
   0xd   :  { %260 = vmatprep.subr.mxu1 %v122_v8 }
   0xe   :  { %261 = vmatpush3.msra.mxu1 %v122_v8 }
   0xf   :  { %262 = vmatprep.subr.mxu1 %v121_v9 }
  0x10   :  { %263 = vmatpush3.msra.mxu1 %v121_v9 }
  0x11   :  { %264 = vmatprep.subr.mxu1 %v120_v10 }
  0x12   :  { %265 = vmatpush3.msra.mxu1 %v120_v10 }
  0xc4   :  { %v249_v12 = vpop.f32.mrf.mxu0 }
  0xc5   :  { %v113_v13 = vadd.f32 %v249_v12, %v225_v11 }
  0xc6   :  { %v107_v14 = vpop.f32.mrf.mxu0 }
  0xc7   :  { %v108_v15 = vadd.f32 %v225_v11, %v107_v14  ;;  %v117_v16 = vmax.f32 %v113_v13, 0.0 }
  0xc9   :  { %v116_v17 = vmax.f32 %v108_v15, 0.0  ;;  %v119_v19 = vmin.f32 %v117_v16, 6.0 }
  0xcb   :  { %v118_v18 = vmin.f32 %v116_v17, 6.0 }
  0xcd   :  { %266 = vmatprep.mubr.msk.f32.mxu1 %vm135_vm2, %v118_v18 }
  0xce   :  { %267 = vmatmul.mubr.msk.f32.vlgmr.msra.gmra.mxu1 %vm135_vm2, %v119_v19 }
 0x18e   :  { %v268_v21 = vpop.f32.mrf.mxu1 }
 0x18f   :  { %v214_v22 = vadd.f32 %v268_v21, %v229_v20 }
 0x190   :  { %v208_v23 = vpop.f32.mrf.mxu1 }
 0x191   :  { %220 = vst.msk [vmem:[%s349_s5 + $0x8] sm:$0x3f] %vm219_vm3, %v214_v22  ;;  %v209_v24 = vadd.f32 %v229_v20, %v208_v23 }
 0x193   :  { %218 = vst.msk [vmem:[%s349_s5] sm:$0xff] %vm217_vm4, %v209_v24 }

// kernel: meta_ptp_forward.7
= control target key start
LH: loop header
LB: loop body
LE: loop exit
PB: predicated region body
PF: predicated region fallthrough
CT: control target
= control target key end

     0   :  { %v583_v0 = vmov 0.0   ;;  %vm584_vm0 = vmmov 0   ;;  %vm44_vm1 = vcmask 261120   ;;  %vm344_vm2 = vcmask 523264   ;;  %s809_s1 = inlined_call_operand.vmem [shape: f32[32,32], index: 1, kind: input, shape index: {}]   ;;  %s810_s0 = inlined_call_operand.vmem [shape: f32[2,32], index: 0, kind: input, shape index: {}]   ;;  %s811_s3 = inlined_call_operand.vmem [shape: f32[32,32], index: 3, kind: input, shape index: {}]   ;;  %s812_s5 = inlined_call_operand.vmem [shape: f32[32,64], index: 5, kind: input, shape index: {}]   ;;  %s813_s2 = inlined_call_operand.vmem [shape: f32[1,32], index: 2, kind: input, shape index: {}]   ;;  %s814_s7 = inlined_call_operand.vmem [shape: f32[64,480], index: 7, kind: input, shape index: {}]   ;;  %s815_s4 = inlined_call_operand.vmem [shape: f32[1,32], index: 4, kind: input, shape index: {}]   ;;  %s816_s6 = inlined_call_operand.vmem [shape: f32[1,64], index: 6, kind: input, shape index: {}]   ;;  %s817_s8 = inlined_call_operand.vmem [shape: f32[1,480], index: 8, kind: input, shape index: {}]   ;;  %s818_s9 = inlined_call_operand.vmem [shape: f32[2,480], index: 9, kind: output, shape index: {}]  }
   0x1   :  { %547 = vmatprep.subr.mxu0 %v583_v0  ;;  %v36_v1 = vld [vmem:[%s809_s1 + $0x18] sm:$0xff]  ;;  %v35_v2 = vld [vmem:[%s809_s1 + $0x10] sm:$0xff]  ;;  %555 = vmatprep.mubr.msk.f32.mxu0 %vm584_vm0, %v583_v0  ;;  %v34_v3 = vld [vmem:[%s809_s1 + $0x8] sm:$0xff]  ;;  %v324_v62 = vlaneseq  ;;  %vm512_vm3 = vcmask 1041408   ;;  %vm513_vm4 = vcmask 1043458   ;;  %vm515_vm6 = vcmask 1045508  }
   0x2   :  { %548 = vmatpush3.msra.mxu0 %v36_v1  ;;  %558 = vmatprep.subr.mxu1 %v583_v0  ;;  %v33_v4 = vld [vmem:[%s809_s1] sm:$0xff]  ;;  %v123_v6 = vld [vmem:[%s811_s3 + $0x18] sm:$0xff]  ;;  %v122_v7 = vld [vmem:[%s811_s3 + $0x10] sm:$0xff]  ;;  %vm517_vm8 = vcmask 785414  }
   0x3   :  { %549 = vmatprep.subr.mxu0 %v583_v0  ;;  %566 = vmatprep.mubr.msk.f32.mxu1 %vm584_vm0, %v583_v0  ;;  %v32_v5 = vld [vmem:[%s810_s0] sm:$0x3]  ;;  %v121_v8 = vld [vmem:[%s811_s3 + $0x8] sm:$0xff]  ;;  %v207_v10 = vld [vmem:[%s812_s5 + $0x18] sm:$0xff]  ;;  %v325_v63 = vshrl.u32 %v324_v62, 7 }
   0x4   :  { %550 = vmatpush3.msra.mxu0 %v35_v2  ;;  %559 = vmatpush3.msra.mxu1 %v123_v6  ;;  %v120_v9 = vld [vmem:[%s811_s3] sm:$0xff]  ;;  %v206_v11 = vld [vmem:[%s812_s5 + $0x10] sm:$0xff]  ;;  %v205_v18 = vld [vmem:[%s812_s5 + $0x8] sm:$0xff]  ;;  %v585_v2 = vmov 1983009808  }
   0x5   :  { %551 = vmatprep.subr.mxu0 %v583_v0  ;;  %560 = vmatprep.subr.mxu1 %v583_v0  ;;  %v524_v12 = vld [vmem:[%s813_s2] ss:$0 sm:$0xff]  ;;  %v319_v20 = vld [vmem:[%s814_s7 + $0xe8] sm:$0xff]  ;;  %v321_v21 = vld [vmem:[%s814_s7 + $0xf8] sm:$0xff]  ;;  %v334_v1 = vsub.s32 2, %v325_v63  ;;  %v338_v6 = vsub.s32 3, %v325_v63 }
   0x6   :  { %552 = vmatpush3.msra.mxu0 %v34_v3  ;;  %561 = vmatpush3.msra.mxu1 %v122_v7  ;;  %v204_v19 = vld [vmem:[%s812_s5] sm:$0xff]  ;;  %v315_v23 = vld [vmem:[%s814_s7 + $0xc8] sm:$0xff]  ;;  %v320_v33 = vld [vmem:[%s814_s7 + $0xf0] sm:$0xff]  ;;  %v497_v3 = vunpack.c.l.s4 %v585_v2 }
   0x7   :  { %553 = vmatprep.subr.mxu0 %v583_v0  ;;  %562 = vmatprep.subr.mxu1 %v583_v0  ;;  %v318_v22 = vld [vmem:[%s814_s7 + $0xe0] sm:$0xff]  ;;  %v311_v25 = vld [vmem:[%s814_s7 + $0xa8] sm:$0xff]  ;;  %v317_v35 = vld [vmem:[%s814_s7 + $0xd8] sm:$0xff] }
   0x8   :  { %554 = vmatpush3.msra.mxu0 %v33_v4  ;;  %563 = vmatpush3.msra.mxu1 %v121_v8  ;;  %v314_v24 = vld [vmem:[%s814_s7 + $0xc0] sm:$0xff]  ;;  %v307_v27 = vld [vmem:[%s814_s7 + $0x88] sm:$0xff]  ;;  %v316_v36 = vld [vmem:[%s814_s7 + $0xd0] sm:$0xff] }
   0x9   :  { %556 = vmatmul.mubr.msk.f32.vlgmr.msra.gmra.mxu0 %vm44_vm1, %v32_v5  ;;  %569 = vmatprep.subr.mxu0 %v583_v0  ;;  %v310_v26 = vld [vmem:[%s814_s7 + $0xa0] sm:$0xff]  ;;  %v303_v29 = vld [vmem:[%s814_s7 + $0x68] sm:$0xff]  ;;  %v313_v37 = vld [vmem:[%s814_s7 + $0xb8] sm:$0xff]  ;;  %v330_v5 = vsub.s32 1, %v325_v63 }
   0xa   :  { %577 = vmatprep.mubr.msk.f32.mxu0 %vm584_vm0, %v583_v0  ;;  %564 = vmatprep.subr.mxu1 %v583_v0  ;;  %v306_v28 = vld [vmem:[%s814_s7 + $0x80] sm:$0xff]  ;;  %v312_v38 = vld [vmem:[%s814_s7 + $0xb0] sm:$0xff]  ;;  %v309_v39 = vld [vmem:[%s814_s7 + $0x98] sm:$0xff] }
   0xb   :  { %565 = vmatpush3.msra.mxu1 %v120_v9  ;;  %570 = vmatpush3.msra.mxu0 %v207_v10  ;;  %v526_v30 = vld [vmem:[%s815_s4] ss:$0 sm:$0xff]  ;;  %v308_v40 = vld [vmem:[%s814_s7 + $0x90] sm:$0xff]  ;;  %v305_v41 = vld [vmem:[%s814_s7 + $0x78] sm:$0xff]  ;;  %v498_v9 = vunpack.c.0.s8 %v497_v3 }
   0xc   :  { %571 = vmatprep.subr.mxu0 %v583_v0  ;;  %364 = vmatprep.subr.mxu1 %v319_v20  ;;  %v302_v42 = vld [vmem:[%s814_s7 + $0x60] sm:$0xff]  ;;  %v304_v43 = vld [vmem:[%s814_s7 + $0x70] sm:$0xff]  ;;  %v299_v44 = vld [vmem:[%s814_s7 + $0x48] sm:$0xff] }
   0xd   :  { %572 = vmatpush3.msra.mxu0 %v206_v11  ;;  %v301_v45 = vld [vmem:[%s814_s7 + $0x58] sm:$0xff]  ;;  %v298_v46 = vld [vmem:[%s814_s7 + $0x40] sm:$0xff]  ;;  %v300_v47 = vld [vmem:[%s814_s7 + $0x50] sm:$0xff] }
   0xe   :  { %573 = vmatprep.subr.mxu0 %v583_v0  ;;  %v295_v48 = vld [vmem:[%s814_s7 + $0x28] sm:$0xff]  ;;  %v297_v49 = vld [vmem:[%s814_s7 + $0x38] sm:$0xff]  ;;  %v294_v50 = vld [vmem:[%s814_s7 + $0x20] sm:$0xff] }
   0xf   :  { %574 = vmatpush3.msra.mxu0 %v205_v18  ;;  %v296_v51 = vld [vmem:[%s814_s7 + $0x30] sm:$0xff]  ;;  %v291_v52 = vld [vmem:[%s814_s7 + $0x8] sm:$0xff]  ;;  %v293_v53 = vld [vmem:[%s814_s7 + $0x18] sm:$0xff] }
  0x10   :  { %575 = vmatprep.subr.mxu0 %v583_v0  ;;  %v290_v54 = vld [vmem:[%s814_s7] sm:$0xff]  ;;  %v292_v55 = vld [vmem:[%s814_s7 + $0x10] sm:$0xff]  ;;  %vm514_vm5 = vmor %vm513_vm4, %vm512_vm3 }
  0x11   :  { %576 = vmatpush3.msra.mxu0 %v204_v19  ;;  %v528_v56 = vld [vmem:[%s816_s6] ss:$0 sm:$0xff]  ;;  %vm516_vm7 = vmor %vm515_vm6, %vm514_vm5 }
  0x12   :  { %435 = vmatprep.subr.mxu0 %v321_v21  ;;  %v322_v4 = vld [vmem:[%s817_s8] sm:$0xf]  ;;  %vm518_vm9 = vmor %vm517_vm8, %vm516_vm7 }
  0x13   :  { %v335_v8 = vrot.slane %v322_v4, %v334_v1  ;;  %v331_v10 = vrot.slane %v322_v4, %v330_v5  ;;  %v339_v11 = vrot.slane %v322_v4, %v338_v6 }
  0xc9   :  { %v114_v13 = vpop.f32.mrf.mxu0 }
  0xca   :  { %v115_v14 = vadd.f32 %v524_v12, %v114_v13 }
  0xcb   :  { %v557_v15 = vpop.f32.mrf.mxu0 }
  0xcc   :  { %v118_v16 = vmax.f32 %v115_v14, 0.0  ;;  %v501_v15 = vsub.s32 %v498_v9, %v325_v63 }
  0xce   :  { %v119_v17 = vmin.f32 %v118_v16, 6.0 }
  0xd0   :  { %567 = vmatmul.mubr.msk.f32.vlgmr.msra.gmra.mxu1 %vm44_vm1, %v119_v17 }
  0xd1   :  { %412 = vmatprep.mubr.f32.mxu1 %v583_v0  ;;  %365 = vmatpush1.msra.mxu1 %v318_v22 }
  0xd2   :  { %366 = vmatprep.subr.mxu1 %v315_v23 }
  0xd3   :  { %367 = vmatpush1.msra.mxu1 %v314_v24 }
  0xd4   :  { %368 = vmatprep.subr.mxu1 %v311_v25 }
  0xd5   :  { %369 = vmatpush1.msra.mxu1 %v310_v26 }
  0xd6   :  { %370 = vmatprep.subr.mxu1 %v307_v27 }
  0xd7   :  { %371 = vmatpush1.msra.mxu1 %v306_v28 }
  0xd8   :  { %372 = vmatprep.subr.mxu1 %v303_v29 }
  0xd9   :  { %373 = vmatpush1.msra.mxu1 %v302_v42 }
  0xda   :  { %374 = vmatprep.subr.mxu1 %v299_v44 }
  0xdb   :  { %375 = vmatpush1.msra.mxu1 %v298_v46 }
  0xdc   :  { %376 = vmatprep.subr.mxu1 %v295_v48 }
  0xdd   :  { %377 = vmatpush1.msra.mxu1 %v294_v50 }
  0xde   :  { %378 = vmatprep.subr.mxu1 %v291_v52 }
  0xdf   :  { %379 = vmatpush1.msra.mxu1 %v290_v54 }
 0x190   :  { %v200_v31 = vpop.f32.mrf.mxu1 }
 0x191   :  { %v201_v32 = vadd.f32 %v526_v30, %v200_v31 }
 0x192   :  { %v568_v34 = vpop.f32.mrf.mxu1 }
 0x193   :  { %578 = vmatmul.mubr.msk.f32.vlgmr.msra.gmra.mxu0 %vm44_vm1, %v201_v32 }
 0x194   :  { %436 = vmatpush1.msra.mxu0 %v320_v33  ;;  %483 = vmatprep.mubr.f32.mxu0 %v583_v0  ;;  %v326_v0 = vsub.s32 0, %v325_v63 }
 0x195   :  { %437 = vmatprep.subr.mxu0 %v317_v35 }
 0x196   :  { %438 = vmatpush1.msra.mxu0 %v316_v36  ;;  %v327_v7 = vrot.slane %v322_v4, %v326_v0 }
 0x197   :  { %439 = vmatprep.subr.mxu0 %v313_v37 }
 0x198   :  { %440 = vmatpush1.msra.mxu0 %v312_v38 }
 0x199   :  { %441 = vmatprep.subr.mxu0 %v309_v39 }
 0x19a   :  { %442 = vmatpush1.msra.mxu0 %v308_v40 }
 0x19b   :  { %443 = vmatprep.subr.mxu0 %v305_v41 }
 0x19c   :  { %444 = vmatpush1.msra.mxu0 %v304_v43 }
 0x19d   :  { %445 = vmatprep.subr.mxu0 %v301_v45 }
 0x19e   :  { %446 = vmatpush1.msra.mxu0 %v300_v47 }
 0x19f   :  { %447 = vmatprep.subr.mxu0 %v297_v49 }
 0x1a0   :  { %448 = vmatpush1.msra.mxu0 %v296_v51 }
 0x1a1   :  { %449 = vmatprep.subr.mxu0 %v293_v53 }
 0x1a2   :  { %450 = vmatpush1.msra.mxu0 %v292_v55 }
 0x253   :  { %v284_v57 = vpop.f32.mrf.mxu0 }
 0x254   :  { %v285_v58 = vadd.f32 %v528_v56, %v284_v57 }
 0x255   :  { %v579_v59 = vpop.f32.mrf.mxu0 }
 0x256   :  { %v288_v60 = vmax.f32 %v285_v58, 0.0 }
 0x258   :  { %v289_v61 = vmin.f32 %v288_v60, 6.0 }
 0x25a   :  { %530 = vmatmul.mubr.msk.f32.vlgmr.msra.gmra.mxu1 %vm344_vm2, %v289_v61  ;;  %531 = vmatmul.mubr.msk.f32.vlgmr.msra.gmra.mxu0 %vm344_vm2, %v289_v61 }
 0x31a   :  { %v414_v12 = vpop.f32.mrf.mxu1  ;;  %v485_v13 = vpop.f32.mrf.mxu0 }
 0x31b   :  { %v415_v17 = vadd.f32 %v414_v12, %v327_v7  ;;  %v486_v18 = vadd.f32 %v485_v13, %v335_v8 }
 0x31c   :  { %v416_v14 = vpop.f32.mrf.mxu1  ;;  %v487_v16 = vpop.f32.mrf.mxu0 }
 0x31d   :  { %v417_v19 = vadd.f32 %v416_v14, %v331_v10  ;;  %v488_v20 = vadd.f32 %v487_v16, %v339_v11 }
 0x31f   :  { %v494_v21 = vcombine.low %v415_v17, %v417_v19  ;;  %v495_v22 = vcombine.low %v486_v18, %v488_v20 }
 0x321   :  { %v502_v23 = vrot.slane %v494_v21, %v501_v15  ;;  %v509_v24 = vrot.slane %v495_v22, %v501_v15 }
 0x323   :  { %v510_v25 = vcombine.low %v502_v23, %v509_v24 }
 0x325   :  { %519 = vst.msk [vmem:[%s818_s9] sm:$0xff] %vm518_vm9, %v510_v25 }

// kernel: meta_ptp_forward.6
= control target key start
LH: loop header
LB: loop body
LE: loop exit
PB: predicated region body
PF: predicated region fallthrough
CT: control target
= control target key end

     0   :  { %s4369_s0 = inlined_call_operand.vmem [shape: f32[2,32], index: 0, kind: input, shape index: {}]   ;;  %s4370_s1 = inlined_call_operand.vmem [shape: f32[7,16,3], index: 1, kind: input, shape index: {}]   ;;  %s4371_s2 = inlined_call_operand.vmem [shape: f32[7,16,4], index: 2, kind: input, shape index: {}]   ;;  %s4372_s3 = inlined_call_operand.vmem [shape: f32[7,2,8], index: 3, kind: input, shape index: {}]   ;;  %s4373_s4 = inlined_call_operand.vmem [shape: f32[7,2,32], index: 4, kind: input, shape index: {}]   ;;  %s4374_s5 = inlined_call_operand.vmem [shape: f32[3,256], index: 5, kind: input, shape index: {}]   ;;  %s4375_s6 = inlined_call_operand.vmem [shape: f32[1,256], index: 6, kind: input, shape index: {}]   ;;  %s4376_s7 = inlined_call_operand.vmem [shape: f32[256,256], index: 7, kind: input, shape index: {}]   ;;  %s4377_s8 = inlined_call_operand.vmem [shape: f32[1,256], index: 8, kind: input, shape index: {}]   ;;  %s4378_s9 = inlined_call_operand.vmem [shape: f32[256,256], index: 9, kind: input, shape index: {}]   ;;  %s4379_s10 = inlined_call_operand.vmem [shape: f32[1,256], index: 10, kind: input, shape index: {}]   ;;  %s4380_s11 = inlined_call_operand.vmem [shape: f32[4,64], index: 11, kind: input, shape index: {}]   ;;  %s4381_s12 = inlined_call_operand.vmem [shape: f32[1,64], index: 12, kind: input, shape index: {}]   ;;  %s4382_s13 = inlined_call_operand.vmem [shape: f32[64,128], index: 13, kind: input, shape index: {}]   ;;  %s4383_s14 = inlined_call_operand.vmem [shape: f32[1,128], index: 14, kind: input, shape index: {}]   ;;  %s4384_s15 = inlined_call_operand.vmem [shape: f32[128,128], index: 15, kind: input, shape index: {}]   ;;  %s4385_s16 = inlined_call_operand.vmem [shape: f32[1,128], index: 16, kind: input, shape index: {}]   ;;  %s4386_s17 = inlined_call_operand.vmem [shape: f32[32,256], index: 17, kind: input, shape index: {}]   ;;  %s4387_s18 = inlined_call_operand.vmem [shape: f32[1,256], index: 18, kind: input, shape index: {}]   ;;  %s4388_s19 = inlined_call_operand.vmem [shape: f32[256,256], index: 19, kind: input, shape index: {}]   ;;  %s4389_s20 = inlined_call_operand.vmem [shape: f32[1,256], index: 20, kind: input, shape index: {}]   ;;  %s4390_s21 = inlined_call_operand.vmem [shape: f32[256,256], index: 21, kind: input, shape index: {}]   ;;  %s4391_s22 = inlined_call_operand.vmem [shape: f32[1,256], index: 22, kind: input, shape index: {}]   ;;  %s4392_s23 = inlined_call_operand.vmem [shape: f32[128,96], index: 23, kind: input, shape index: {}]   ;;  %s4393_s24 = inlined_call_operand.vmem [shape: f32[32,96], index: 24, kind: input, shape index: {}]   ;;  %s4394_s25 = inlined_call_operand.vmem [shape: f32[32,96], index: 25, kind: input, shape index: {}]   ;;  %s4395_s26 = inlined_call_operand.vmem [shape: f32[1,96], index: 26, kind: input, shape index: {}]   ;;  %s4396_s27 = inlined_call_operand.vmem [shape: f32[1,96], index: 27, kind: input, shape index: {}]   ;;  %s4397_s28 = inlined_call_operand.vmem [shape: f32[2,32], index: 28, kind: output, shape index: {}]  }
   0x1   :  { %4404 = sst [smem:[#allocation6_spill]] %s4369_s0 }
   0x2   :  { %4405 = sst [smem:[#allocation7_spill]] %s4370_s1 }
   0x3   :  { %4406 = sst [smem:[#allocation8_spill]] %s4371_s2 }
   0x4   :  { %4407 = sst [smem:[#allocation9_spill]] %s4372_s3 }
   0x5   :  { %4408 = sst [smem:[#allocation10_spill]] %s4373_s4 }
   0x6   :  { %4409 = sst [smem:[#allocation11_spill]] %s4374_s5  ;;  %s3244_s5 = smov 0  }
   0x7   :  { %4410 = sst [smem:[#allocation12_spill]] %s4375_s6 }
   0x8   :  { %4411 = sst [smem:[#allocation13_spill]] %s4376_s7 }
   0x9   :  { %4412 = sst [smem:[#allocation14_spill]] %s4377_s8  ;;  %s3242_s8 = smov 0  }
   0xa   :  { %4413 = sst [smem:[#allocation15_spill]] %s4378_s9  ;;  %s3246_s9 = smov 0  }
   0xb   :  { %4414 = sst [smem:[#allocation16_spill]] %s4379_s10 }
   0xc   :  { %4415 = sst [smem:[#allocation17_spill]] %s4380_s11 }
   0xd   :  { %4416 = sst [smem:[#allocation18_spill]] %s4381_s12 }
   0xe   :  { %4417 = sst [smem:[#allocation19_spill]] %s4392_s23 }
   0xf   :  { %4418 = sst [smem:[#allocation20_spill]] %s4393_s24 }
  0x10   :  { %4419 = sst [smem:[#allocation21_spill]] %s4395_s26 }
  0x11   :  { %4420 = sst [smem:[#allocation22_spill]] %s4396_s27 }
  0x12   :  { %4421 = sst [smem:[#allocation23_spill]] %s4397_s28 }
  0x13 LB: > { %4422 = sst [smem:[#allocation3_spill]] %s3085_s5  ;;  %s47_s30 = sadd.s32 1, %s3085_s5  ;;  %s3089_s9 = sphi %s3246_s9, %s38_s9   ;;  %s3085_s5 = sphi %s3244_s5, %s4447_s5   ;;  %s3081_s8 = sphi %s3242_s8, %s4446_s8  }
  0x14   : > { %4423 = sst [smem:[#allocation4_spill]] %s3089_s9  ;;  %p2804_p0 = scmp.ge.s32.totalorder %s3089_s9, 1 }
  0x15   : > { %p48_p1 = scmp.ge.s32.totalorder %s47_s30, 7  ;;  %p835_p2 = scmp.lt.s32.totalorder %s3089_s9, 8 }
  0x17   : > { %s4449_s30 = smov (%p48_p1, %s47_s30), 0  ;;  %p836_p3 = pnand %p2804_p0, %p835_p2 }
  0x18   : > { %4424 = sst [smem:[#allocation5_spill]] %s4449_s30  ;;  %p944_p4 = scmp.lt.s32.totalorder (!%p836_p3), %s3081_s8, 6 }
  0x19   : > { %839 = sbr.rel (%p836_p3) target bundleno = 2131 (0x853), region = 132  ;;  %s4425_s29 = sld [smem:[#allocation7_spill]] (!%p836_p3) }
  0x1a   : > { %s4426_s1 = sld [smem:[#allocation8_spill]] (!%p836_p3)  ;;  %p2811_p5 = scmp.ne.s32.totalorder (!%p836_p3), %s3081_s8, 0 }
  0x1b   : > { %s4427_s28 = sld [smem:[#allocation9_spill]] (!%p836_p3) }
  0x1c   : > { %s4428_s23 = sld [smem:[#allocation10_spill]] (!%p836_p3) }
  0x1e   : > { %s945_s3 = scalar_select %p944_p4, %s3081_s8, 6 }
  0x1f   : > { %984 = sbr.rel (%p2811_p5) target bundleno = 39 (0x27), region = 136  ;;  %s4429_s11 = sld [smem:[#allocation6_spill]] (!%p2811_p5) }
  0x20   : > { %s2835_s6 = sshll.u32 %s945_s3, 4  ;;  %s2809_s10 = sshll.u32 %s945_s3, 1 }
  0x21   : > { %s3263_s2 = scalar_lea.vmem %s4425_s29, %s2835_s6  ;;  %s3268_s4 = scalar_lea.vmem %s4426_s1, %s2835_s6 }
  0x22   : > { %s3273_s30 = scalar_lea.vmem %s4427_s28, %s2809_s10  ;;  %s3278_s24 = scalar_lea.vmem %s4428_s23, %s2809_s10 }
  0x24   : > { %vm986_vm0 = vcmask 254976  }
  0x25   : > { %v985_v0 = vld [vmem:[%s4429_s11] sm:$0x3] }
  0x26   : > { %987 = vst.msk [vmem:[#allocation2] sm:$0x3] %vm986_vm0, %v985_v0 }
  0x27 PF: > { %v996_v1 = vld [vmem:[%s4386_s17 + $0x38] sm:$0xff]  ;;  %v995_v2 = vld [vmem:[%s4386_s17 + $0x30] sm:$0xff]  ;;  %v994_v3 = vld [vmem:[%s4386_s17 + $0x28] sm:$0xff]  ;;  %v3091_v5 = vmov 0.0   ;;  %vm1009_vm1 = vcmask 261120   ;;  %s4430_s28 = sld [smem:[#allocation11_spill]] }
  0x28   : > { %1037 = vmatprep.subr.mxu1 %v996_v1  ;;  %v993_v4 = vld [vmem:[%s4386_s17 + $0x20] sm:$0xff]  ;;  %1077 = vmatprep.mubr.f32.mxu1 %v3091_v5  ;;  %v992_v6 = vld [vmem:[%s4386_s17 + $0x18] sm:$0xff]  ;;  %v991_v7 = vld [vmem:[%s4386_s17 + $0x10] sm:$0xff]  ;;  %vm1410_vm2 = vcmask 1042432   ;;  %s4431_s5 = sld [smem:[#allocation13_spill]]  ;;  %vm1403_vm3 = vcmask 23552  }
  0x29   : > { %1038 = vmatpush1.msra.mxu1 %v995_v2  ;;  %v990_v8 = vld [vmem:[%s4386_s17 + $0x8] sm:$0xff]  ;;  %v989_v9 = vld [vmem:[%s4386_s17] sm:$0xff]  ;;  %v1119_v11 = vld [vmem:[%s4388_s19 + $0xf8] sm:$0xff]  ;;  %s4433_s10 = sld [smem:[#allocation15_spill]]  ;;  %vm1831_vm4 = vcmask 1043456   ;;  %vm1824_vm5 = vcmask 31744  }
  0x2a   : > { %1039 = vmatprep.subr.mxu1 %v994_v3  ;;  %v1118_v12 = vld [vmem:[%s4388_s19 + $0xf0] sm:$0xff]  ;;  %v1117_v13 = vld [vmem:[%s4388_s19 + $0xe8] sm:$0xff]  ;;  %v1116_v14 = vld [vmem:[%s4388_s19 + $0xe0] sm:$0xff]  ;;  %s4434_s0 = sld [smem:[#allocation12_spill]]  ;;  %vm1929_vm6 = vcmask 523264   ;;  %vm2188_vm9 = vcmask 1041409  }
  0x2b   : > { %1040 = vmatpush1.msra.mxu1 %v993_v4  ;;  %v1115_v15 = vld [vmem:[%s4388_s19 + $0xd8] sm:$0xff]  ;;  %v1114_v16 = vld [vmem:[%s4388_s19 + $0xd0] sm:$0xff]  ;;  %v1113_v17 = vld [vmem:[%s4388_s19 + $0xc8] sm:$0xff]  ;;  %s4435_s8 = sld [smem:[#allocation17_spill]]  ;;  %vm2192_vm11 = vcmask 58368   ;;  %vm3093_vm12 = vmmov 0  }
  0x2c   : > { %1041 = vmatprep.subr.mxu1 %v992_v6  ;;  %v1112_v18 = vld [vmem:[%s4388_s19 + $0xc0] sm:$0xff]  ;;  %v1111_v19 = vld [vmem:[%s4388_s19 + $0xb8] sm:$0xff]  ;;  %v1110_v20 = vld [vmem:[%s4388_s19 + $0xb0] sm:$0xff]  ;;  %s4436_s12 = sld [smem:[#allocation14_spill]]  ;;  %vm2233_vm14 = vcmask 64512   ;;  %s3096_s11 = smov 32  }
  0x2d   : > { %1042 = vmatpush1.msra.mxu1 %v991_v7  ;;  %v988_v10 = vld [vmem:[#allocation2] sm:$0x3]  ;;  %v1109_v21 = vld [vmem:[%s4388_s19 + $0xa8] sm:$0xff]  ;;  %v1107_v23 = vld [vmem:[%s4388_s19 + $0x98] sm:$0xff]  ;;  %s4437_s29 = sld [smem:[#allocation18_spill]]  ;;  %vm2669_vm15 = vcmask 254976  }
  0x2e   : > { %1043 = vmatprep.subr.mxu1 %v990_v8  ;;  %v1108_v22 = vld [vmem:[%s4388_s19 + $0xa0] sm:$0xff]  ;;  %v1106_v24 = vld [vmem:[%s4388_s19 + $0x90] sm:$0xff]  ;;  %v1105_v25 = vld [vmem:[%s4388_s19 + $0x88] sm:$0xff]  ;;  %s4432_s26 = smov %s4431_s5  ;;  %s4439_s6 = sld [smem:[#allocation20_spill]] }
  0x2f   : > { %1044 = vmatpush1.msra.mxu1 %v989_v9  ;;  %v1104_v26 = vld [vmem:[%s4388_s19 + $0x80] sm:$0xff]  ;;  %v1103_v27 = vld [vmem:[%s4388_s19 + $0x78] sm:$0xff]  ;;  %v1102_v28 = vld [vmem:[%s4388_s19 + $0x70] sm:$0xff]  ;;  %s4440_s9 = sld [smem:[#allocation19_spill]] }
  0x30   : > { %2812 = vmatmul.mubr.msk.f32.vlgmr.msra.gmra.mxu1 %vm1009_vm1, %v988_v10  ;;  %1164 = vmatprep.subr.mxu1 %v1119_v11  ;;  %v1101_v29 = vld [vmem:[%s4388_s19 + $0x68] sm:$0xff]  ;;  %v1100_v30 = vld [vmem:[%s4388_s19 + $0x60] sm:$0xff]  ;;  %v1099_v31 = vld [vmem:[%s4388_s19 + $0x58] sm:$0xff]  ;;  %s4443_s3 = sld [smem:[#allocation21_spill]] }
  0x31   : > { %1165 = vmatpush1.msra.mxu1 %v1118_v12  ;;  %v1098_v32 = vld [vmem:[%s4388_s19 + $0x50] sm:$0xff]  ;;  %v1097_v33 = vld [vmem:[%s4388_s19 + $0x48] sm:$0xff]  ;;  %v1096_v34 = vld [vmem:[%s4388_s19 + $0x40] sm:$0xff] }
  0x32   : > { %1166 = vmatprep.subr.mxu1 %v1117_v13  ;;  %v1095_v35 = vld [vmem:[%s4388_s19 + $0x38] sm:$0xff]  ;;  %v1094_v36 = vld [vmem:[%s4388_s19 + $0x30] sm:$0xff]  ;;  %v1093_v37 = vld [vmem:[%s4388_s19 + $0x28] sm:$0xff] }
  0x33   : > { %1167 = vmatpush1.msra.mxu1 %v1116_v14  ;;  %v1092_v38 = vld [vmem:[%s4388_s19 + $0x20] sm:$0xff]  ;;  %v1091_v39 = vld [vmem:[%s4388_s19 + $0x18] sm:$0xff]  ;;  %v1090_v40 = vld [vmem:[%s4388_s19 + $0x10] sm:$0xff] }
  0x34   : > { %1168 = vmatprep.subr.mxu1 %v1115_v15  ;;  %v1089_v41 = vld [vmem:[%s4388_s19 + $0x8] sm:$0xff]  ;;  %v1088_v42 = vld [vmem:[%s4388_s19] sm:$0xff]  ;;  %v1151_v43 = vld [vmem:[%s4388_s19 + $0x1f8] sm:$0xff] }
  0x35   : > { %1169 = vmatpush1.msra.mxu1 %v1114_v16  ;;  %v1150_v44 = vld [vmem:[%s4388_s19 + $0x1f0] sm:$0xff]  ;;  %v1149_v45 = vld [vmem:[%s4388_s19 + $0x1e8] sm:$0xff]  ;;  %v1148_v46 = vld [vmem:[%s4388_s19 + $0x1e0] sm:$0xff]  ;;  %s4441_s7 = smov %s4440_s9 }
  0x36   : > { %1170 = vmatprep.subr.mxu1 %v1113_v17  ;;  %v1147_v47 = vld [vmem:[%s4388_s19 + $0x1d8] sm:$0xff]  ;;  %v1146_v48 = vld [vmem:[%s4388_s19 + $0x1d0] sm:$0xff]  ;;  %v1145_v49 = vld [vmem:[%s4388_s19 + $0x1c8] sm:$0xff] }
  0x37   : > { %1171 = vmatpush1.msra.mxu1 %v1112_v18  ;;  %v1144_v50 = vld [vmem:[%s4388_s19 + $0x1c0] sm:$0xff]  ;;  %v1143_v51 = vld [vmem:[%s4388_s19 + $0x1b8] sm:$0xff]  ;;  %v1142_v52 = vld [vmem:[%s4388_s19 + $0x1b0] sm:$0xff] }
  0x38   : > { %1172 = vmatprep.subr.mxu1 %v1111_v19  ;;  %v1141_v53 = vld [vmem:[%s4388_s19 + $0x1a8] sm:$0xff]  ;;  %v1140_v54 = vld [vmem:[%s4388_s19 + $0x1a0] sm:$0xff]  ;;  %v1139_v55 = vld [vmem:[%s4388_s19 + $0x198] sm:$0xff] }
  0x39   : > { %1173 = vmatpush1.msra.mxu1 %v1110_v20  ;;  %v1138_v56 = vld [vmem:[%s4388_s19 + $0x190] sm:$0xff]  ;;  %v1137_v57 = vld [vmem:[%s4388_s19 + $0x188] sm:$0xff]  ;;  %v1136_v58 = vld [vmem:[%s4388_s19 + $0x180] sm:$0xff] }
  0x3a   : > { %1174 = vmatprep.subr.mxu1 %v1109_v21  ;;  %v1135_v59 = vld [vmem:[%s4388_s19 + $0x178] sm:$0xff]  ;;  %v1134_v60 = vld [vmem:[%s4388_s19 + $0x170] sm:$0xff]  ;;  %v1133_v61 = vld [vmem:[%s4388_s19 + $0x168] sm:$0xff] }
  0x3b   : > { %1175 = vmatpush1.msra.mxu1 %v1108_v22  ;;  %v1132_v62 = vld [vmem:[%s4388_s19 + $0x160] sm:$0xff]  ;;  %v1131_v63 = vld [vmem:[%s4388_s19 + $0x158] sm:$0xff]  ;;  %v1130_v0 = vld [vmem:[%s4388_s19 + $0x150] sm:$0xff] }
  0x3c   : > { %1176 = vmatprep.subr.mxu1 %v1107_v23  ;;  %v1129_v1 = vld [vmem:[%s4388_s19 + $0x148] sm:$0xff]  ;;  %v1128_v2 = vld [vmem:[%s4388_s19 + $0x140] sm:$0xff]  ;;  %v1127_v3 = vld [vmem:[%s4388_s19 + $0x138] sm:$0xff] }
  0x3d   : > { %1177 = vmatpush1.msra.mxu1 %v1106_v24  ;;  %v1126_v4 = vld [vmem:[%s4388_s19 + $0x130] sm:$0xff]  ;;  %v1125_v6 = vld [vmem:[%s4388_s19 + $0x128] sm:$0xff]  ;;  %v1124_v7 = vld [vmem:[%s4388_s19 + $0x120] sm:$0xff] }
  0x3e   : > { %1178 = vmatprep.subr.mxu1 %v1105_v25  ;;  %v1123_v8 = vld [vmem:[%s4388_s19 + $0x118] sm:$0xff]  ;;  %v1122_v9 = vld [vmem:[%s4388_s19 + $0x110] sm:$0xff]  ;;  %v1121_v10 = vld [vmem:[%s4388_s19 + $0x108] sm:$0xff] }
  0x3f   : > { %1179 = vmatpush1.msra.mxu1 %v1104_v26  ;;  %v1120_v11 = vld [vmem:[%s4388_s19 + $0x100] sm:$0xff]  ;;  %v1270_v14 = vld [vmem:[%s4390_s21 + $0xf8] sm:$0xff]  ;;  %v1269_v15 = vld [vmem:[%s4390_s21 + $0xf0] sm:$0xff] }
  0x40   : > { %1180 = vmatprep.subr.mxu1 %v1103_v27  ;;  %v3504_v12 = vld [vmem:[%s4430_s28] sm:$0x77]  ;;  %v1268_v16 = vld [vmem:[%s4390_s21 + $0xe8] sm:$0xff]  ;;  %1315 = vmatprep.subr.mxu0 %v1270_v14  ;;  %v1266_v18 = vld [vmem:[%s4390_s21 + $0xd8] sm:$0xff]  ;;  %s4438_s28 = sld [smem:[#allocation16_spill]] }
  0x41   : > { %1181 = vmatpush1.msra.mxu1 %v1102_v28  ;;  %v1402_v13 = vcombine.high %v3504_v12, %v3504_v12  ;;  %v1267_v17 = vld [vmem:[%s4390_s21 + $0xe0] sm:$0xff]  ;;  %1316 = vmatpush1.msra.mxu0 %v1269_v15  ;;  %v1265_v19 = vld [vmem:[%s4390_s21 + $0xd0] sm:$0xff]  ;;  %v1264_v20 = vld [vmem:[%s4390_s21 + $0xc8] sm:$0xff] }
  0x42   : > { %1182 = vmatprep.subr.mxu1 %v1101_v29  ;;  %1317 = vmatprep.subr.mxu0 %v1268_v16  ;;  %v1263_v21 = vld [vmem:[%s4390_s21 + $0xc0] sm:$0xff]  ;;  %v1262_v22 = vld [vmem:[%s4390_s21 + $0xb8] sm:$0xff]  ;;  %v1261_v23 = vld [vmem:[%s4390_s21 + $0xb0] sm:$0xff] }
  0x43   : > { %1183 = vmatpush1.msra.mxu1 %v1100_v30  ;;  %1318 = vmatpush1.msra.mxu0 %v1267_v17  ;;  %v1260_v24 = vld [vmem:[%s4390_s21 + $0xa8] sm:$0xff]  ;;  %v1259_v25 = vld [vmem:[%s4390_s21 + $0xa0] sm:$0xff]  ;;  %v1258_v26 = vld [vmem:[%s4390_s21 + $0x98] sm:$0xff] }
  0x44   : > { %1184 = vmatprep.subr.mxu1 %v1099_v31  ;;  %1319 = vmatprep.subr.mxu0 %v1266_v18  ;;  %v1257_v27 = vld [vmem:[%s4390_s21 + $0x90] sm:$0xff]  ;;  %v1256_v28 = vld [vmem:[%s4390_s21 + $0x88] sm:$0xff]  ;;  %v1255_v29 = vld [vmem:[%s4390_s21 + $0x80] sm:$0xff] }
  0x45   : > { %1185 = vmatpush1.msra.mxu1 %v1098_v32  ;;  %1320 = vmatpush1.msra.mxu0 %v1265_v19  ;;  %v1254_v30 = vld [vmem:[%s4390_s21 + $0x78] sm:$0xff]  ;;  %v1253_v31 = vld [vmem:[%s4390_s21 + $0x70] sm:$0xff]  ;;  %v1252_v32 = vld [vmem:[%s4390_s21 + $0x68] sm:$0xff] }
  0x46   : > { %1186 = vmatprep.subr.mxu1 %v1097_v33  ;;  %1321 = vmatprep.subr.mxu0 %v1264_v20  ;;  %v1251_v33 = vld [vmem:[%s4390_s21 + $0x60] sm:$0xff] }
  0x47   : > { %1187 = vmatpush1.msra.mxu1 %v1096_v34  ;;  %1322 = vmatpush1.msra.mxu0 %v1263_v21  ;;  %v1250_v34 = vld [vmem:[%s4390_s21 + $0x58] sm:$0xff] }
  0x48   : > { %1188 = vmatprep.subr.mxu1 %v1095_v35  ;;  %1323 = vmatprep.subr.mxu0 %v1262_v22  ;;  %v1249_v35 = vld [vmem:[%s4390_s21 + $0x50] sm:$0xff]  ;;  %v1531_v21 = vld [vmem:[%s4431_s5 + $0xf8] sm:$0xff]  ;;  %v1386_v22 = vld [vmem:[%s3263_s2] sm:$0xff] }
  0x49   : > { %1189 = vmatpush1.msra.mxu1 %v1094_v36  ;;  %1324 = vmatpush1.msra.mxu0 %v1261_v23  ;;  %v1248_v36 = vld [vmem:[%s4390_s21 + $0x48] sm:$0xff]  ;;  %v1530_v23 = vld [vmem:[%s4432_s26 + $0xf0] sm:$0xff] }
  0x4a   : > { %1190 = vmatprep.subr.mxu1 %v1093_v37  ;;  %1325 = vmatprep.subr.mxu0 %v1260_v24  ;;  %v1247_v37 = vld [vmem:[%s4390_s21 + $0x40] sm:$0xff]  ;;  %v1529_v24 = vld [vmem:[%s4432_s26 + $0xe8] sm:$0xff] }
  0x4b   : > { %1191 = vmatpush1.msra.mxu1 %v1092_v38  ;;  %1326 = vmatpush1.msra.mxu0 %v1259_v25  ;;  %v1246_v38 = vld [vmem:[%s4390_s21 + $0x38] sm:$0xff]  ;;  %v1528_v25 = vld [vmem:[%s4432_s26 + $0xe0] sm:$0xff] }
  0x4c   : > { %1192 = vmatprep.subr.mxu1 %v1091_v39  ;;  %1327 = vmatprep.subr.mxu0 %v1258_v26  ;;  %v1245_v39 = vld [vmem:[%s4390_s21 + $0x30] sm:$0xff]  ;;  %v1527_v26 = vld [vmem:[%s4432_s26 + $0xd8] sm:$0xff] }
  0x4d   : > { %1193 = vmatpush1.msra.mxu1 %v1090_v40  ;;  %1328 = vmatpush1.msra.mxu0 %v1257_v27  ;;  %v1244_v40 = vld [vmem:[%s4390_s21 + $0x28] sm:$0xff]  ;;  %v1526_v27 = vld [vmem:[%s4432_s26 + $0xd0] sm:$0xff] }
  0x4e   : > { %1194 = vmatprep.subr.mxu1 %v1089_v41  ;;  %1329 = vmatprep.subr.mxu0 %v1256_v28  ;;  %v1243_v41 = vld [vmem:[%s4390_s21 + $0x20] sm:$0xff]  ;;  %v1525_v28 = vld [vmem:[%s4432_s26 + $0xc8] sm:$0xff] }
  0x4f   : > { %1195 = vmatpush1.msra.mxu1 %v1088_v42  ;;  %1330 = vmatpush1.msra.mxu0 %v1255_v29  ;;  %v1242_v42 = vld [vmem:[%s4390_s21 + $0x18] sm:$0xff]  ;;  %v1524_v29 = vld [vmem:[%s4432_s26 + $0xc0] sm:$0xff] }
  0x50   : > { %1196 = vmatprep.subr.mxu1 %v1151_v43  ;;  %1331 = vmatprep.subr.mxu0 %v1254_v30  ;;  %v1241_v43 = vld [vmem:[%s4390_s21 + $0x10] sm:$0xff]  ;;  %v1523_v30 = vld [vmem:[%s4432_s26 + $0xb8] sm:$0xff] }
  0x51   : > { %1197 = vmatpush2.msra.mxu1 %v1150_v44  ;;  %1332 = vmatpush1.msra.mxu0 %v1253_v31  ;;  %v1240_v44 = vld [vmem:[%s4390_s21 + $0x8] sm:$0xff]  ;;  %v1522_v31 = vld [vmem:[%s4432_s26 + $0xb0] sm:$0xff] }
  0x52   : > { %1198 = vmatprep.subr.mxu1 %v1149_v45  ;;  %1333 = vmatprep.subr.mxu0 %v1252_v32  ;;  %v1239_v45 = vld [vmem:[%s4390_s21] sm:$0xff]  ;;  %v1521_v32 = vld [vmem:[%s4432_s26 + $0xa8] sm:$0xff] }
  0x53   : > { %1199 = vmatpush2.msra.mxu1 %v1148_v46  ;;  %1334 = vmatpush1.msra.mxu0 %v1251_v33  ;;  %v1302_v46 = vld [vmem:[%s4390_s21 + $0x1f8] sm:$0xff]  ;;  %v1520_v33 = vld [vmem:[%s4432_s26 + $0xa0] sm:$0xff] }
  0x54   : > { %1200 = vmatprep.subr.mxu1 %v1147_v47  ;;  %1335 = vmatprep.subr.mxu0 %v1250_v34  ;;  %v1301_v47 = vld [vmem:[%s4390_s21 + $0x1f0] sm:$0xff]  ;;  %v1519_v34 = vld [vmem:[%s4432_s26 + $0x98] sm:$0xff] }
  0x55   : > { %1201 = vmatpush2.msra.mxu1 %v1146_v48  ;;  %1336 = vmatpush1.msra.mxu0 %v1249_v35  ;;  %v1300_v48 = vld [vmem:[%s4390_s21 + $0x1e8] sm:$0xff]  ;;  %v1518_v35 = vld [vmem:[%s4432_s26 + $0x90] sm:$0xff] }
  0x56   : > { %1202 = vmatprep.subr.mxu1 %v1145_v49  ;;  %1337 = vmatprep.subr.mxu0 %v1248_v36  ;;  %v1299_v49 = vld [vmem:[%s4390_s21 + $0x1e0] sm:$0xff]  ;;  %v1517_v36 = vld [vmem:[%s4432_s26 + $0x88] sm:$0xff] }
  0x57   : > { %1203 = vmatpush2.msra.mxu1 %v1144_v50  ;;  %1338 = vmatpush1.msra.mxu0 %v1247_v37  ;;  %v1298_v50 = vld [vmem:[%s4390_s21 + $0x1d8] sm:$0xff]  ;;  %v1516_v37 = vld [vmem:[%s4432_s26 + $0x80] sm:$0xff] }
  0x58   : > { %1204 = vmatprep.subr.mxu1 %v1143_v51  ;;  %1339 = vmatprep.subr.mxu0 %v1246_v38  ;;  %v1297_v51 = vld [vmem:[%s4390_s21 + $0x1d0] sm:$0xff]  ;;  %v1515_v38 = vld [vmem:[%s4432_s26 + $0x78] sm:$0xff] }
  0x59   : > { %1205 = vmatpush2.msra.mxu1 %v1142_v52  ;;  %1340 = vmatpush1.msra.mxu0 %v1245_v39  ;;  %v1296_v52 = vld [vmem:[%s4390_s21 + $0x1c8] sm:$0xff]  ;;  %v1514_v39 = vld [vmem:[%s4432_s26 + $0x70] sm:$0xff] }
  0x5a   : > { %1206 = vmatprep.subr.mxu1 %v1141_v53  ;;  %1341 = vmatprep.subr.mxu0 %v1244_v40  ;;  %v1295_v53 = vld [vmem:[%s4390_s21 + $0x1c0] sm:$0xff]  ;;  %v1513_v40 = vld [vmem:[%s4432_s26 + $0x68] sm:$0xff] }
  0x5b   : > { %1207 = vmatpush2.msra.mxu1 %v1140_v54  ;;  %1342 = vmatpush1.msra.mxu0 %v1243_v41  ;;  %v1294_v54 = vld [vmem:[%s4390_s21 + $0x1b8] sm:$0xff]  ;;  %v1512_v41 = vld [vmem:[%s4432_s26 + $0x60] sm:$0xff] }
  0x5c   : > { %1208 = vmatprep.subr.mxu1 %v1139_v55  ;;  %1343 = vmatprep.subr.mxu0 %v1242_v42  ;;  %v1293_v55 = vld [vmem:[%s4390_s21 + $0x1b0] sm:$0xff]  ;;  %v1511_v42 = vld [vmem:[%s4432_s26 + $0x58] sm:$0xff] }
  0x5d   : > { %1209 = vmatpush2.msra.mxu1 %v1138_v56  ;;  %1344 = vmatpush1.msra.mxu0 %v1241_v43  ;;  %v1292_v56 = vld [vmem:[%s4390_s21 + $0x1a8] sm:$0xff]  ;;  %v1510_v43 = vld [vmem:[%s4432_s26 + $0x50] sm:$0xff] }
  0x5e   : > { %1210 = vmatprep.subr.mxu1 %v1137_v57  ;;  %1345 = vmatprep.subr.mxu0 %v1240_v44  ;;  %v1291_v57 = vld [vmem:[%s4390_s21 + $0x1a0] sm:$0xff]  ;;  %v1509_v44 = vld [vmem:[%s4432_s26 + $0x48] sm:$0xff] }
  0x5f   : > { %1211 = vmatpush2.msra.mxu1 %v1136_v58  ;;  %1346 = vmatpush1.msra.mxu0 %v1239_v45  ;;  %v1290_v58 = vld [vmem:[%s4390_s21 + $0x198] sm:$0xff]  ;;  %v1508_v45 = vld [vmem:[%s4432_s26 + $0x40] sm:$0xff] }
  0x60   : > { %1212 = vmatprep.subr.mxu1 %v1135_v59  ;;  %1347 = vmatprep.subr.mxu0 %v1302_v46  ;;  %v1289_v59 = vld [vmem:[%s4390_s21 + $0x190] sm:$0xff]  ;;  %v1507_v46 = vld [vmem:[%s4432_s26 + $0x38] sm:$0xff] }
  0x61   : > { %1213 = vmatpush2.msra.mxu1 %v1134_v60  ;;  %1348 = vmatpush2.msra.mxu0 %v1301_v47  ;;  %v1288_v60 = vld [vmem:[%s4390_s21 + $0x188] sm:$0xff]  ;;  %v1506_v47 = vld [vmem:[%s4432_s26 + $0x30] sm:$0xff] }
  0x62   : > { %1214 = vmatprep.subr.mxu1 %v1133_v61  ;;  %1349 = vmatprep.subr.mxu0 %v1300_v48  ;;  %v1287_v61 = vld [vmem:[%s4390_s21 + $0x180] sm:$0xff]  ;;  %v1505_v48 = vld [vmem:[%s4432_s26 + $0x28] sm:$0xff] }
  0x63   : > { %1215 = vmatpush2.msra.mxu1 %v1132_v62  ;;  %1350 = vmatpush2.msra.mxu0 %v1299_v49  ;;  %v1286_v62 = vld [vmem:[%s4390_s21 + $0x178] sm:$0xff]  ;;  %v1504_v49 = vld [vmem:[%s4432_s26 + $0x20] sm:$0xff] }
  0x64   : > { %1216 = vmatprep.subr.mxu1 %v1131_v63  ;;  %1351 = vmatprep.subr.mxu0 %v1298_v50  ;;  %v1285_v63 = vld [vmem:[%s4390_s21 + $0x170] sm:$0xff]  ;;  %v1503_v50 = vld [vmem:[%s4432_s26 + $0x18] sm:$0xff] }
  0x65   : > { %1217 = vmatpush2.msra.mxu1 %v1130_v0  ;;  %1352 = vmatpush2.msra.mxu0 %v1297_v51  ;;  %v1284_v0 = vld [vmem:[%s4390_s21 + $0x168] sm:$0xff]  ;;  %v1502_v51 = vld [vmem:[%s4432_s26 + $0x10] sm:$0xff] }
  0x66   : > { %1218 = vmatprep.subr.mxu1 %v1129_v1  ;;  %1353 = vmatprep.subr.mxu0 %v1296_v52  ;;  %v1283_v1 = vld [vmem:[%s4390_s21 + $0x160] sm:$0xff]  ;;  %v1501_v52 = vld [vmem:[%s4432_s26 + $0x8] sm:$0xff] }
  0x67   : > { %1219 = vmatpush2.msra.mxu1 %v1128_v2  ;;  %1354 = vmatpush2.msra.mxu0 %v1295_v53  ;;  %v1282_v2 = vld [vmem:[%s4390_s21 + $0x158] sm:$0xff]  ;;  %v1500_v53 = vld [vmem:[%s4432_s26] sm:$0xff] }
  0x68   : > { %1220 = vmatprep.subr.mxu1 %v1127_v3  ;;  %1355 = vmatprep.subr.mxu0 %v1294_v54  ;;  %v1281_v3 = vld [vmem:[%s4390_s21 + $0x150] sm:$0xff]  ;;  %v1563_v54 = vld [vmem:[%s4432_s26 + $0x1f8] sm:$0xff] }
  0x69   : > { %1221 = vmatpush2.msra.mxu1 %v1126_v4  ;;  %1356 = vmatpush2.msra.mxu0 %v1293_v55  ;;  %v999_v4 = vlaneseq  ;;  %v1562_v55 = vld [vmem:[%s4432_s26 + $0x1f0] sm:$0xff] }
  0x6a   : > { %1222 = vmatprep.subr.mxu1 %v1125_v6  ;;  %1357 = vmatprep.subr.mxu0 %v1292_v56  ;;  %v1561_v56 = vld [vmem:[%s4432_s26 + $0x1e8] sm:$0xff] }
  0x6b   : > { %1223 = vmatpush2.msra.mxu1 %v1124_v7  ;;  %1358 = vmatpush2.msra.mxu0 %v1291_v57  ;;  %v3672_v6 = vshrl.u32 %v999_v4, 7  ;;  %v1560_v57 = vld [vmem:[%s4432_s26 + $0x1e0] sm:$0xff] }
  0x6c   : > { %1224 = vmatprep.subr.mxu1 %v1123_v8  ;;  %1359 = vmatprep.subr.mxu0 %v1290_v58  ;;  %v997_v8 = vld [vmem:[%s4387_s18] sm:$0x3]  ;;  %v1559_v58 = vld [vmem:[%s4432_s26 + $0x1d8] sm:$0xff] }
  0x6d   : > { %1225 = vmatpush2.msra.mxu1 %v1122_v9  ;;  %1360 = vmatpush2.msra.mxu0 %v1289_v59  ;;  %v3675_v7 = vsub.s32 0, %v3672_v6  ;;  %v3681_v9 = vsub.s32 1, %v3672_v6  ;;  %v1558_v59 = vld [vmem:[%s4432_s26 + $0x1d0] sm:$0xff] }
  0x6e   : > { %1226 = vmatprep.subr.mxu1 %v1121_v10  ;;  %1361 = vmatprep.subr.mxu0 %v1288_v60  ;;  %v1557_v60 = vld [vmem:[%s4432_s26 + $0x1c8] sm:$0xff] }
  0x6f   : > { %1227 = vmatpush2.msra.mxu1 %v1120_v11  ;;  %1362 = vmatpush2.msra.mxu0 %v1287_v61  ;;  %v1002_v10 = vrot.slane %v997_v8, %v3675_v7  ;;  %v1006_v11 = vrot.slane %v997_v8, %v3681_v9  ;;  %v1556_v61 = vld [vmem:[%s4432_s26 + $0x1c0] sm:$0xff]  ;;  %v1549_v8 = vld [vmem:[%s4432_s26 + $0x188] sm:$0xff] }
  0x70   : > { %2813 = vmatprep.subr.msk.mxu1 %vm1410_vm2, %v1402_v13  ;;  %1363 = vmatprep.subr.mxu0 %v1286_v62  ;;  %v1555_v62 = vld [vmem:[%s4432_s26 + $0x1b8] sm:$0xff] }
  0x71   : > { %1364 = vmatpush2.msra.mxu0 %v1285_v63  ;;  %v1554_v63 = vld [vmem:[%s4432_s26 + $0x1b0] sm:$0xff] }
  0x72   : > { %1365 = vmatprep.subr.mxu0 %v1284_v0  ;;  %v1553_v0 = vld [vmem:[%s4432_s26 + $0x1a8] sm:$0xff] }
  0x73   : > { %1366 = vmatpush2.msra.mxu0 %v1283_v1  ;;  %v1552_v1 = vld [vmem:[%s4432_s26 + $0x1a0] sm:$0xff] }
  0x74   : > { %1367 = vmatprep.subr.mxu0 %v1282_v2  ;;  %v1551_v2 = vld [vmem:[%s4432_s26 + $0x198] sm:$0xff] }
  0x75   : > { %1368 = vmatpush2.msra.mxu0 %v1281_v3  ;;  %v1550_v3 = vld [vmem:[%s4432_s26 + $0x190] sm:$0xff] }
  0xf0   : > { %v1079_v13 = vpop.f32.mrf.mxu1 }
  0xf1   : > { %v1080_v14 = vadd.f32 %v1079_v13, %v1002_v10  ;;  %v1548_v10 = vld [vmem:[%s4432_s26 + $0x180] sm:$0xff]  ;;  %v1546_v13 = vld [vmem:[%s4432_s26 + $0x170] sm:$0xff] }
  0xf2   : > { %v1081_v15 = vpop.f32.mrf.mxu1 }
  0xf3   : > { %v1082_v16 = vadd.f32 %v1081_v15, %v1006_v11  ;;  %v1084_v17 = vmax.f32 %v1080_v14, 0.0  ;;  %v1547_v11 = vld [vmem:[%s4432_s26 + $0x178] sm:$0xff]  ;;  %v1280_v14 = vld [vmem:[%s4390_s21 + $0x148] sm:$0xff] }
  0xf4   : > { %v1545_v15 = vld [vmem:[%s4432_s26 + $0x168] sm:$0xff]  ;;  %1369 = vmatprep.subr.mxu0 %v1280_v14  ;;  %v1685_v14 = vld [vmem:[%s4433_s10 + $0xc0] sm:$0xff] }
  0xf5   : > { %v1085_v18 = vmax.f32 %v1082_v16, 0.0  ;;  %v1086_v20 = vmin.f32 %v1084_v17, 6.0  ;;  %v1279_v16 = vld [vmem:[%s4390_s21 + $0x140] sm:$0xff] }
  0xf6   : > { %v1544_v17 = vld [vmem:[%s4432_s26 + $0x160] sm:$0xff]  ;;  %1370 = vmatpush2.msra.mxu0 %v1279_v16  ;;  %v1684_v16 = vld [vmem:[%s4433_s10 + $0xb8] sm:$0xff] }
  0xf7   : > { %v1087_v19 = vmin.f32 %v1085_v18, 6.0  ;;  %v1278_v18 = vld [vmem:[%s4390_s21 + $0x138] sm:$0xff] }
  0xf8   : > { %1371 = vmatprep.subr.mxu0 %v1278_v18  ;;  %v1683_v18 = vld [vmem:[%s4433_s10 + $0xb0] sm:$0xff] }
  0xf9   : > { %1228 = vmatprep.mubr.f32.mxu1 %v1087_v19  ;;  %v1543_v19 = vld [vmem:[%s4432_s26 + $0x158] sm:$0xff] }
  0xfa   : > { %1229 = vmatmul.mubr.f32.vlgmr.msra.gmra.mxu1 %v1086_v20  ;;  %v1277_v20 = vld [vmem:[%s4390_s21 + $0x130] sm:$0xff] }
  0xfb   : > { %2814 = vmatpush1.msk.msra.mxu1 %vm1410_vm2, %v3504_v12  ;;  %1479 = vmatprep.mubr.f32.mxu1 %v3091_v5  ;;  %v1387_v12 = vld [vmem:[%s3263_s2 + $0x8] sm:$0xff]  ;;  %s4444_s2 = sld [smem:[#allocation23_spill]] }
  0xfc   : > { %1576 = vmatprep.subr.mxu1 %v1531_v21  ;;  %v1542_v21 = vld [vmem:[%s4432_s26 + $0x150] sm:$0xff]  ;;  %1372 = vmatpush2.msra.mxu0 %v1277_v20  ;;  %v1681_v20 = vld [vmem:[%s4433_s10 + $0xa0] sm:$0xff] }
  0xfe   : > { %2815 = vmatmul.mubr.msk.f32.vlgmr.msra.gmra.mxu1 %vm1403_vm3, %v1386_v22  ;;  %v1276_v22 = vld [vmem:[%s4390_s21 + $0x128] sm:$0xff] }
  0xff   : > { %1485 = vmatprep.mubr.f32.mxu1 %v3091_v5  ;;  %1577 = vmatpush1.msra.mxu1 %v1530_v23  ;;  %v1541_v23 = vld [vmem:[%s4432_s26 + $0x148] sm:$0xff] }
 0x100   : > { %1578 = vmatprep.subr.mxu1 %v1529_v24  ;;  %1373 = vmatprep.subr.mxu0 %v1276_v22  ;;  %v1275_v24 = vld [vmem:[%s4390_s21 + $0x120] sm:$0xff]  ;;  %v1679_v22 = vld [vmem:[%s4433_s10 + $0x90] sm:$0xff] }
 0x101   : > { %1579 = vmatpush1.msra.mxu1 %v1528_v25  ;;  %v1540_v25 = vld [vmem:[%s4432_s26 + $0x140] sm:$0xff]  ;;  %1374 = vmatpush2.msra.mxu0 %v1275_v24 }
 0x102   : > { %2816 = vmatmul.mubr.msk.f32.gmra.mxu1 %vm1403_vm3, %v1387_v12  ;;  %1580 = vmatprep.subr.mxu1 %v1527_v26  ;;  %v1274_v12 = vld [vmem:[%s4390_s21 + $0x118] sm:$0xff]  ;;  %v1677_v24 = vld [vmem:[%s4433_s10 + $0x80] sm:$0xff] }
 0x103   : > { %1581 = vmatpush1.msra.mxu1 %v1526_v27  ;;  %v1539_v26 = vld [vmem:[%s4432_s26 + $0x138] sm:$0xff]  ;;  %1375 = vmatprep.subr.mxu0 %v1274_v12  ;;  %v1273_v27 = vld [vmem:[%s4390_s21 + $0x110] sm:$0xff] }
 0x104   : > { %1582 = vmatprep.subr.mxu1 %v1525_v28  ;;  %v1538_v28 = vld [vmem:[%s4432_s26 + $0x130] sm:$0xff]  ;;  %1376 = vmatpush2.msra.mxu0 %v1273_v27  ;;  %v1673_v27 = vld [vmem:[%s4433_s10 + $0x60] sm:$0xff] }
 0x105   : > { %1583 = vmatpush1.msra.mxu1 %v1524_v29  ;;  %v1272_v29 = vld [vmem:[%s4390_s21 + $0x108] sm:$0xff]  ;;  %v1675_v12 = vld [vmem:[%s4433_s10 + $0x70] sm:$0xff] }
 0x106   : > { %1584 = vmatprep.subr.mxu1 %v1523_v30  ;;  %v1537_v30 = vld [vmem:[%s4432_s26 + $0x128] sm:$0xff]  ;;  %1377 = vmatprep.subr.mxu0 %v1272_v29  ;;  %v1671_v29 = vld [vmem:[%s4433_s10 + $0x50] sm:$0xff] }
 0x107   : > { %1585 = vmatpush1.msra.mxu1 %v1522_v31  ;;  %v1271_v31 = vld [vmem:[%s4390_s21 + $0x100] sm:$0xff] }
 0x108   : > { %1586 = vmatprep.subr.mxu1 %v1521_v32  ;;  %v1536_v32 = vld [vmem:[%s4432_s26 + $0x120] sm:$0xff]  ;;  %1378 = vmatpush2.msra.mxu0 %v1271_v31 }
 0x109   : > { %1587 = vmatpush1.msra.mxu1 %v1520_v33  ;;  %v1535_v33 = vld [vmem:[%s4432_s26 + $0x118] sm:$0xff]  ;;  %v1669_v31 = vld [vmem:[%s4433_s10 + $0x40] sm:$0xff] }
 0x10a   : > { %1588 = vmatprep.subr.mxu1 %v1519_v34  ;;  %v1534_v34 = vld [vmem:[%s4432_s26 + $0x110] sm:$0xff] }
 0x10b   : > { %1589 = vmatpush1.msra.mxu1 %v1518_v35  ;;  %v1533_v35 = vld [vmem:[%s4432_s26 + $0x108] sm:$0xff] }
 0x10c   : > { %1590 = vmatprep.subr.mxu1 %v1517_v36  ;;  %v1532_v36 = vld [vmem:[%s4432_s26 + $0x100] sm:$0xff] }
 0x10d   : > { %1591 = vmatpush1.msra.mxu1 %v1516_v37  ;;  %v1692_v37 = vld [vmem:[%s4433_s10 + $0xf8] sm:$0xff] }
 0x10e   : > { %1592 = vmatprep.subr.mxu1 %v1515_v38  ;;  %1737 = vmatprep.subr.mxu0 %v1692_v37  ;;  %v1152_v38 = vld [vmem:[%s4389_s20] sm:$0x3]  ;;  %v1663_v37 = vld [vmem:[%s4433_s10 + $0x10] sm:$0xff] }
 0x10f   : > { %1593 = vmatpush1.msra.mxu1 %v1514_v39  ;;  %v1157_v39 = vrot.slane %v1152_v38, %v3675_v7 }
 0x110   : > { %1594 = vmatprep.subr.mxu1 %v1513_v40  ;;  %v1389_v40 = vld [vmem:[%s4434_s0] sm:$0x3]  ;;  %s3095_s0 = smov 96  }
 0x111   : > { %1595 = vmatpush1.msra.mxu1 %v1512_v41  ;;  %v1161_v41 = vrot.slane %v1152_v38, %v3681_v9  ;;  %v1662_v38 = vld [vmem:[%s4433_s10 + $0x8] sm:$0xff] }
 0x112   : > { %1596 = vmatprep.subr.mxu1 %v1511_v42 }
 0x113   : > { %1597 = vmatpush1.msra.mxu1 %v1510_v43 }
 0x114   : > { %1598 = vmatprep.subr.mxu1 %v1509_v44  ;;  %v1394_v44 = vrot.slane %v1389_v40, %v3675_v7 }
 0x115   : > { %1599 = vmatpush1.msra.mxu1 %v1508_v45 }
 0x116   : > { %1600 = vmatprep.subr.mxu1 %v1507_v46 }
 0x117   : > { %1601 = vmatpush1.msra.mxu1 %v1506_v47  ;;  %v1398_v47 = vrot.slane %v1389_v40, %v3681_v9  ;;  %v1724_v40 = vld [vmem:[%s4433_s10 + $0x1f8] sm:$0xff] }
 0x118   : > { %1602 = vmatprep.subr.mxu1 %v1505_v48 }
 0x119   : > { %1603 = vmatpush1.msra.mxu1 %v1504_v49 }
 0x11a   : > { %1604 = vmatprep.subr.mxu1 %v1503_v50 }
 0x11b   : > { %1605 = vmatpush1.msra.mxu1 %v1502_v51 }
 0x11c   : > { %1606 = vmatprep.subr.mxu1 %v1501_v52 }
 0x11d   : > { %1607 = vmatpush1.msra.mxu1 %v1500_v53 }
 0x11e   : > { %1608 = vmatprep.subr.mxu1 %v1563_v54 }
 0x11f   : > { %1609 = vmatpush2.msra.mxu1 %v1562_v55 }
 0x120   : > { %1610 = vmatprep.subr.mxu1 %v1561_v56 }
 0x121   : > { %1611 = vmatpush2.msra.mxu1 %v1560_v57 }
 0x122   : > { %1612 = vmatprep.subr.mxu1 %v1559_v58  ;;  %v1691_v58 = vld [vmem:[%s4433_s10 + $0xf0] sm:$0xff] }
 0x123   : > { %1613 = vmatpush2.msra.mxu1 %v1558_v59 }
 0x124   : > { %1614 = vmatprep.subr.mxu1 %v1557_v60 }
 0x125   : > { %1615 = vmatpush2.msra.mxu1 %v1556_v61  ;;  %v1690_v61 = vld [vmem:[%s4433_s10 + $0xe8] sm:$0xff] }
 0x126   : > { %1616 = vmatprep.subr.mxu1 %v1555_v62 }
 0x127   : > { %1617 = vmatpush2.msra.mxu1 %v1554_v63  ;;  %v1689_v63 = vld [vmem:[%s4433_s10 + $0xe0] sm:$0xff] }
 0x128   : > { %1618 = vmatprep.subr.mxu1 %v1553_v0 }
 0x129   : > { %1619 = vmatpush2.msra.mxu1 %v1552_v1 }
 0x12a   : > { %1620 = vmatprep.subr.mxu1 %v1551_v2  ;;  %v1688_v2 = vld [vmem:[%s4433_s10 + $0xd8] sm:$0xff] }
 0x12b   : > { %1621 = vmatpush2.msra.mxu1 %v1550_v3 }
 0x12c   : > { %1622 = vmatprep.subr.mxu1 %v1549_v8 }
 0x12d   : > { %1623 = vmatpush2.msra.mxu1 %v1548_v10  ;;  %v1687_v10 = vld [vmem:[%s4433_s10 + $0xd0] sm:$0xff] }
 0x12e   : > { %1624 = vmatprep.subr.mxu1 %v1547_v11 }
 0x12f   : > { %1625 = vmatpush2.msra.mxu1 %v1546_v13  ;;  %v1686_v13 = vld [vmem:[%s4433_s10 + $0xc8] sm:$0xff] }
 0x130   : > { %1626 = vmatprep.subr.mxu1 %v1545_v15 }
 0x131   : > { %1627 = vmatpush2.msra.mxu1 %v1544_v17 }
 0x132   : > { %1628 = vmatprep.subr.mxu1 %v1543_v19  ;;  %v1682_v19 = vld [vmem:[%s4433_s10 + $0xa8] sm:$0xff] }
 0x133   : > { %1629 = vmatpush2.msra.mxu1 %v1542_v21  ;;  %v1680_v21 = vld [vmem:[%s4433_s10 + $0x98] sm:$0xff] }
 0x134   : > { %1630 = vmatprep.subr.mxu1 %v1541_v23  ;;  %v1678_v23 = vld [vmem:[%s4433_s10 + $0x88] sm:$0xff] }
 0x135   : > { %1631 = vmatpush2.msra.mxu1 %v1540_v25  ;;  %v1676_v25 = vld [vmem:[%s4433_s10 + $0x78] sm:$0xff] }
 0x136   : > { %1632 = vmatprep.subr.mxu1 %v1539_v26  ;;  %v1674_v26 = vld [vmem:[%s4433_s10 + $0x68] sm:$0xff] }
 0x137   : > { %1633 = vmatpush2.msra.mxu1 %v1538_v28  ;;  %v1672_v28 = vld [vmem:[%s4433_s10 + $0x58] sm:$0xff] }
 0x138   : > { %1634 = vmatprep.subr.mxu1 %v1537_v30  ;;  %v1670_v30 = vld [vmem:[%s4433_s10 + $0x48] sm:$0xff] }
 0x139   : > { %1635 = vmatpush2.msra.mxu1 %v1536_v32  ;;  %v1668_v32 = vld [vmem:[%s4433_s10 + $0x38] sm:$0xff] }
 0x13a   : > { %1636 = vmatprep.subr.mxu1 %v1535_v33  ;;  %v1667_v33 = vld [vmem:[%s4433_s10 + $0x30] sm:$0xff] }
 0x13b   : > { %1637 = vmatpush2.msra.mxu1 %v1534_v34  ;;  %v1666_v34 = vld [vmem:[%s4433_s10 + $0x28] sm:$0xff] }
 0x13c   : > { %1638 = vmatprep.subr.mxu1 %v1533_v35  ;;  %v1665_v35 = vld [vmem:[%s4433_s10 + $0x20] sm:$0xff] }
 0x13d   : > { %1639 = vmatpush2.msra.mxu1 %v1532_v36  ;;  %v1664_v36 = vld [vmem:[%s4433_s10 + $0x18] sm:$0xff] }
 0x1ba   : > { %v1230_v42 = vpop.f32.mrf.mxu1 }
 0x1bb   : > { %v1231_v43 = vadd.f32 %v1230_v42, %v1157_v39  ;;  %v1661_v39 = vld [vmem:[%s4433_s10] sm:$0xff]  ;;  %v1722_v42 = vld [vmem:[%s4433_s10 + $0x1e8] sm:$0xff] }
 0x1bc   : > { %v1232_v45 = vpop.f32.mrf.mxu1 }
 0x1bd   : > { %v1233_v46 = vadd.f32 %v1232_v45, %v1161_v41  ;;  %v1235_v48 = vmax.f32 %v1231_v43, 0.0  ;;  %v1723_v41 = vld [vmem:[%s4433_s10 + $0x1f0] sm:$0xff]  ;;  %v1721_v43 = vld [vmem:[%s4433_s10 + $0x1e0] sm:$0xff] }
 0x1be   : > { %v1481_v49 = vpop.f32.mrf.mxu1  ;;  %v1719_v45 = vld [vmem:[%s4433_s10 + $0x1d0] sm:$0xff] }
 0x1bf   : > { %v1482_v50 = vadd.f32 %v1481_v49, %v1394_v44  ;;  %v1236_v51 = vmax.f32 %v1233_v46, 0.0  ;;  %v1237_v55 = vmin.f32 %v1235_v48, 6.0  ;;  %v1718_v46 = vld [vmem:[%s4433_s10 + $0x1c8] sm:$0xff]  ;;  %v1716_v48 = vld [vmem:[%s4433_s10 + $0x1b8] sm:$0xff]  ;;  %v1715_v49 = vld [vmem:[%s4433_s10 + $0x1b0] sm:$0xff] }
 0x1c0   : > { %v1483_v52 = vpop.f32.mrf.mxu1 }
 0x1c1   : > { %v1484_v53 = vadd.f32 %v1483_v52, %v1398_v47  ;;  %v1238_v54 = vmin.f32 %v1236_v51, 6.0  ;;  %v1492_v56 = vmax.f32 %v1482_v50, 0.0  ;;  %v1714_v50 = vld [vmem:[%s4433_s10 + $0x1a8] sm:$0xff]  ;;  %v1713_v51 = vld [vmem:[%s4433_s10 + $0x1a0] sm:$0xff]  ;;  %v1712_v52 = vld [vmem:[%s4433_s10 + $0x198] sm:$0xff] }
 0x1c2   : > { %v1487_v57 = vpop.f32.mrf.mxu1 }
 0x1c3   : > { %v1493_v59 = vmax.f32 %v1484_v53, 0.0  ;;  %v1488_v60 = vadd.f32 %v1487_v57, %v1394_v44  ;;  %1379 = vmatprep.mubr.f32.mxu0 %v1238_v54  ;;  %v1496_v3 = vmin.f32 %v1492_v56, 6.0  ;;  %v1720_v44 = vld [vmem:[%s4433_s10 + $0x1d8] sm:$0xff]  ;;  %v1711_v53 = vld [vmem:[%s4433_s10 + $0x190] sm:$0xff]  ;;  %v1710_v54 = vld [vmem:[%s4433_s10 + $0x188] sm:$0xff] }
 0x1c4   : > { %1380 = vmatmul.mubr.f32.vlgmr.msra.gmra.mxu0 %v1237_v55  ;;  %v1489_v62 = vpop.f32.mrf.mxu1  ;;  %v1709_v55 = vld [vmem:[%s4433_s10 + $0x180] sm:$0xff]  ;;  %v1708_v56 = vld [vmem:[%s4433_s10 + $0x178] sm:$0xff]  ;;  %v1707_v57 = vld [vmem:[%s4433_s10 + $0x170] sm:$0xff] }
 0x1c5   : > { %v1497_v0 = vmin.f32 %v1493_v59, 6.0  ;;  %v1490_v1 = vadd.f32 %v1489_v62, %v1398_v47  ;;  %1738 = vmatpush1.msra.mxu0 %v1691_v58  ;;  %v1494_v8 = vmax.f32 %v1488_v60, 0.0  ;;  %v1717_v47 = vld [vmem:[%s4433_s10 + $0x1c0] sm:$0xff]  ;;  %v1706_v58 = vld [vmem:[%s4433_s10 + $0x168] sm:$0xff]  ;;  %v1704_v60 = vld [vmem:[%s4433_s10 + $0x158] sm:$0xff] }
 0x1c6   : > { %1739 = vmatprep.subr.mxu0 %v1690_v61  ;;  %v1705_v59 = vld [vmem:[%s4433_s10 + $0x160] sm:$0xff]  ;;  %v1703_v61 = vld [vmem:[%s4433_s10 + $0x150] sm:$0xff]  ;;  %v1702_v62 = vld [vmem:[%s4433_s10 + $0x148] sm:$0xff] }
 0x1c7   : > { %v1495_v11 = vmax.f32 %v1490_v1, 0.0  ;;  %1640 = vmatprep.mubr.f32.mxu1 %v1497_v0  ;;  %1740 = vmatpush1.msra.mxu0 %v1689_v63  ;;  %v1498_v17 = vmin.f32 %v1494_v8, 6.0  ;;  %v1701_v63 = vld [vmem:[%s4433_s10 + $0x140] sm:$0xff]  ;;  %v1700_v0 = vld [vmem:[%s4433_s10 + $0x138] sm:$0xff]  ;;  %v1699_v1 = vld [vmem:[%s4433_s10 + $0x130] sm:$0xff] }
 0x1c8   : > { %1641 = vmatmul.mubr.f32.vlgmr.msra.gmra.mxu1 %v1496_v3  ;;  %1741 = vmatprep.subr.mxu0 %v1688_v2  ;;  %v1698_v2 = vld [vmem:[%s4433_s10 + $0x128] sm:$0xff]  ;;  %v1697_v3 = vld [vmem:[%s4433_s10 + $0x120] sm:$0xff]  ;;  %v1696_v8 = vld [vmem:[%s4433_s10 + $0x118] sm:$0xff] }
 0x1c9   : > { %v1499_v15 = vmin.f32 %v1495_v11, 6.0  ;;  %1742 = vmatpush1.msra.mxu0 %v1687_v10  ;;  %v1695_v10 = vld [vmem:[%s4433_s10 + $0x110] sm:$0xff]  ;;  %v1694_v11 = vld [vmem:[%s4433_s10 + $0x108] sm:$0xff] }
 0x1ca   : > { %1743 = vmatprep.subr.mxu0 %v1686_v13  ;;  %v1693_v13 = vld [vmem:[%s4433_s10 + $0x100] sm:$0xff] }
 0x1cb   : > { %1646 = vmatprep.mubr.f32.mxu1 %v1499_v15  ;;  %1744 = vmatpush1.msra.mxu0 %v1685_v14  ;;  %v1816_v14 = vld [vmem:[%s4435_s8] sm:$0xf] }
 0x1cc   : > { %1647 = vmatmul.mubr.f32.gmra.mxu1 %v1498_v17  ;;  %1745 = vmatprep.subr.mxu0 %v1684_v16  ;;  %v1814_v15 = vld [vmem:[%s3268_s4] sm:$0xff]  ;;  %v1815_v16 = vld [vmem:[%s3268_s4 + $0x8] sm:$0xff]  ;;  %s3094_s4 = smov 64  }
 0x1cd   : > { %1746 = vmatpush1.msra.mxu0 %v1683_v18  ;;  %2899 = vmatprep.subr.msk.mxu1 %vm1831_vm4, %v1816_v14  ;;  %v1564_v17 = vld [vmem:[%s4436_s12] sm:$0x3]  ;;  %s4442_s12 = sld [smem:[#allocation22_spill]] }
 0x1ce   : > { %1747 = vmatprep.subr.mxu0 %v1682_v19  ;;  %2901 = vmatprep.mubr.msk.f32.mxu1 %vm1824_vm5, %v1814_v15  ;;  %v1569_v18 = vrot.slane %v1564_v17, %v3675_v7  ;;  %v1573_v19 = vrot.slane %v1564_v17, %v3681_v9 }
 0x1cf   : > { %1748 = vmatpush1.msra.mxu0 %v1681_v20  ;;  %2900 = vmatpush3.msk.msra.mxu1 %vm1831_vm4, %v1816_v14 }
 0x1d0   : > { %1749 = vmatprep.subr.mxu0 %v1680_v21  ;;  %2902 = vmatmul.mubr.msk.f32.vlgmr.msra.gmra.mxu1 %vm1824_vm5, %v1815_v16 }
 0x1d1   : > { %1750 = vmatpush1.msra.mxu0 %v1679_v22 }
 0x1d2   : > { %1751 = vmatprep.subr.mxu0 %v1678_v23 }
 0x1d3   : > { %1752 = vmatpush1.msra.mxu0 %v1677_v24 }
 0x1d4   : > { %1753 = vmatprep.subr.mxu0 %v1676_v25 }
 0x1d5   : > { %1754 = vmatpush1.msra.mxu0 %v1675_v12 }
 0x1d6   : > { %1755 = vmatprep.subr.mxu0 %v1674_v26 }
 0x1d7   : > { %1756 = vmatpush1.msra.mxu0 %v1673_v27 }
 0x1d8   : > { %1757 = vmatprep.subr.mxu0 %v1672_v28 }
 0x1d9   : > { %1758 = vmatpush1.msra.mxu0 %v1671_v29 }
 0x1da   : > { %1759 = vmatprep.subr.mxu0 %v1670_v30 }
 0x1db   : > { %1760 = vmatpush1.msra.mxu0 %v1669_v31 }
 0x1dc   : > { %1761 = vmatprep.subr.mxu0 %v1668_v32 }
 0x1dd   : > { %1762 = vmatpush1.msra.mxu0 %v1667_v33 }
 0x1de   : > { %1763 = vmatprep.subr.mxu0 %v1666_v34 }
 0x1df   : > { %1764 = vmatpush1.msra.mxu0 %v1665_v35  ;;  %v1921_v35 = vld [vmem:[%s4382_s13 + $0x38] sm:$0xff] }
 0x1e0   : > { %1765 = vmatprep.subr.mxu0 %v1664_v36  ;;  %v1920_v36 = vld [vmem:[%s4382_s13 + $0x30] sm:$0xff] }
 0x1e1   : > { %1766 = vmatpush1.msra.mxu0 %v1663_v37 }
 0x1e2   : > { %1767 = vmatprep.subr.mxu0 %v1662_v38  ;;  %v2817_v38 = vld [vmem:[%s4437_s29] ss:$0 sm:$0xff] }
 0x1e3   : > { %1768 = vmatpush1.msra.mxu0 %v1661_v39  ;;  %v1919_v39 = vld [vmem:[%s4382_s13 + $0x28] sm:$0xff] }
 0x1e4   : > { %1769 = vmatprep.subr.mxu0 %v1724_v40 }
 0x1e5   : > { %1770 = vmatpush2.msra.mxu0 %v1723_v41 }
 0x1e6   : > { %1771 = vmatprep.subr.mxu0 %v1722_v42  ;;  %v1918_v42 = vld [vmem:[%s4382_s13 + $0x20] sm:$0xff] }
 0x1e7   : > { %1772 = vmatpush2.msra.mxu0 %v1721_v43 }
 0x1e8   : > { %1773 = vmatprep.subr.mxu0 %v1720_v44 }
 0x1e9   : > { %1774 = vmatpush2.msra.mxu0 %v1719_v45  ;;  %v1917_v45 = vld [vmem:[%s4382_s13 + $0x18] sm:$0xff] }
 0x1ea   : > { %1775 = vmatprep.subr.mxu0 %v1718_v46 }
 0x1eb   : > { %1776 = vmatpush2.msra.mxu0 %v1717_v47  ;;  %v1916_v47 = vld [vmem:[%s4382_s13 + $0x10] sm:$0xff] }
 0x1ec   : > { %1777 = vmatprep.subr.mxu0 %v1716_v48 }
 0x1ed   : > { %1778 = vmatpush2.msra.mxu0 %v1715_v49  ;;  %v1915_v49 = vld [vmem:[%s4382_s13 + $0x8] sm:$0xff] }
 0x1ee   : > { %1779 = vmatprep.subr.mxu0 %v1714_v50  ;;  %v1914_v50 = vld [vmem:[%s4382_s13] sm:$0xff] }
 0x1ef   : > { %1780 = vmatpush2.msra.mxu0 %v1713_v51 }
 0x1f0   : > { %1781 = vmatprep.subr.mxu0 %v1712_v52 }
 0x1f1   : > { %1782 = vmatpush2.msra.mxu0 %v1711_v53  ;;  %v1303_v53 = vld [vmem:[%s4391_s22] sm:$0x3] }
 0x1f2   : > { %1783 = vmatprep.subr.mxu0 %v1710_v54  ;;  %v1312_v54 = vrot.slane %v1303_v53, %v3681_v9 }
 0x1f3   : > { %1784 = vmatpush2.msra.mxu0 %v1709_v55  ;;  %v3092_v55 = vmov 1966171168  }
 0x1f4   : > { %1785 = vmatprep.subr.mxu0 %v1708_v56  ;;  %v2118_v56 = vunpack.c.l.s4 %v3092_v55 }
 0x1f5   : > { %1786 = vmatpush2.msra.mxu0 %v1707_v57 }
 0x1f6   : > { %1787 = vmatprep.subr.mxu0 %v1706_v58  ;;  %v1308_v58 = vrot.slane %v1303_v53, %v3675_v7  ;;  %v2179_v53 = vand.u32 127, %v999_v4 }
 0x1f7   : > { %1788 = vmatpush2.msra.mxu0 %v1705_v59 }
 0x1f8   : > { %1789 = vmatprep.subr.mxu0 %v1704_v60  ;;  %v2119_v60 = vunpack.c.0.s8 %v2118_v56  ;;  %v2182_v56 = vsub.s32 %v2179_v53, %v3672_v6 }
 0x1f9   : > { %1790 = vmatpush2.msra.mxu0 %v1703_v61 }
 0x1fa   : > { %1791 = vmatprep.subr.mxu0 %v1702_v62 }
 0x1fb   : > { %1792 = vmatpush2.msra.mxu0 %v1701_v63  ;;  %v4161_v63 = vsub.s32 %v2119_v60, %v3672_v6  ;;  %v2113_v60 = vld [vmem:[%s3273_s30] sm:$0x3] }
 0x1fc   : > { %1793 = vmatprep.subr.mxu0 %v1700_v0  ;;  %v1725_v0 = vld [vmem:[%s4438_s28] sm:$0x3]  ;;  %vm2175_vm10 = vcmp.gt.f32.partialorder %v2113_v60, 0.0 }
 0x1fd   : > { %1794 = vmatpush2.msra.mxu0 %v1699_v1 }
 0x1fe   : > { %1795 = vmatprep.subr.mxu0 %v1698_v2  ;;  %v1730_v2 = vrot.slane %v1725_v0, %v3675_v7 }
 0x1ff   : > { %1796 = vmatpush2.msra.mxu0 %v1697_v3 }
 0x200   : > { %1797 = vmatprep.subr.mxu0 %v1696_v8  ;;  %v1734_v8 = vrot.slane %v1725_v0, %v3681_v9 }
 0x201   : > { %1798 = vmatpush2.msra.mxu0 %v1695_v10 }
 0x202   : > { %1799 = vmatprep.subr.mxu0 %v1694_v11 }
 0x203   : > { %1800 = vmatpush2.msra.mxu0 %v1693_v13 }
 0x204   : > { %2904 = vmatprep.subr.mxu0 %v1921_v35 }
 0x284   : > { %v1381_v52 = vpop.f32.mrf.mxu0 }
 0x285   : > { %v1382_v61 = vadd.f32 %v1381_v52, %v1308_v58 }
 0x286   : > { %v1383_v57 = vpop.f32.mrf.mxu0 }
 0x287   : > { %v1384_v59 = vadd.f32 %v1383_v57, %v1312_v54 }
 0x288   : > { %v1642_v20 = vpop.f32.mrf.mxu1 }
 0x289   : > { %v1643_v21 = vadd.f32 %v1642_v20, %v1569_v18  ;;  %v2116_v62 = vcombine.low %v1382_v61, %v1384_v59 }
 0x28a   : > { %v1644_v22 = vpop.f32.mrf.mxu1 }
 0x28b   : > { %v1645_v23 = vadd.f32 %v1644_v22, %v1573_v19  ;;  %v1653_v24 = vmax.f32 %v1643_v21, 0.0  ;;  %v2123_v1 = vrot.slane %v2116_v62, %v4161_v63 }
 0x28c   : > { %v1648_v25 = vpop.f32.mrf.mxu1 }
 0x28d   : > { %v1654_v12 = vmax.f32 %v1645_v23, 0.0  ;;  %v1649_v26 = vadd.f32 %v1648_v25, %v1569_v18  ;;  %v1657_v30 = vmin.f32 %v1653_v24, 6.0  ;;  %v2124_v3 = vcombine.high %v2123_v1, %v2123_v1 }
 0x28e   : > { %v1650_v27 = vpop.f32.mrf.mxu1  ;;  %v2131_v10 = vrot.slane %v2123_v1, %v4161_v63 }
 0x28f   : > { %v1658_v28 = vmin.f32 %v1654_v12, 6.0  ;;  %v1651_v29 = vadd.f32 %v1650_v27, %v1573_v19  ;;  %v1655_v31 = vmax.f32 %v1649_v26, 0.0  ;;  %v2138_v16 = vrot.slane %v2124_v3, %v4161_v63 }
 0x290   : > { %v2903_v37 = vpop.f32.mrf.mxu1  ;;  %v2142_v17 = vrot.slane %v2131_v10, %v3675_v7  ;;  %v2146_v18 = vrot.slane %v2131_v10, %v3681_v9 }
 0x291   : > { %v1656_v32 = vmax.f32 %v1651_v29, 0.0  ;;  %1801 = vmatprep.mubr.f32.mxu0 %v1658_v28  ;;  %v1659_v34 = vmin.f32 %v1655_v31, 6.0  ;;  %v1907_v43 = vadd.f32 %v2903_v37, %v2817_v38  ;;  %v2150_v24 = vrot.slane %v2138_v16, %v3675_v7  ;;  %v2029_v31 = vld [vmem:[%s4384_s15 + $0x70] sm:$0xff]  ;;  %v2028_v7 = vld [vmem:[%s4384_s15 + $0x68] sm:$0xff] }
 0x292   : > { %1802 = vmatmul.mubr.f32.vlgmr.msra.gmra.mxu0 %v1657_v30  ;;  %v1901_v40 = vpop.f32.mrf.mxu1  ;;  %v2154_v12 = vrot.slane %v2138_v16, %v3681_v9  ;;  %v2030_v30 = vld [vmem:[%s4384_s15 + $0x78] sm:$0xff]  ;;  %v2027_v9 = vld [vmem:[%s4384_s15 + $0x60] sm:$0xff]  ;;  %v2021_v37 = vld [vmem:[%s4384_s15 + $0x30] sm:$0xff] }
 0x293   : > { %v1660_v33 = vmin.f32 %v1656_v32, 6.0  ;;  %2905 = vmatpush3.msra.mxu0 %v1921_v35  ;;  %v1902_v41 = vadd.f32 %v2817_v38, %v1901_v40  ;;  %v1911_v48 = vmax.f32 %v1907_v43, 0.0  ;;  %2923 = vmatprep.subr.mxu1 %v2030_v30  ;;  %v2026_v32 = vld [vmem:[%s4384_s15 + $0x58] sm:$0xff]  ;;  %v2023_v35 = vld [vmem:[%s4384_s15 + $0x40] sm:$0xff]  ;;  %v2020_v38 = vld [vmem:[%s4384_s15 + $0x28] sm:$0xff] }
 0x294   : > { %2906 = vmatprep.subr.mxu0 %v1920_v36  ;;  %2924 = vmatpush3.msra.mxu1 %v2030_v30  ;;  %v2018_v40 = vld [vmem:[%s4384_s15 + $0x18] sm:$0xff]  ;;  %v2015_v43 = vld [vmem:[%s4384_s15] sm:$0xff] }
 0x295   : > { %1807 = vmatprep.mubr.f32.mxu0 %v1660_v33  ;;  %2907 = vmatpush3.msra.mxu0 %v1920_v36  ;;  %v1910_v44 = vmax.f32 %v1902_v41, 0.0  ;;  %v1913_v51 = vmin.f32 %v1911_v48, 6.0  ;;  %v2025_v33 = vld [vmem:[%s4384_s15 + $0x50] sm:$0xff]  ;;  %v2022_v36 = vld [vmem:[%s4384_s15 + $0x38] sm:$0xff] }
 0x296   : > { %1808 = vmatmul.mubr.f32.gmra.mxu0 %v1659_v34  ;;  %2908 = vmatprep.subr.mxu0 %v1919_v39  ;;  %v2024_v34 = vld [vmem:[%s4384_s15 + $0x48] sm:$0xff]  ;;  %v2017_v41 = vld [vmem:[%s4384_s15 + $0x10] sm:$0xff] }
 0x297   : > { %2909 = vmatpush3.msra.mxu0 %v1919_v39  ;;  %v1912_v46 = vmin.f32 %v1910_v44, 6.0  ;;  %2925 = vmatprep.subr.mxu1 %v2029_v31  ;;  %v2019_v39 = vld [vmem:[%s4384_s15 + $0x20] sm:$0xff] }
 0x298   : > { %2910 = vmatprep.subr.mxu0 %v1918_v42  ;;  %2926 = vmatpush3.msra.mxu1 %v2029_v31  ;;  %v2821_v44 = vld [vmem:[%s4383_s14] ss:$0 sm:$0xff] }
 0x299   : > { %2911 = vmatpush3.msra.mxu0 %v1918_v42  ;;  %2920 = vmatprep.mubr.msk.f32.mxu0 %vm1929_vm6, %v1912_v46  ;;  %v2016_v42 = vld [vmem:[%s4384_s15 + $0x8] sm:$0xff] }
 0x29a   : > { %2912 = vmatprep.subr.mxu0 %v1917_v45  ;;  %2927 = vmatprep.subr.mxu1 %v2028_v7 }
 0x29b   : > { %2913 = vmatpush3.msra.mxu0 %v1917_v45  ;;  %2928 = vmatpush3.msra.mxu1 %v2028_v7  ;;  %v2398_v7 = vld [vmem:[%s4439_s6 + $0x18] sm:$0xff] }
 0x29c   : > { %2914 = vmatprep.subr.mxu0 %v1916_v47  ;;  %2929 = vmatprep.subr.mxu1 %v2027_v9 }
 0x29d   : > { %2915 = vmatpush3.msra.mxu0 %v1916_v47  ;;  %2930 = vmatpush3.msra.mxu1 %v2027_v9  ;;  %v2397_v9 = vld [vmem:[%s4439_s6 + $0x10] sm:$0xff] }
 0x29e   : > { %2916 = vmatprep.subr.mxu0 %v1915_v49  ;;  %2931 = vmatprep.subr.mxu1 %v2026_v32 }
 0x29f   : > { %2917 = vmatpush3.msra.mxu0 %v1915_v49  ;;  %2932 = vmatpush3.msra.mxu1 %v2026_v32  ;;  %v2395_v32 = vld [vmem:[%s4439_s6] sm:$0xff] }
 0x2a0   : > { %2918 = vmatprep.subr.mxu0 %v1914_v50  ;;  %2933 = vmatprep.subr.mxu1 %v2025_v33 }
 0x2a1   : > { %2919 = vmatpush3.msra.mxu0 %v1914_v50  ;;  %2934 = vmatpush3.msra.mxu1 %v2025_v33  ;;  %v2378_v33 = vld [vmem:[%s3278_s24] sm:$0x3] }
 0x2a2   : > { %2921 = vmatmul.mubr.msk.f32.vlgmr.msra.gmra.mxu0 %vm1929_vm6, %v1913_v51  ;;  %2958 = vmatprep.subr.mxu0 %v3091_v5 }
 0x2a3   : > { %2935 = vmatprep.subr.mxu1 %v2024_v34  ;;  %2960 = vmatprep.mubr.msk.f32.mxu0 %vm3093_vm12, %v3091_v5 }
 0x2a4   : > { %2936 = vmatpush3.msra.mxu1 %v2024_v34  ;;  %v2394_v34 = vld [vmem:[%s4440_s9 + $0x78] sm:$0xff] }
 0x2a5   : > { %2937 = vmatprep.subr.mxu1 %v2023_v35 }
 0x2a6   : > { %2938 = vmatpush3.msra.mxu1 %v2023_v35  ;;  %v2393_v35 = vld [vmem:[%s4441_s7 + $0x70] sm:$0xff] }
 0x2a7   : > { %2939 = vmatprep.subr.mxu1 %v2022_v36 }
 0x2a8   : > { %2940 = vmatpush3.msra.mxu1 %v2022_v36  ;;  %v2392_v36 = vld [vmem:[%s4441_s7 + $0x68] sm:$0xff] }
 0x2a9   : > { %2941 = vmatprep.subr.mxu1 %v2021_v37 }
 0x2aa   : > { %2942 = vmatpush3.msra.mxu1 %v2021_v37  ;;  %v2391_v37 = vld [vmem:[%s4441_s7 + $0x60] sm:$0xff] }
 0x2ab   : > { %2943 = vmatprep.subr.mxu1 %v2020_v38 }
 0x2ac   : > { %2944 = vmatpush3.msra.mxu1 %v2020_v38  ;;  %v2390_v38 = vld [vmem:[%s4441_s7 + $0x58] sm:$0xff] }
 0x2ad   : > { %2945 = vmatprep.subr.mxu1 %v2019_v39 }
 0x2ae   : > { %2946 = vmatpush3.msra.mxu1 %v2019_v39  ;;  %v2389_v39 = vld [vmem:[%s4441_s7 + $0x50] sm:$0xff] }
 0x2af   : > { %2947 = vmatprep.subr.mxu1 %v2018_v40 }
 0x2b0   : > { %2948 = vmatpush3.msra.mxu1 %v2018_v40  ;;  %v2388_v40 = vld [vmem:[%s4441_s7 + $0x48] sm:$0xff] }
 0x2b1   : > { %2949 = vmatprep.subr.mxu1 %v2017_v41 }
 0x2b2   : > { %2950 = vmatpush3.msra.mxu1 %v2017_v41  ;;  %v2387_v41 = vld [vmem:[%s4441_s7 + $0x40] sm:$0xff] }
 0x2b3   : > { %2951 = vmatprep.subr.mxu1 %v2016_v42 }
 0x2b4   : > { %2952 = vmatpush3.msra.mxu1 %v2016_v42  ;;  %v2386_v42 = vld [vmem:[%s4441_s7 + $0x38] sm:$0xff] }
 0x2b5   : > { %2953 = vmatprep.subr.mxu1 %v2015_v43 }
 0x2b6   : > { %2954 = vmatpush3.msra.mxu1 %v2015_v43  ;;  %v2385_v43 = vld [vmem:[%s4441_s7 + $0x30] sm:$0xff] }
 0x2b7   : > { %3014 = vmatprep.subr.mxu1 %v3091_v5 }
 0x352   : > { %v1803_v11 = vpop.f32.mrf.mxu0 }
 0x353   : > { %v1804_v13 = vadd.f32 %v1803_v11, %v1730_v2 }
 0x354   : > { %v1805_v14 = vpop.f32.mrf.mxu0 }
 0x355   : > { %v1806_v15 = vadd.f32 %v1805_v14, %v1734_v8  ;;  %v2159_v21 = vmul.f32 %v2142_v17, %v1804_v13 }
 0x356   : > { %v1809_v19 = vpop.f32.mrf.mxu0 }
 0x357   : > { %v1810_v20 = vadd.f32 %v1809_v19, %v1730_v2  ;;  %v2160_v22 = vmul.f32 %v2146_v18, %v1806_v15  ;;  %v2824_v15 = vld [vmem:[%s4385_s16] ss:$0 sm:$0xff]  ;;  %v2558_v19 = vld [vmem:[%s4394_s25 + $0x18] sm:$0xff] }
 0x358   : > { %v1811_v23 = vpop.f32.mrf.mxu0 }
 0x359   : > { %v1812_v25 = vadd.f32 %v1811_v23, %v1734_v8  ;;  %v2163_v26 = vadd.f32 %v2160_v22, %v2159_v21  ;;  %v2161_v27 = vmul.f32 %v2150_v24, %v1810_v20  ;;  %v2557_v20 = vld [vmem:[%s4394_s25 + $0x10] sm:$0xff]  ;;  %v2556_v21 = vld [vmem:[%s4394_s25 + $0x8] sm:$0xff]  ;;  %v2555_v22 = vld [vmem:[%s4394_s25] sm:$0xff] }
 0x35a   : > { %v4254_v23 = vld [vmem:[#allocation2] sm:$0x3] }
 0x35b   : > { %v2162_v28 = vmul.f32 %v2154_v12, %v1812_v25  ;;  %2164 = vadd.xlane.f32.xlu0 %v2163_v26 }
 0x35d   : > { %v2166_v29 = vadd.f32 %v2162_v28, %v2161_v27 }
 0x35f   : > { %2167 = vadd.xlane.f32.xlu0 %v2166_v29 }
 0x362   : > { %v2922_v45 = vpop.f32.mrf.mxu0 }
 0x363   : > { %v2008_v46 = vadd.f32 %v2922_v45, %v2821_v44  ;;  %v2383_v45 = vld [vmem:[%s4441_s7 + $0x20] sm:$0xff] }
 0x364   : > { %v2002_v47 = vpop.f32.mrf.mxu0 }
 0x365   : > { %v2012_v48 = vmax.f32 %v2008_v46, 0.0  ;;  %v2003_v49 = vadd.f32 %v2821_v44, %v2002_v47  ;;  %v2384_v44 = vld [vmem:[%s4441_s7 + $0x28] sm:$0xff]  ;;  %v2382_v46 = vld [vmem:[%s4441_s7 + $0x18] sm:$0xff]  ;;  %v2381_v47 = vld [vmem:[%s4441_s7 + $0x10] sm:$0xff] }
 0x367   : > { %v2011_v50 = vmax.f32 %v2003_v49, 0.0  ;;  %v2014_v51 = vmin.f32 %v2012_v48, 6.0  ;;  %v2380_v48 = vld [vmem:[%s4441_s7 + $0x8] sm:$0xff]  ;;  %v2379_v49 = vld [vmem:[%s4441_s7] sm:$0xff] }
 0x369   : > { %v2013_v52 = vmin.f32 %v2011_v50, 6.0  ;;  %v2829_v50 = vld [vmem:[%s4442_s12] ss:$0 sm:$0xff] }
 0x36b   : > { %2955 = vmatprep.mubr.f32.mxu1 %v2013_v52 }
 0x36c   : > { %2956 = vmatmul.mubr.f32.vlgmr.msra.gmra.mxu1 %v2014_v51 }
 0x36d   : > { %3022 = vmatprep.mubr.msk.f32.mxu1 %vm3093_vm12, %v3091_v5  ;;  %3015 = vmatpush3.msra.mxu1 %v2558_v19 }
 0x36e   : > { %3016 = vmatprep.subr.mxu1 %v3091_v5 }
 0x36f   : > { %3017 = vmatpush3.msra.mxu1 %v2557_v20 }
 0x370   : > { %3018 = vmatprep.subr.mxu1 %v3091_v5 }
 0x371   : > { %3019 = vmatpush3.msra.mxu1 %v2556_v21 }
 0x372   : > { %3020 = vmatprep.subr.mxu1 %v3091_v5 }
 0x373   : > { %3021 = vmatpush3.msra.mxu1 %v2555_v22 }
 0x374   : > { %3023 = vmatmul.mubr.msk.f32.vlgmr.msra.gmra.mxu1 %vm1009_vm1, %v4254_v23 }
 0x3e4   : > { %v2165_v54 = vpop.xlane.xlu0 %2164 }
 0x3e5   : > { %v2171_v55 = vmul.f32 0.2, %v2165_v54  ;;  %vm2169_vm7 = vcmp.ge.f32.partialorder %v2165_v54, 0.0 }
 0x3e7   : > { %v2173_v58 = vsel %vm2169_vm7, %v2165_v54, %v2171_v55 }
 0x3e8   : > { %v2168_v57 = vpop.xlane.xlu0 %2167  ;;  %v2183_v62 = vrot.slane %v2173_v58, %v2182_v56 }
 0x3e9   : > { %vm2170_vm8 = vcmp.ge.f32.partialorder %v2168_v57, 0.0  ;;  %v2172_v59 = vmul.f32 0.2, %v2168_v57 }
 0x3eb   : > { %v2174_v61 = vsel %vm2170_vm8, %v2168_v57, %v2172_v59 }
 0x3ec   : > { %v2187_v0 = vrot.slane %v2174_v61, %v2182_v56 }
 0x3ee   : > { %v2189_v1 = vsel %vm2188_vm9, %v2187_v0, %v2183_v62  ;;  %v2828_v62 = vld [vmem:[%s4443_s3] ss:$0 sm:$0xff] }
 0x3ef   : > { %v2191_v2 = vsel %vm2175_vm10, %v2189_v1, -1e+30 }
 0x3f0   : > { %v2193_v4 = vsel %vm2192_vm11, %v2191_v2, -inf }
 0x3f1   : > { %2194 = vmax.xlane.f32.xlu1 %v2193_v4 }
 0x42c   : > { %v2957_v14 = vpop.f32.mrf.mxu1 }
 0x42d   : > { %v2110_v17 = vadd.f32 %v2957_v14, %v2824_v15 }
 0x42e   : > { %v2104_v16 = vpop.f32.mrf.mxu1 }
 0x42f   : > { %v2105_v18 = vadd.f32 %v2824_v15, %v2104_v16 }
 0x431   : > { %2959 = vmatpush3.msra.mxu0 %v2105_v18 }
 0x432   : > { %2963 = vmatprep.subr.mxu0 %v3091_v5 }
 0x434   : > { %v2632_v51 = vpop.f32.mrf.mxu1 }
 0x435   : > { %v2633_v52 = vadd.f32 %v2829_v50, %v2632_v51 }
 0x436   : > { %v3024_v53 = vpop.f32.mrf.mxu1 }
 0x437   : > { %2644 = vrot.lane.b32.xlu0 %v2633_v52, %s3094_s4 }
 0x47a   : > { %v2195_v3 = vpop.xlane.xlu1 %2194 }
 0x47b   : > { %v2196_v8 = vsub.f32 %v2191_v2, %v2195_v3 }
 0x47d   : > { %v2197_v10 = vmul.f32 1.442695, %v2196_v8 }
 0x47f   : > { %3056 = vpow2.f32 %v2197_v10 }
 0x48c   : > { %v3057_v6 = vpop.eup %3056 }
 0x48d   : > { %v2199_v11 = vsel %vm2175_vm10, %v3057_v6, 0.0 }
 0x48e   : > { %v2200_v13 = vsel %vm2192_vm11, %v2199_v11, 0.0 }
 0x48f   : > { %2201 = vadd.xlane.f32.xlu1 %v2200_v13 }
 0x4a9   : > { %v2645_v6 = vpop.permute.xlu0 %2644 }
 0x518   : > { %v2202_v24 = vpop.xlane.xlu1 %2201 }
 0x519   : > { %v2204_v25 = vmax.f32 %v2202_v24, 1e-30  ;;  %vm2203_vm13 = vcmp.gt.f32.partialorder %v2202_v24, 0.0 }
 0x51b   : > { %3058 = vrcp.f32 %v2204_v25 }
 0x528   : > { %v3059_v12 = vpop.eup %3058 }
 0x529   : > { %v2206_v26 = vmul.f32 %v3059_v12, %v2199_v11 }
 0x52b   : > { %v2209_v27 = vsel %vm2203_vm13, %v2206_v26, 0.0 }
 0x52c   : > { %v2217_v28 = vrot.slane %v2209_v27, %v4161_v63 }
 0x52e   : > { %v2218_v29 = vcombine.high %v2217_v28, %v2217_v28  ;;  %v2225_v30 = vrot.slane %v2217_v28, %v4161_v63 }
 0x530   : > { %2961 = vmatmul.mubr.msk.f32.vlgmr.msra.gmra.mxu0 %vm2233_vm14, %v2225_v30  ;;  %v2232_v31 = vrot.slane %v2218_v29, %v4161_v63  ;;  %v2396_v63 = vld [vmem:[%s4439_s6 + $0x8] sm:$0xff] }
 0x531   : > { %2964 = vmatpush3.msra.mxu0 %v2110_v17  ;;  %2965 = vmatprep.mubr.msk.f32.mxu0 %vm3093_vm12, %v3091_v5 }
 0x532   : > { %2968 = vmatprep.subr.mxu0 %v3091_v5 }
 0x534   : > { %2966 = vmatmul.mubr.msk.f32.vlgmr.msra.gmra.mxu0 %vm2233_vm14, %v2232_v31 }
 0x535   : > { %2969 = vmatpush3.msra.mxu0 %v2398_v7  ;;  %2976 = vmatprep.mubr.msk.f32.mxu0 %vm3093_vm12, %v3091_v5 }
 0x536   : > { %2970 = vmatprep.subr.mxu0 %v3091_v5 }
 0x537   : > { %2971 = vmatpush3.msra.mxu0 %v2397_v9 }
 0x538   : > { %2972 = vmatprep.subr.mxu0 %v3091_v5 }
 0x539   : > { %2973 = vmatpush3.msra.mxu0 %v2396_v63 }
 0x53a   : > { %2974 = vmatprep.subr.mxu0 %v3091_v5 }
 0x53b   : > { %2975 = vmatpush3.msra.mxu0 %v2395_v32 }
 0x53c   : > { %2977 = vmatmul.mubr.msk.f32.vlgmr.msra.gmra.mxu0 %vm1009_vm1, %v2378_v33  ;;  %2979 = vmatprep.subr.mxu0 %v3091_v5 }
 0x53d   : > { %2980 = vmatpush3.msra.mxu0 %v2394_v34  ;;  %3011 = vmatprep.mubr.msk.f32.mxu0 %vm3093_vm12, %v3091_v5 }
 0x53e   : > { %2981 = vmatprep.subr.mxu0 %v3091_v5 }
 0x53f   : > { %2982 = vmatpush3.msra.mxu0 %v2393_v35 }
 0x540   : > { %2983 = vmatprep.subr.mxu0 %v3091_v5 }
 0x541   : > { %2984 = vmatpush3.msra.mxu0 %v2392_v36 }
 0x542   : > { %2985 = vmatprep.subr.mxu0 %v3091_v5 }
 0x543   : > { %2986 = vmatpush3.msra.mxu0 %v2391_v37 }
 0x544   : > { %2987 = vmatprep.subr.mxu0 %v3091_v5 }
 0x545   : > { %2988 = vmatpush3.msra.mxu0 %v2390_v38 }
 0x546   : > { %2989 = vmatprep.subr.mxu0 %v3091_v5 }
 0x547   : > { %2990 = vmatpush3.msra.mxu0 %v2389_v39 }
 0x548   : > { %2991 = vmatprep.subr.mxu0 %v3091_v5 }
 0x549   : > { %2992 = vmatpush3.msra.mxu0 %v2388_v40 }
 0x54a   : > { %2993 = vmatprep.subr.mxu0 %v3091_v5 }
 0x54b   : > { %2994 = vmatpush3.msra.mxu0 %v2387_v41 }
 0x54c   : > { %2995 = vmatprep.subr.mxu0 %v3091_v5 }
 0x54d   : > { %2996 = vmatpush3.msra.mxu0 %v2386_v42 }
 0x54e   : > { %2997 = vmatprep.subr.mxu0 %v3091_v5 }
 0x54f   : > { %2998 = vmatpush3.msra.mxu0 %v2385_v43 }
 0x550   : > { %2999 = vmatprep.subr.mxu0 %v3091_v5 }
 0x551   : > { %3000 = vmatpush3.msra.mxu0 %v2384_v44 }
 0x552   : > { %3001 = vmatprep.subr.mxu0 %v3091_v5 }
 0x553   : > { %3002 = vmatpush3.msra.mxu0 %v2383_v45 }
 0x554   : > { %3003 = vmatprep.subr.mxu0 %v3091_v5 }
 0x555   : > { %3004 = vmatpush3.msra.mxu0 %v2382_v46 }
 0x556   : > { %3005 = vmatprep.subr.mxu0 %v3091_v5 }
 0x557   : > { %3006 = vmatpush3.msra.mxu0 %v2381_v47 }
 0x558   : > { %3007 = vmatprep.subr.mxu0 %v3091_v5 }
 0x559   : > { %3008 = vmatpush3.msra.mxu0 %v2380_v48 }
 0x55a   : > { %3009 = vmatprep.subr.mxu0 %v3091_v5 }
 0x55b   : > { %3010 = vmatpush3.msra.mxu0 %v2379_v49 }
 0x5f0   : > { %v2302_v54 = vpop.f32.mrf.mxu0 }
 0x5f2   : > { %v2962_v55 = vpop.f32.mrf.mxu0 }
 0x5f4   : > { %v2374_v56 = vpop.f32.mrf.mxu0 }
 0x5f5   : > { %v2474_v57 = vrot.slane %v2374_v56, 7 }
 0x5f6   : > { %v2967_v58 = vpop.f32.mrf.mxu0 }
 0x5f7   : > { %v2475_v59 = vsel %vm2188_vm9, %v2474_v57, %v2302_v54 }
 0x5f8   : > { %3012 = vmatmul.mubr.f32.vlgmr.msra.gmra.mxu0 %v2475_v59 }
 0x5fc   : > { %v2468_v60 = vpop.f32.mrf.mxu0 }
 0x5fe   : > { %v2978_v5 = vpop.f32.mrf.mxu0 }
 0x6b8   : > { %v2543_v61 = vpop.f32.mrf.mxu0 }
 0x6b9   : > { %v2544_v0 = vadd.f32 %v2543_v61, %v2468_v60 }
 0x6ba   : > { %v3013_v1 = vpop.f32.mrf.mxu0 }
 0x6bb   : > { %v2554_v2 = vadd.f32 %v2828_v62, %v2544_v0 }
 0x6bd   : > { %v2636_v4 = vadd.f32 %v2633_v52, %v2554_v2 }
 0x6bf   : > { %v2831_v3 = vmul.f32 -1.442695, %v2636_v4 }
 0x6c1   : > { %3060 = vpow2.f32 %v2831_v3 }
 0x6ce   : > { %v3061_v8 = vpop.eup %3060 }
 0x6cf   : > { %v2640_v10 = vadd.f32 1.0, %v3061_v8 }
 0x6d1   : > { %3062 = vrcp.f32 %v2640_v10 }
 0x6de   : > { %v3063_v11 = vpop.eup %3062 }
 0x6df   : > { %v2647_v13 = vmul.f32 %v3063_v11, %v2645_v6  ;;  %v2654_v18 = vsub.f32 1.0, %v3063_v11 }
 0x6e1   : > { %2649 = vrot.lane.b32.xlu1 %v2647_v13, %s3094_s4 }
 0x753   : > { %v2650_v14 = vpop.permute.xlu1 %2649 }
 0x754   : > { %v2652_v15 = vadd.f32 %v2650_v14, %v2554_v2 }
 0x756   : > { %3064 = vtanh.f32 %v2652_v15 }
 0x763   : > { %v3065_v16 = vpop.eup %3064 }
 0x764   : > { %2656 = vrot.lane.b32.xlu1 %v3065_v16, %s3095_s0 }
 0x768   : > { %2660 = vrot.lane.b32.xlu1 %v4254_v23, %s3096_s11 }
 0x7d6   : > { %v2657_v17 = vpop.permute.xlu1 %2656 }
 0x7d7   : > { %v2659_v20 = vmul.f32 %v2657_v17, %v2654_v18 }
 0x7da   : > { %v2661_v19 = vpop.permute.xlu1 %2660 }
 0x7db   : > { %v2663_v21 = vmul.f32 %v3063_v11, %v2661_v19 }
 0x7dd   : > { %v2664_v22 = vadd.f32 %v2663_v21, %v2659_v20 }
 0x7df   : > { %2666 = vrot.lane.b32.xlu0 %v2664_v22, %s3095_s0 }
 0x851   : > { %v2667_v24 = vpop.permute.xlu0 %2666 }
 0x852   : > { %2670 = vst.msk [vmem:[#allocation2] sm:$0x3] %vm2669_vm15, %v2667_v24  ;;  %2671 = vst.msk [vmem:[%s4444_s2] sm:$0x3] %vm2669_vm15, %v2667_v24 }
 0x853 PF: > { %s4445_s5 = sld [smem:[#allocation4_spill]] }
 0x854   : > { %s4446_s8 = sld [smem:[#allocation3_spill]] }
 0x859   : > { %s38_s9 = sadd.s32 1, %s4445_s5   ;;  %s4447_s5 = sld [smem:[#allocation5_spill]] }
 0x85a   : > { %p35_p6 = scmp.ge.s32.totalorder %s38_s9, 9  }
 0x85c   :  { %37 = sbr.rel (!%p35_p6) target bundleno = 19 (0x13), region = 178 }

</bundles_post_ra>
